<compile_context>
chip_gen: v7x
topology: tpu7x:2x2x1
jax: 0.10.0
libtpu: 0.0.40
codegen_flags: <defaults>
</compile_context>

<pallas_src>
import functools

import jax
import jax.numpy as jnp
from jax import lax
from jax.experimental import pallas as pl
from jax.experimental.pallas import tpu as pltpu

EPS = 1e-5
LANE = 128


def _round_up(n, m):
    return (n + m - 1) // m * m


# ----------------------------- Pallas kernels -------------------------------


def _bn_scale_shift(sum_ref, ssq_ref, g_ref, be_ref, inv_m):
    """Fold train-mode BN into a per-channel FMA: y * scale + shift."""
    mean = sum_ref[...] * inv_m
    # One-pass biased variance, clamped >= 0 (f32 catastrophic cancellation safety).
    var = jnp.maximum(ssq_ref[...] * inv_m - mean * mean, 0.0)
    scale = g_ref[...] * lax.rsqrt(var + EPS)
    shift = be_ref[...] - mean * scale
    return scale, shift


def _stage1_kernel(ho, wo, stride, inv_m,
                   xph_ref, w_ref, g_ref, be_ref,
                   o_ref, sum_ref, ssq_ref):
    """conv1 (3x3, stride s, pad 1) + BN1 (batch stats) + ReLU, halo'd output.

    grid = (phase, batch-block).  Phase 0: accumulate per-channel sum/sumsq of the raw
    conv output over the whole batch.  Phase 1: recompute the conv and apply the folded
    BN FMA + ReLU, writing interior + an explicit 1-px zero halo for stage 2.
    """
    p = pl.program_id(0)
    nb = pl.program_id(1)
    nbk = xph_ref.shape[1]                               # images per grid step
    cin = xph_ref.shape[-1]
    cp = w_ref.shape[-1]
    m = nbk * ho * wo

    @pl.when((p == 0) & (nb == 0))
    def _init():
        sum_ref[...] = jnp.zeros_like(sum_ref)
        ssq_ref[...] = jnp.zeros_like(ssq_ref)

    # In-kernel 3x3 conv as ONE bf16 MXU matmul with K = 9*Cin: the wrapper has
    # space-to-depth'd the padded input into stride-phase planes, so every tap is a
    # contiguous static slice; taps are concatenated along the contraction dim.
    xall = xph_ref[...]                                  # (s*s, NB, Hs, Ws, Cin) bf16
    taps = []
    for kh in range(3):
        for kw in range(3):
            plane = xall[(kh % stride) * stride + (kw % stride)]
            patch = plane[:, kh // stride:kh // stride + ho,
                          kw // stride:kw // stride + wo, :]
            taps.append(patch.reshape(m, cin))
    lhs = jnp.concatenate(taps, axis=-1)                 # (M, 9*Cin)
    acc = jnp.dot(lhs, w_ref[...], preferred_element_type=jnp.float32)

    @pl.when(p == 0)
    def _accumulate_stats():
        sum_ref[...] += jnp.sum(acc, axis=0, keepdims=True)
        ssq_ref[...] += jnp.sum(acc * acc, axis=0, keepdims=True)

    @pl.when(p == 1)
    def _apply():
        scale, shift = _bn_scale_shift(sum_ref, ssq_ref, g_ref, be_ref, inv_m)
        y = jnp.maximum(acc * scale + shift, 0.0)        # fused BN FMA + ReLU
        y = y.reshape(nbk, ho, wo, cp).astype(o_ref.dtype)
        # Interior store + four thin zero strips: no full (ho+2)x(wo+2) temp.
        o_ref[:, 1:ho + 1, 1:wo + 1, :] = y
        zrow = jnp.zeros((nbk, 1, wo + 2, cp), o_ref.dtype)
        o_ref[:, 0:1, :, :] = zrow
        o_ref[:, ho + 1:ho + 2, :, :] = zrow
        zcol = jnp.zeros((nbk, ho, 1, cp), o_ref.dtype)
        o_ref[:, 1:ho + 1, 0:1, :] = zcol
        o_ref[:, 1:ho + 1, wo + 1:wo + 2, :] = zcol


def _stage2_kernel(ho, wo, inv_m, use_sc_conv, *refs):
    """conv2 (3x3, stride 1) + BN2, shortcut (1x1 conv + BN, or identity), add, ReLU.

    Same two-phase BN-stat scheme as stage 1; everything fused in one kernel.
    """
    if use_sc_conv:
        (o1_ref, xs_ref, w2_ref, g2_ref, be2_ref, ws_ref, gs_ref, bes_ref,
         o_ref, s2_sum, s2_ssq, sc_sum, sc_ssq) = refs
    else:
        (o1_ref, xs_ref, w2_ref, g2_ref, be2_ref,
         o_ref, s2_sum, s2_ssq) = refs

    p = pl.program_id(0)
    nb = pl.program_id(1)
    nbk = o1_ref.shape[0]
    cp = w2_ref.shape[-1]
    m = nbk * ho * wo

    @pl.when((p == 0) & (nb == 0))
    def _init():
        s2_sum[...] = jnp.zeros_like(s2_sum)
        s2_ssq[...] = jnp.zeros_like(s2_ssq)
        if use_sc_conv:
            sc_sum[...] = jnp.zeros_like(sc_sum)
            sc_ssq[...] = jnp.zeros_like(sc_ssq)

    # conv2: the stage-1 output already carries a zero halo, so taps are plain slices.
    # TODO(synk): on v6e/v7x concatenate tap pairs along K (K = 2*Cp = 256) or rely on
    # MRB in-place accumulation to cut the eight f32 accumulate passes.
    o1 = o1_ref[...]                                     # (NB, ho+2, wo+2, Cp) bf16
    acc2 = jnp.zeros((m, cp), jnp.float32)
    for kh in range(3):
        for kw in range(3):
            patch = o1[:, kh:kh + ho, kw:kw + wo, :].reshape(m, cp)
            acc2 = acc2 + jnp.dot(patch, w2_ref[kh * 3 + kw],
                                  preferred_element_type=jnp.float32)

    def shortcut_acc():
        xs = xs_ref[...]
        if use_sc_conv:
            return jnp.dot(xs.reshape(m, -1), ws_ref[...],
                           preferred_element_type=jnp.float32)
        return xs.reshape(m, cp).astype(jnp.float32)     # identity shortcut

    @pl.when(p == 0)
    def _accumulate_stats():
        s2_sum[...] += jnp.sum(acc2, axis=0, keepdims=True)
        s2_ssq[...] += jnp.sum(acc2 * acc2, axis=0, keepdims=True)
        if use_sc_conv:
            a = shortcut_acc()
            sc_sum[...] += jnp.sum(a, axis=0, keepdims=True)
            sc_ssq[...] += jnp.sum(a * a, axis=0, keepdims=True)

    @pl.when(p == 1)
    def _apply():
        scale2, shift2 = _bn_scale_shift(s2_sum, s2_ssq, g2_ref, be2_ref, inv_m)
        y = acc2 * scale2 + shift2
        a = shortcut_acc()
        if use_sc_conv:
            scale_sc, shift_sc = _bn_scale_shift(sc_sum, sc_ssq, gs_ref, bes_ref, inv_m)
            y = y + (a * scale_sc + shift_sc)
        else:
            y = y + a
        o_ref[...] = jnp.maximum(y, 0.0).reshape(nbk, ho, wo, cp).astype(o_ref.dtype)


# ------------------------------- glue (JAX) ---------------------------------


def _phase_split(xp, s):
    """Space-to-depth relabel: (B, Hp, Wp, C) -> (s*s, B, Hp//s, Wp//s, C) with
    plane[di*s + dj, b] == xp[b, di::s, dj::s, :].  Zero data blow-up; lets the kernel
    implement the strided conv with only contiguous static slices."""
    B, Hp, Wp, C = xp.shape
    Hs, Ws = Hp // s, Wp // s
    x = xp.reshape(B, Hs, s, Ws, s, C)
    x = jnp.transpose(x, (2, 4, 0, 1, 3, 5))             # (s, s, B, Hs, Ws, C)
    return x.reshape(s * s, B, Hs, Ws, C)


def _pad_vec(v, cp):
    return jnp.pad(v.astype(jnp.float32), (0, cp - v.shape[0])).reshape(1, cp)


def _pick_batch_block(B, ho, wo, cp, cin):
    """Images per grid step: enough rows (M = NB*ho*wo >= ~512) to feed the MXU, small
    enough to stay well inside VMEM (double-buffered blocks + live f32 accumulator)."""
    target = max(1, 512 // max(1, ho * wo))
    per_img = ((ho + 2) * (wo + 2) * cp * 2 * 2          # halo'd stage-1 out bf16, 2-buf
               + ho * wo * cp * 2 * 2                    # stage-2 out bf16, 2-buf
               + ho * wo * max(cin, cp) * 2 * 2          # shortcut input bf16, 2-buf
               + ho * wo * cp * 4)                       # live f32 accumulator
    vmem_cap = max(1, (24 << 20) // max(1, per_img))
    cap = max(1, min(target, vmem_cap, 8, B))
    for d in range(cap, 0, -1):
        if B % d == 0:
            return d
    return 1


def res_basic_blk_forward(x_nchw, params, stride):
    """ResBasicBlk forward (training-mode BN).  x_nchw: (B, Cin, H, W) f32 -> NCHW f32.

    params = (w1, b1, g1, be1, w2, b2, g2, be2, ws, bs, gs, bes); conv weights in HWIO.
    The last four are None when Cin == Cout (identity shortcut, as in the module).
    Conv biases are accepted but unused (cancelled by train-mode BN mean subtraction).
    """
    (w1, _b1, g1, be1, w2, _b2, g2, be2, ws, _bs, gs, bes) = params
    use_sc_conv = ws is not None

    B, Cin, H, W = x_nchw.shape
    Cout = w1.shape[-1]
    ho = (H + 2 - 3) // stride + 1
    wo = (W + 2 - 3) // stride + 1
    M = B * ho * wo
    Cp = _round_up(Cout, LANE)                 # lane-dense channel layout
    inv_m = 1.0 / M
    NB = _pick_batch_block(B, ho, wo, Cp, Cin)

    x = jnp.transpose(x_nchw, (0, 2, 3, 1)).astype(jnp.float32)     # NCHW -> NHWC

    cparams = pltpu.CompilerParams(
        # Phase axis is sequential by construction; the batch axis carries the shared
        # BN-stat accumulators, so both stay 'arbitrary'.  (TODO(synk): v7x 2-TC split.)
        dimension_semantics=("arbitrary", "arbitrary"),
        vmem_limit_bytes=48 * 1024 * 1024)

    # ---------------- stage 1: conv1 + BN1 + ReLU (halo'd output) ----------------
    xp = jnp.pad(x, ((0, 0), (1, 1), (1, 1), (0, 0)))
    Hp, Wp = H + 2, W + 2
    xp = jnp.pad(xp, ((0, 0), (0, (-Hp) % stride), (0, (-Wp) % stride), (0, 0)))
    xph = _phase_split(xp, stride).astype(jnp.bfloat16)  # (s*s, B, Hs, Ws, Cin)
    ss, Hs, Ws = stride * stride, xph.shape[2], xph.shape[3]

    w1p = jnp.pad(w1, ((0, 0), (0, 0), (0, 0), (0, Cp - Cout)))
    w1p = w1p.reshape(9 * Cin, Cp).astype(jnp.bfloat16)  # K-concat weight layout
    g1p, be1p = _pad_vec(g1, Cp), _pad_vec(be1, Cp)

    out1p = pl.pallas_call(
        functools.partial(_stage1_kernel, ho, wo, stride, inv_m),
        grid=(2, B // NB),
        in_specs=[
            pl.BlockSpec((ss, NB, Hs, Ws, Cin), lambda p, nb: (0, nb, 0, 0, 0)),
            pl.BlockSpec((9 * Cin, Cp), lambda p, nb: (0, 0)),
            pl.BlockSpec((1, Cp), lambda p, nb: (0, 0)),
            pl.BlockSpec((1, Cp), lambda p, nb: (0, 0)),
        ],
        # Phase 0 never writes: pin its output block index to 0 so no garbage blocks
        # are DMA'd back to HBM (block 0 is overwritten by phase-1/nb=0 before the
        # first real writeback).
        out_specs=pl.BlockSpec((NB, ho + 2, wo + 2, Cp),
                               lambda p, nb: (p * nb, 0, 0, 0)),
        out_shape=jax.ShapeDtypeStruct((B, ho + 2, wo + 2, Cp), jnp.bfloat16),
        scratch_shapes=[pltpu.VMEM((1, Cp), jnp.float32),
                        pltpu.VMEM((1, Cp), jnp.float32)],
        compiler_params=cparams,
        cost_estimate=pl.CostEstimate(
            flops=int(2 * 2 * M * 9 * Cin * Cp), transcendentals=0,
            bytes_accessed=int(2 * xph.size * 2 + B * (ho + 2) * (wo + 2) * Cp * 2)),
    )(xph, w1p, g1p, be1p)

    # ------ stage 2: conv2 + BN2, shortcut (+BN or identity), add, ReLU (fused) ------
    w2p = jnp.pad(w2, ((0, 0), (0, 0), (0, Cp - Cout), (0, Cp - Cout)))
    w2p = w2p.reshape(9, Cp, Cp).astype(jnp.bfloat16)
    g2p, be2p = _pad_vec(g2, Cp), _pad_vec(be2, Cp)

    xs = x[:, ::stride, ::stride, :]               # shortcut input (1x1-conv sampling)
    if use_sc_conv:
        xs = xs.astype(jnp.bfloat16)
        wsp = jnp.pad(ws.reshape(Cin, Cout),
                      ((0, 0), (0, Cp - Cout))).astype(jnp.bfloat16)
        gsp, besp = _pad_vec(gs, Cp), _pad_vec(bes, Cp)
        inputs = (out1p, xs, w2p, g2p, be2p, wsp, gsp, besp)
        in_specs = [
            pl.BlockSpec((NB, ho + 2, wo + 2, Cp), lambda p, nb: (nb, 0, 0, 0)),
            pl.BlockSpec((NB, ho, wo, Cin), lambda p, nb: (nb, 0, 0, 0)),
            pl.BlockSpec((9, Cp, Cp), lambda p, nb: (0, 0, 0)),
            pl.BlockSpec((1, Cp), lambda p, nb: (0, 0)),
            pl.BlockSpec((1, Cp), lambda p, nb: (0, 0)),
            pl.BlockSpec((Cin, Cp), lambda p, nb: (0, 0)),
            pl.BlockSpec((1, Cp), lambda p, nb: (0, 0)),
            pl.BlockSpec((1, Cp), lambda p, nb: (0, 0)),
        ]
        scratch = [pltpu.VMEM((1, Cp), jnp.float32) for _ in range(4)]
    else:
        # Identity shortcut (Cin == Cout): shipped bf16, channel-padded.  Its block
        # index is pinned during phase 0 (stats don't need it -> no per-image re-DMA).
        xs = jnp.pad(xs, ((0, 0), (0, 0), (0, 0), (0, Cp - Cout))).astype(jnp.bfloat16)
        inputs = (out1p, xs, w2p, g2p, be2p)
        in_specs = [
            pl.BlockSpec((NB, ho + 2, wo + 2, Cp), lambda p, nb: (nb, 0, 0, 0)),
            pl.BlockSpec((NB, ho, wo, Cp), lambda p, nb: (p * nb, 0, 0, 0)),
            pl.BlockSpec((9, Cp, Cp), lambda p, nb: (0, 0, 0)),
            pl.BlockSpec((1, Cp), lambda p, nb: (0, 0)),
            pl.BlockSpec((1, Cp), lambda p, nb: (0, 0)),
        ]
        scratch = [pltpu.VMEM((1, Cp), jnp.float32) for _ in range(2)]

    outp = pl.pallas_call(
        functools.partial(_stage2_kernel, ho, wo, inv_m, use_sc_conv),
        grid=(2, B // NB),
        in_specs=in_specs,
        # Same phase-0 writeback collapse as stage 1; output is bf16 to halve the
        # largest HBM write (cast back to f32 in the wrapper).
        out_specs=pl.BlockSpec((NB, ho, wo, Cp), lambda p, nb: (p * nb, 0, 0, 0)),
        out_shape=jax.ShapeDtypeStruct((B, ho, wo, Cp), jnp.bfloat16),
        scratch_shapes=scratch,
        compiler_params=cparams,
        cost_estimate=pl.CostEstimate(
            flops=int(2 * 2 * M * (9 * Cp + Cin) * Cp), transcendentals=0,
            bytes_accessed=int(2 * B * (ho + 2) * (wo + 2) * Cp * 2
                               + B * ho * wo * Cp * 2)),
    )(*inputs)

    out = outp[..., :Cout].astype(jnp.float32)             # drop lane padding, f32 out
    return jnp.transpose(out, (0, 3, 1, 2))                # NHWC -> NCHW


# ---------------------------- pure-JAX reference ----------------------------


def _ref_forward(x_nchw, params, stride):
    (w1, b1, g1, be1, w2, b2, g2, be2, ws, bs, gs, bes) = params
    x = jnp.transpose(x_nchw, (0, 2, 3, 1)).astype(jnp.float32)

    def conv(x, w, b, s, pad):
        y = lax.conv_general_dilated(
            x, w, (s, s), [(pad, pad), (pad, pad)],
            dimension_numbers=('NHWC', 'HWIO', 'NHWC'),
            precision=lax.Precision.HIGHEST)
        return y + b.reshape(1, 1, 1, -1)

    def bn(y, g, be):
        mean = jnp.mean(y, axis=(0, 1, 2), keepdims=True)
        var = jnp.mean((y - mean) ** 2, axis=(0, 1, 2), keepdims=True)
        return (y - mean) / jnp.sqrt(var + EPS) * g.reshape(1, 1, 1, -1) \
            + be.reshape(1, 1, 1, -1)

    out = jax.nn.relu(bn(conv(x, w1, b1, stride, 1), g1, be1))
    out = bn(conv(out, w2, b2, 1, 1), g2, be2)
    sc = bn(conv(x, ws, bs, stride, 0), gs, bes) if ws is not None else x
    return jnp.transpose(jax.nn.relu(out + sc), (0, 3, 1, 2))


# ----------------------------------- main ------------------------------------


def _make_params(key, cin, cout, identity_shortcut):
    ks = jax.random.split(key, 12)

    def nrm(k, shape, scale=0.1):
        return scale * jax.random.normal(k, shape, jnp.float32)

    p = [nrm(ks[0], (3, 3, cin, cout)), nrm(ks[1], (cout,)),        # conv1 w, b
         1.0 + nrm(ks[2], (cout,)), nrm(ks[3], (cout,)),            # bn1 gamma, beta
         nrm(ks[4], (3, 3, cout, cout)), nrm(ks[5], (cout,)),       # conv2 w, b
         1.0 + nrm(ks[6], (cout,)), nrm(ks[7], (cout,))]            # bn2 gamma, beta
    if identity_shortcut:
        p += [None, None, None, None]
    else:
        p += [nrm(ks[8], (1, 1, cin, cout)), nrm(ks[9], (cout,)),   # shortcut conv
              1.0 + nrm(ks[10], (cout,)), nrm(ks[11], (cout,))]     # shortcut bn
    return tuple(p)


def _check(out, ref, tag):
    scale = float(jnp.max(jnp.abs(ref))) + 1e-6
    err = float(jnp.max(jnp.abs(out - ref)))
    assert err / scale < 5e-2, f"{tag}: max abs err {err} (ref scale {scale})"


if __name__ == "__main__":
    key = jax.random.PRNGKey(0)
    k_p1, k_p2, k_x1, k_x2 = jax.random.split(key, 4)

    # Case 1: Cin != Cout, stride 2 -> projection shortcut (1x1 conv + BN).
    B, Cin, H, W, Cout, stride = 2, 4, 16, 16, 8, 2
    params = _make_params(k_p1, Cin, Cout, identity_shortcut=False)
    x = jax.random.normal(k_x1, (B, Cin, H, W), jnp.float32)

    fwd = jax.jit(functools.partial(res_basic_blk_forward, stride=stride))
    out = jax.block_until_ready(fwd(x, params))
    assert out.shape == (B, Cout, H // stride, W // stride), out.shape
    _check(out, _ref_forward(x, params, stride), "projection shortcut")

    # Case 2: Cin == Cout, stride 1 -> identity shortcut (nn.Sequential()).
    C2 = 8
    params2 = _make_params(k_p2, C2, C2, identity_shortcut=True)
    x2 = jax.random.normal(k_x2, (B, C2, H, W), jnp.float32)

    fwd2 = jax.jit(functools.partial(res_basic_blk_forward, stride=1))
    out2 = jax.block_until_ready(fwd2(x2, params2))
    assert out2.shape == (B, C2, H, W), out2.shape
    _check(out2, _ref_forward(x2, params2, 1), "identity shortcut")

    print("KERNEL_OK")
</pallas_src>

<mosaic_0001>
module attributes {stable_mosaic.version = 11 : i64} {
  func.func @_stage1_kernel(%arg0: i32, %arg1: i32, %arg2: memref<4x2x9x9x4xbf16, #tpu.memory_space<vmem>>, %arg3: memref<36x128xbf16, #tpu.memory_space<vmem>>, %arg4: memref<1x128xf32, #tpu.memory_space<vmem>>, %arg5: memref<1x128xf32, #tpu.memory_space<vmem>>, %arg6: memref<2x10x10x128xbf16, #tpu.memory_space<vmem>>, %arg7: memref<1x128xf32, #tpu.memory_space<vmem>>, %arg8: memref<1x128xf32, #tpu.memory_space<vmem>>) attributes {dimension_semantics = [#tpu.dimension_semantics<arbitrary>, #tpu.dimension_semantics<arbitrary>], iteration_bounds = array<i64: 2, 1>, scalar_prefetch = 0 : i64, scratch_operands = 2 : i64, tpu.core_type = #tpu.core_type<tc>, window_params = [{transform_indices = @transform_0, window_bounds = array<i64: 4, 2, 9, 9, 4>}, {pipeline_mode = #tpu.pipeline_mode<synchronous>, transform_indices = @transform_1, window_bounds = array<i64: 36, 128>}, {pipeline_mode = #tpu.pipeline_mode<synchronous>, transform_indices = @transform_2, window_bounds = array<i64: 1, 128>}, {pipeline_mode = #tpu.pipeline_mode<synchronous>, transform_indices = @transform_3, window_bounds = array<i64: 1, 128>}, {transform_indices = @transform_4, window_bounds = array<i64: 2, 10, 10, 128>}]} {
    %c0_i32 = arith.constant 0 : i32
    %0 = arith.cmpi eq, %arg0, %c0_i32 : i32
    %c0_i32_0 = arith.constant 0 : i32
    %1 = arith.cmpi eq, %arg1, %c0_i32_0 : i32
    %2 = arith.andi %0, %1 : i1
    %3 = arith.extui %2 : i1 to i32
    %c0_i32_1 = arith.constant 0 : i32
    %4 = arith.cmpi ne, %3, %c0_i32_1 : i32
    scf.if %4 {
      %cst_11 = arith.constant 0.000000e+00 : f32
      %51 = vector.broadcast %cst_11 : f32 to vector<1x128xf32>
      %c0_12 = arith.constant 0 : index
      %c0_13 = arith.constant 0 : index
      %52 = vector.load %arg7[%c0_12, %c0_13] : memref<1x128xf32, #tpu.memory_space<vmem>>, vector<1x128xf32>
      tpu.vector_store %arg7[%c0_12, %c0_13], %51 {strides = array<i32>} : memref<1x128xf32, #tpu.memory_space<vmem>>, vector<1x128xf32>,
      %cst_14 = arith.constant 0.000000e+00 : f32
      %53 = vector.broadcast %cst_14 : f32 to vector<1x128xf32>
      %c0_15 = arith.constant 0 : index
      %c0_16 = arith.constant 0 : index
      %54 = vector.load %arg8[%c0_15, %c0_16] : memref<1x128xf32, #tpu.memory_space<vmem>>, vector<1x128xf32>
      tpu.vector_store %arg8[%c0_15, %c0_16], %53 {strides = array<i32>} : memref<1x128xf32, #tpu.memory_space<vmem>>, vector<1x128xf32>,
    } else {
    }
    %c0 = arith.constant 0 : index
    %c0_2 = arith.constant 0 : index
    %c0_3 = arith.constant 0 : index
    %c0_4 = arith.constant 0 : index
    %c0_5 = arith.constant 0 : index
    %5 = vector.load %arg2[%c0, %c0_2, %c0_3, %c0_4, %c0_5] : memref<4x2x9x9x4xbf16, #tpu.memory_space<vmem>>, vector<4x2x9x9x4xbf16>
    %6 = vector.extract_strided_slice %5 {offsets = [0, 0, 0, 0, 0], sizes = [1, 2, 9, 9, 4], strides = [1, 1, 1, 1, 1]} : vector<4x2x9x9x4xbf16> to vector<1x2x9x9x4xbf16>
    %7 = vector.shape_cast %6 : vector<1x2x9x9x4xbf16> to vector<2x9x9x4xbf16>
    %8 = vector.extract_strided_slice %7 {offsets = [0, 0, 0, 0], sizes = [2, 8, 8, 4], strides = [1, 1, 1, 1]} : vector<2x9x9x4xbf16> to vector<2x8x8x4xbf16>
    %9 = vector.shape_cast %8 : vector<2x8x8x4xbf16> to vector<128x4xbf16>
    %10 = vector.extract_strided_slice %5 {offsets = [1, 0, 0, 0, 0], sizes = [1, 2, 9, 9, 4], strides = [1, 1, 1, 1, 1]} : vector<4x2x9x9x4xbf16> to vector<1x2x9x9x4xbf16>
    %11 = vector.shape_cast %10 : vector<1x2x9x9x4xbf16> to vector<2x9x9x4xbf16>
    %12 = vector.extract_strided_slice %11 {offsets = [0, 0, 0, 0], sizes = [2, 8, 8, 4], strides = [1, 1, 1, 1]} : vector<2x9x9x4xbf16> to vector<2x8x8x4xbf16>
    %13 = vector.shape_cast %12 : vector<2x8x8x4xbf16> to vector<128x4xbf16>
    %14 = vector.extract_strided_slice %5 {offsets = [0, 0, 0, 0, 0], sizes = [1, 2, 9, 9, 4], strides = [1, 1, 1, 1, 1]} : vector<4x2x9x9x4xbf16> to vector<1x2x9x9x4xbf16>
    %15 = vector.shape_cast %14 : vector<1x2x9x9x4xbf16> to vector<2x9x9x4xbf16>
    %16 = vector.extract_strided_slice %15 {offsets = [0, 0, 1, 0], sizes = [2, 8, 8, 4], strides = [1, 1, 1, 1]} : vector<2x9x9x4xbf16> to vector<2x8x8x4xbf16>
    %17 = vector.shape_cast %16 : vector<2x8x8x4xbf16> to vector<128x4xbf16>
    %18 = vector.extract_strided_slice %5 {offsets = [2, 0, 0, 0, 0], sizes = [1, 2, 9, 9, 4], strides = [1, 1, 1, 1, 1]} : vector<4x2x9x9x4xbf16> to vector<1x2x9x9x4xbf16>
    %19 = vector.shape_cast %18 : vector<1x2x9x9x4xbf16> to vector<2x9x9x4xbf16>
    %20 = vector.extract_strided_slice %19 {offsets = [0, 0, 0, 0], sizes = [2, 8, 8, 4], strides = [1, 1, 1, 1]} : vector<2x9x9x4xbf16> to vector<2x8x8x4xbf16>
    %21 = vector.shape_cast %20 : vector<2x8x8x4xbf16> to vector<128x4xbf16>
    %22 = vector.extract_strided_slice %5 {offsets = [3, 0, 0, 0, 0], sizes = [1, 2, 9, 9, 4], strides = [1, 1, 1, 1, 1]} : vector<4x2x9x9x4xbf16> to vector<1x2x9x9x4xbf16>
    %23 = vector.shape_cast %22 : vector<1x2x9x9x4xbf16> to vector<2x9x9x4xbf16>
    %24 = vector.extract_strided_slice %23 {offsets = [0, 0, 0, 0], sizes = [2, 8, 8, 4], strides = [1, 1, 1, 1]} : vector<2x9x9x4xbf16> to vector<2x8x8x4xbf16>
    %25 = vector.shape_cast %24 : vector<2x8x8x4xbf16> to vector<128x4xbf16>
    %26 = vector.extract_strided_slice %5 {offsets = [2, 0, 0, 0, 0], sizes = [1, 2, 9, 9, 4], strides = [1, 1, 1, 1, 1]} : vector<4x2x9x9x4xbf16> to vector<1x2x9x9x4xbf16>
    %27 = vector.shape_cast %26 : vector<1x2x9x9x4xbf16> to vector<2x9x9x4xbf16>
    %28 = vector.extract_strided_slice %27 {offsets = [0, 0, 1, 0], sizes = [2, 8, 8, 4], strides = [1, 1, 1, 1]} : vector<2x9x9x4xbf16> to vector<2x8x8x4xbf16>
    %29 = vector.shape_cast %28 : vector<2x8x8x4xbf16> to vector<128x4xbf16>
    %30 = vector.extract_strided_slice %5 {offsets = [0, 0, 0, 0, 0], sizes = [1, 2, 9, 9, 4], strides = [1, 1, 1, 1, 1]} : vector<4x2x9x9x4xbf16> to vector<1x2x9x9x4xbf16>
    %31 = vector.shape_cast %30 : vector<1x2x9x9x4xbf16> to vector<2x9x9x4xbf16>
    %32 = vector.extract_strided_slice %31 {offsets = [0, 1, 0, 0], sizes = [2, 8, 8, 4], strides = [1, 1, 1, 1]} : vector<2x9x9x4xbf16> to vector<2x8x8x4xbf16>
    %33 = vector.shape_cast %32 : vector<2x8x8x4xbf16> to vector<128x4xbf16>
    %34 = vector.extract_strided_slice %5 {offsets = [1, 0, 0, 0, 0], sizes = [1, 2, 9, 9, 4], strides = [1, 1, 1, 1, 1]} : vector<4x2x9x9x4xbf16> to vector<1x2x9x9x4xbf16>
    %35 = vector.shape_cast %34 : vector<1x2x9x9x4xbf16> to vector<2x9x9x4xbf16>
    %36 = vector.extract_strided_slice %35 {offsets = [0, 1, 0, 0], sizes = [2, 8, 8, 4], strides = [1, 1, 1, 1]} : vector<2x9x9x4xbf16> to vector<2x8x8x4xbf16>
    %37 = vector.shape_cast %36 : vector<2x8x8x4xbf16> to vector<128x4xbf16>
    %38 = vector.extract_strided_slice %5 {offsets = [0, 0, 0, 0, 0], sizes = [1, 2, 9, 9, 4], strides = [1, 1, 1, 1, 1]} : vector<4x2x9x9x4xbf16> to vector<1x2x9x9x4xbf16>
    %39 = vector.shape_cast %38 : vector<1x2x9x9x4xbf16> to vector<2x9x9x4xbf16>
    %40 = vector.extract_strided_slice %39 {offsets = [0, 1, 1, 0], sizes = [2, 8, 8, 4], strides = [1, 1, 1, 1]} : vector<2x9x9x4xbf16> to vector<2x8x8x4xbf16>
    %41 = vector.shape_cast %40 : vector<2x8x8x4xbf16> to vector<128x4xbf16>
    %42 = tpu.concatenate %9, %13, %17, %21, %25, %29, %33, %37, %41 in 1 : vector<128x4xbf16>, vector<128x4xbf16>, vector<128x4xbf16>, vector<128x4xbf16>, vector<128x4xbf16>, vector<128x4xbf16>, vector<128x4xbf16>, vector<128x4xbf16>, vector<128x4xbf16> -> vector<128x36xbf16>
    %c0_6 = arith.constant 0 : index
    %c0_7 = arith.constant 0 : index
    %43 = vector.load %arg3[%c0_6, %c0_7] : memref<36x128xbf16, #tpu.memory_space<vmem>>, vector<36x128xbf16>
    %cst = arith.constant dense<0.000000e+00> : vector<128x128xf32>
    %44 = tpu.matmul %42, %43, %cst {dimension_numbers = #tpu.dot_dimension_numbers<[1], [0], [0], [1], [0, 0, 1, 1], [], []>} : vector<128x36xbf16>, vector<36x128xbf16>, vector<128x128xf32> -> vector<128x128xf32>
    %c0_i32_8 = arith.constant 0 : i32
    %45 = arith.cmpi eq, %arg0, %c0_i32_8 : i32
    %46 = arith.extui %45 : i1 to i32
    %c0_i32_9 = arith.constant 0 : i32
    %47 = arith.cmpi ne, %46, %c0_i32_9 : i32
    scf.if %47 {
      %c0_11 = arith.constant 0 : index
      %c0_12 = arith.constant 0 : index
      %51 = vector.load %arg7[%c0_11, %c0_12] : memref<1x128xf32, #tpu.memory_space<vmem>>, vector<1x128xf32>
      %cst_13 = arith.constant dense<0.000000e+00> : vector<128xf32>
      %52 = vector.multi_reduction <add>, %44, %cst_13 [0] : vector<128x128xf32> to vector<128xf32>
      %53 = vector.shape_cast %52 : vector<128xf32> to vector<1x128xf32>
      %54 = arith.addf %51, %53 : vector<1x128xf32>
      %c0_14 = arith.constant 0 : index
      %c0_15 = arith.constant 0 : index
      %55 = vector.load %arg7[%c0_14, %c0_15] : memref<1x128xf32, #tpu.memory_space<vmem>>, vector<1x128xf32>
      tpu.vector_store %arg7[%c0_14, %c0_15], %54 {strides = array<i32>} : memref<1x128xf32, #tpu.memory_space<vmem>>, vector<1x128xf32>,
      %c0_16 = arith.constant 0 : index
      %c0_17 = arith.constant 0 : index
      %56 = vector.load %arg8[%c0_16, %c0_17] : memref<1x128xf32, #tpu.memory_space<vmem>>, vector<1x128xf32>
      %57 = arith.mulf %44, %44 : vector<128x128xf32>
      %cst_18 = arith.constant dense<0.000000e+00> : vector<128xf32>
      %58 = vector.multi_reduction <add>, %57, %cst_18 [0] : vector<128x128xf32> to vector<128xf32>
      %59 = vector.shape_cast %58 : vector<128xf32> to vector<1x128xf32>
      %60 = arith.addf %56, %59 : vector<1x128xf32>
      %c0_19 = arith.constant 0 : index
      %c0_20 = arith.constant 0 : index
      %61 = vector.load %arg8[%c0_19, %c0_20] : memref<1x128xf32, #tpu.memory_space<vmem>>, vector<1x128xf32>
      tpu.vector_store %arg8[%c0_19, %c0_20], %60 {strides = array<i32>} : memref<1x128xf32, #tpu.memory_space<vmem>>, vector<1x128xf32>,
    } else {
    }
    %c1_i32 = arith.constant 1 : i32
    %48 = arith.cmpi eq, %arg0, %c1_i32 : i32
    %49 = arith.extui %48 : i1 to i32
    %c0_i32_10 = arith.constant 0 : i32
    %50 = arith.cmpi ne, %49, %c0_i32_10 : i32
    scf.if %50 {
      %c0_11 = arith.constant 0 : index
      %c0_12 = arith.constant 0 : index
      %51 = vector.load %arg7[%c0_11, %c0_12] : memref<1x128xf32, #tpu.memory_space<vmem>>, vector<1x128xf32>
      %cst_13 = arith.constant 7.812500e-03 : f32
      %52 = vector.broadcast %cst_13 : f32 to vector<1x128xf32>
      %53 = arith.mulf %51, %52 : vector<1x128xf32>
      %c0_14 = arith.constant 0 : index
      %c0_15 = arith.constant 0 : index
      %54 = vector.load %arg8[%c0_14, %c0_15] : memref<1x128xf32, #tpu.memory_space<vmem>>, vector<1x128xf32>
      %cst_16 = arith.constant 7.812500e-03 : f32
      %55 = vector.broadcast %cst_16 : f32 to vector<1x128xf32>
      %56 = arith.mulf %54, %55 : vector<1x128xf32>
      %57 = arith.mulf %53, %53 : vector<1x128xf32>
      %58 = arith.subf %56, %57 : vector<1x128xf32>
      %cst_17 = arith.constant 0.000000e+00 : f32
      %59 = vector.broadcast %cst_17 : f32 to vector<1x128xf32>
      %60 = arith.maximumf %58, %59 : vector<1x128xf32>
      %c0_18 = arith.constant 0 : index
      %c0_19 = arith.constant 0 : index
      %61 = vector.load %arg4[%c0_18, %c0_19] : memref<1x128xf32, #tpu.memory_space<vmem>>, vector<1x128xf32>
      %cst_20 = arith.constant 9.99999974E-6 : f32
      %62 = vector.broadcast %cst_20 : f32 to vector<1x128xf32>
      %63 = arith.addf %60, %62 : vector<1x128xf32>
      %64 = math.rsqrt %63 : vector<1x128xf32>
      %65 = arith.mulf %61, %64 : vector<1x128xf32>
      %c0_21 = arith.constant 0 : index
      %c0_22 = arith.constant 0 : index
      %66 = vector.load %arg5[%c0_21, %c0_22] : memref<1x128xf32, #tpu.memory_space<vmem>>, vector<1x128xf32>
      %67 = arith.mulf %53, %65 : vector<1x128xf32>
      %68 = arith.subf %66, %67 : vector<1x128xf32>
      %69 = vector.broadcast %65 : vector<1x128xf32> to vector<128x128xf32>
      %70 = arith.mulf %44, %69 : vector<128x128xf32>
      %71 = vector.broadcast %68 : vector<1x128xf32> to vector<128x128xf32>
      %72 = arith.addf %70, %71 : vector<128x128xf32>
      %cst_23 = arith.constant 0.000000e+00 : f32
      %73 = vector.broadcast %cst_23 : f32 to vector<128x128xf32>
      %74 = arith.maximumf %72, %73 : vector<128x128xf32>
      %75 = vector.shape_cast %74 : vector<128x128xf32> to vector<2x8x8x128xf32>
      %76 = arith.truncf %75 : vector<2x8x8x128xf32> to vector<2x8x8x128xbf16>
      %c0_24 = arith.constant 0 : index
      %c1 = arith.constant 1 : index
      %c1_25 = arith.constant 1 : index
      %c0_26 = arith.constant 0 : index
      %77 = vector.load %arg6[%c0_24, %c1, %c1_25, %c0_26] : memref<2x10x10x128xbf16, #tpu.memory_space<vmem>>, vector<2x8x8x128xbf16>
      tpu.vector_store %arg6[%c0_24, %c1, %c1_25, %c0_26], %76 {strides = array<i32>} : memref<2x10x10x128xbf16, #tpu.memory_space<vmem>>, vector<2x8x8x128xbf16>,
      %cst_27 = arith.constant 0.000000e+00 : bf16
      %78 = vector.broadcast %cst_27 : bf16 to vector<2x1x10x128xbf16>
      %c0_28 = arith.constant 0 : index
      %c0_29 = arith.constant 0 : index
      %c0_30 = arith.constant 0 : index
      %c0_31 = arith.constant 0 : index
      %79 = vector.load %arg6[%c0_28, %c0_29, %c0_30, %c0_31] : memref<2x10x10x128xbf16, #tpu.memory_space<vmem>>, vector<2x1x10x128xbf16>
      tpu.vector_store %arg6[%c0_28, %c0_29, %c0_30, %c0_31], %78 {strides = array<i32>} : memref<2x10x10x128xbf16, #tpu.memory_space<vmem>>, vector<2x1x10x128xbf16>,
      %c0_32 = arith.constant 0 : index
      %c9 = arith.constant 9 : index
      %c0_33 = arith.constant 0 : index
      %c0_34 = arith.constant 0 : index
      %80 = vector.load %arg6[%c0_32, %c9, %c0_33, %c0_34] : memref<2x10x10x128xbf16, #tpu.memory_space<vmem>>, vector<2x1x10x128xbf16>
      tpu.vector_store %arg6[%c0_32, %c9, %c0_33, %c0_34], %78 {strides = array<i32>} : memref<2x10x10x128xbf16, #tpu.memory_space<vmem>>, vector<2x1x10x128xbf16>,
      %cst_35 = arith.constant 0.000000e+00 : bf16
      %81 = vector.broadcast %cst_35 : bf16 to vector<2x8x1x128xbf16>
      %c0_36 = arith.constant 0 : index
      %c1_37 = arith.constant 1 : index
      %c0_38 = arith.constant 0 : index
      %c0_39 = arith.constant 0 : index
      %82 = vector.load %arg6[%c0_36, %c1_37, %c0_38, %c0_39] : memref<2x10x10x128xbf16, #tpu.memory_space<vmem>>, vector<2x8x1x128xbf16>
      tpu.vector_store %arg6[%c0_36, %c1_37, %c0_38, %c0_39], %81 {strides = array<i32>} : memref<2x10x10x128xbf16, #tpu.memory_space<vmem>>, vector<2x8x1x128xbf16>,
      %c0_40 = arith.constant 0 : index
      %c1_41 = arith.constant 1 : index
      %c9_42 = arith.constant 9 : index
      %c0_43 = arith.constant 0 : index
      %83 = vector.load %arg6[%c0_40, %c1_41, %c9_42, %c0_43] : memref<2x10x10x128xbf16, #tpu.memory_space<vmem>>, vector<2x8x1x128xbf16>
      tpu.vector_store %arg6[%c0_40, %c1_41, %c9_42, %c0_43], %81 {strides = array<i32>} : memref<2x10x10x128xbf16, #tpu.memory_space<vmem>>, vector<2x8x1x128xbf16>,
    } else {
    }
    return
  }
  func.func @transform_0(%arg0: i32, %arg1: i32) -> (i32, i32, i32, i32, i32) {
    %c0_i32 = arith.constant 0 : i32
    %c0_i32_0 = arith.constant 0 : i32
    %c0_i32_1 = arith.constant 0 : i32
    %c0_i32_2 = arith.constant 0 : i32
    %c0_i32_3 = arith.constant 0 : i32
    return %c0_i32, %arg1, %c0_i32_0, %c0_i32_1, %c0_i32_2 : i32, i32, i32, i32, i32
  }
  func.func @transform_1(%arg0: i32, %arg1: i32) -> (i32, i32) {
    %c0_i32 = arith.constant 0 : i32
    %c0_i32_0 = arith.constant 0 : i32
    %c0_i32_1 = arith.constant 0 : i32
    return %c0_i32, %c0_i32_0 : i32, i32
  }
  func.func @transform_2(%arg0: i32, %arg1: i32) -> (i32, i32) {
    %c0_i32 = arith.constant 0 : i32
    %c0_i32_0 = arith.constant 0 : i32
    %c0_i32_1 = arith.constant 0 : i32
    return %c0_i32, %c0_i32_0 : i32, i32
  }
  func.func @transform_3(%arg0: i32, %arg1: i32) -> (i32, i32) {
    %c0_i32 = arith.constant 0 : i32
    %c0_i32_0 = arith.constant 0 : i32
    %c0_i32_1 = arith.constant 0 : i32
    return %c0_i32, %c0_i32_0 : i32, i32
  }
  func.func @transform_4(%arg0: i32, %arg1: i32) -> (i32, i32, i32, i32) {
    %0 = arith.muli %arg0, %arg1 : i32
    %c0_i32 = arith.constant 0 : i32
    %c0_i32_0 = arith.constant 0 : i32
    %c0_i32_1 = arith.constant 0 : i32
    %c0_i32_2 = arith.constant 0 : i32
    return %0, %c0_i32, %c0_i32_0, %c0_i32_1 : i32, i32, i32, i32
  }
}

module attributes {stable_mosaic.version = 11 : i64} {
  func.func @_stage2_kernel(%arg0: i32, %arg1: i32, %arg2: memref<2x10x10x128xbf16, #tpu.memory_space<vmem>>, %arg3: memref<2x8x8x4xbf16, #tpu.memory_space<vmem>>, %arg4: memref<9x128x128xbf16, #tpu.memory_space<vmem>>, %arg5: memref<1x128xf32, #tpu.memory_space<vmem>>, %arg6: memref<1x128xf32, #tpu.memory_space<vmem>>, %arg7: memref<4x128xbf16, #tpu.memory_space<vmem>>, %arg8: memref<1x128xf32, #tpu.memory_space<vmem>>, %arg9: memref<1x128xf32, #tpu.memory_space<vmem>>, %arg10: memref<2x8x8x128xbf16, #tpu.memory_space<vmem>>, %arg11: memref<1x128xf32, #tpu.memory_space<vmem>>, %arg12: memref<1x128xf32, #tpu.memory_space<vmem>>, %arg13: memref<1x128xf32, #tpu.memory_space<vmem>>, %arg14: memref<1x128xf32, #tpu.memory_space<vmem>>) attributes {dimension_semantics = [#tpu.dimension_semantics<arbitrary>, #tpu.dimension_semantics<arbitrary>], iteration_bounds = array<i64: 2, 1>, scalar_prefetch = 0 : i64, scratch_operands = 4 : i64, tpu.core_type = #tpu.core_type<tc>, window_params = [{transform_indices = @transform_0, window_bounds = array<i64: 2, 10, 10, 128>}, {transform_indices = @transform_1, window_bounds = array<i64: 2, 8, 8, 4>}, {pipeline_mode = #tpu.pipeline_mode<synchronous>, transform_indices = @transform_2, window_bounds = array<i64: 9, 128, 128>}, {pipeline_mode = #tpu.pipeline_mode<synchronous>, transform_indices = @transform_3, window_bounds = array<i64: 1, 128>}, {pipeline_mode = #tpu.pipeline_mode<synchronous>, transform_indices = @transform_4, window_bounds = array<i64: 1, 128>}, {pipeline_mode = #tpu.pipeline_mode<synchronous>, transform_indices = @transform_5, window_bounds = array<i64: 4, 128>}, {pipeline_mode = #tpu.pipeline_mode<synchronous>, transform_indices = @transform_6, window_bounds = array<i64: 1, 128>}, {pipeline_mode = #tpu.pipeline_mode<synchronous>, transform_indices = @transform_7, window_bounds = array<i64: 1, 128>}, {transform_indices = @transform_8, window_bounds = array<i64: 2, 8, 8, 128>}]} {
    %c0_i32 = arith.constant 0 : i32
    %0 = arith.cmpi eq, %arg0, %c0_i32 : i32
    %c0_i32_0 = arith.constant 0 : i32
    %1 = arith.cmpi eq, %arg1, %c0_i32_0 : i32
    %2 = arith.andi %0, %1 : i1
    %3 = arith.extui %2 : i1 to i32
    %c0_i32_1 = arith.constant 0 : i32
    %4 = arith.cmpi ne, %3, %c0_i32_1 : i32
    scf.if %4 {
      %cst_36 = arith.constant 0.000000e+00 : f32
      %67 = vector.broadcast %cst_36 : f32 to vector<1x128xf32>
      %c0_37 = arith.constant 0 : index
      %c0_38 = arith.constant 0 : index
      %68 = vector.load %arg11[%c0_37, %c0_38] : memref<1x128xf32, #tpu.memory_space<vmem>>, vector<1x128xf32>
      tpu.vector_store %arg11[%c0_37, %c0_38], %67 {strides = array<i32>} : memref<1x128xf32, #tpu.memory_space<vmem>>, vector<1x128xf32>,
      %cst_39 = arith.constant 0.000000e+00 : f32
      %69 = vector.broadcast %cst_39 : f32 to vector<1x128xf32>
      %c0_40 = arith.constant 0 : index
      %c0_41 = arith.constant 0 : index
      %70 = vector.load %arg12[%c0_40, %c0_41] : memref<1x128xf32, #tpu.memory_space<vmem>>, vector<1x128xf32>
      tpu.vector_store %arg12[%c0_40, %c0_41], %69 {strides = array<i32>} : memref<1x128xf32, #tpu.memory_space<vmem>>, vector<1x128xf32>,
      %cst_42 = arith.constant 0.000000e+00 : f32
      %71 = vector.broadcast %cst_42 : f32 to vector<1x128xf32>
      %c0_43 = arith.constant 0 : index
      %c0_44 = arith.constant 0 : index
      %72 = vector.load %arg13[%c0_43, %c0_44] : memref<1x128xf32, #tpu.memory_space<vmem>>, vector<1x128xf32>
      tpu.vector_store %arg13[%c0_43, %c0_44], %71 {strides = array<i32>} : memref<1x128xf32, #tpu.memory_space<vmem>>, vector<1x128xf32>,
      %cst_45 = arith.constant 0.000000e+00 : f32
      %73 = vector.broadcast %cst_45 : f32 to vector<1x128xf32>
      %c0_46 = arith.constant 0 : index
      %c0_47 = arith.constant 0 : index
      %74 = vector.load %arg14[%c0_46, %c0_47] : memref<1x128xf32, #tpu.memory_space<vmem>>, vector<1x128xf32>
      tpu.vector_store %arg14[%c0_46, %c0_47], %73 {strides = array<i32>} : memref<1x128xf32, #tpu.memory_space<vmem>>, vector<1x128xf32>,
    } else {
    }
    %c0 = arith.constant 0 : index
    %c0_2 = arith.constant 0 : index
    %c0_3 = arith.constant 0 : index
    %c0_4 = arith.constant 0 : index
    %5 = vector.load %arg2[%c0, %c0_2, %c0_3, %c0_4] : memref<2x10x10x128xbf16, #tpu.memory_space<vmem>>, vector<2x10x10x128xbf16>
    %cst = arith.constant 0.000000e+00 : f32
    %6 = vector.broadcast %cst : f32 to vector<128x128xf32>
    %7 = vector.extract_strided_slice %5 {offsets = [0, 0, 0, 0], sizes = [2, 8, 8, 128], strides = [1, 1, 1, 1]} : vector<2x10x10x128xbf16> to vector<2x8x8x128xbf16>
    %8 = vector.shape_cast %7 : vector<2x8x8x128xbf16> to vector<128x128xbf16>
    %c0_5 = arith.constant 0 : index
    %c0_6 = arith.constant 0 : index
    %c0_7 = arith.constant 0 : index
    %9 = vector.load %arg4[%c0_5, %c0_6, %c0_7] : memref<9x128x128xbf16, #tpu.memory_space<vmem>>, vector<1x128x128xbf16>
    %10 = vector.shape_cast %9 : vector<1x128x128xbf16> to vector<128x128xbf16>
    %cst_8 = arith.constant dense<0.000000e+00> : vector<128x128xf32>
    %11 = tpu.matmul %8, %10, %cst_8 {dimension_numbers = #tpu.dot_dimension_numbers<[1], [0], [0], [1], [0, 0, 1, 1], [], []>} : vector<128x128xbf16>, vector<128x128xbf16>, vector<128x128xf32> -> vector<128x128xf32>
    %12 = arith.addf %6, %11 : vector<128x128xf32>
    %13 = vector.extract_strided_slice %5 {offsets = [0, 0, 1, 0], sizes = [2, 8, 8, 128], strides = [1, 1, 1, 1]} : vector<2x10x10x128xbf16> to vector<2x8x8x128xbf16>
    %14 = vector.shape_cast %13 : vector<2x8x8x128xbf16> to vector<128x128xbf16>
    %c1 = arith.constant 1 : index
    %c0_9 = arith.constant 0 : index
    %c0_10 = arith.constant 0 : index
    %15 = vector.load %arg4[%c1, %c0_9, %c0_10] : memref<9x128x128xbf16, #tpu.memory_space<vmem>>, vector<1x128x128xbf16>
    %16 = vector.shape_cast %15 : vector<1x128x128xbf16> to vector<128x128xbf16>
    %cst_11 = arith.constant dense<0.000000e+00> : vector<128x128xf32>
    %17 = tpu.matmul %14, %16, %cst_11 {dimension_numbers = #tpu.dot_dimension_numbers<[1], [0], [0], [1], [0, 0, 1, 1], [], []>} : vector<128x128xbf16>, vector<128x128xbf16>, vector<128x128xf32> -> vector<128x128xf32>
    %18 = arith.addf %12, %17 : vector<128x128xf32>
    %19 = vector.extract_strided_slice %5 {offsets = [0, 0, 2, 0], sizes = [2, 8, 8, 128], strides = [1, 1, 1, 1]} : vector<2x10x10x128xbf16> to vector<2x8x8x128xbf16>
    %20 = vector.shape_cast %19 : vector<2x8x8x128xbf16> to vector<128x128xbf16>
    %c2 = arith.constant 2 : index
    %c0_12 = arith.constant 0 : index
    %c0_13 = arith.constant 0 : index
    %21 = vector.load %arg4[%c2, %c0_12, %c0_13] : memref<9x128x128xbf16, #tpu.memory_space<vmem>>, vector<1x128x128xbf16>
    %22 = vector.shape_cast %21 : vector<1x128x128xbf16> to vector<128x128xbf16>
    %cst_14 = arith.constant dense<0.000000e+00> : vector<128x128xf32>
    %23 = tpu.matmul %20, %22, %cst_14 {dimension_numbers = #tpu.dot_dimension_numbers<[1], [0], [0], [1], [0, 0, 1, 1], [], []>} : vector<128x128xbf16>, vector<128x128xbf16>, vector<128x128xf32> -> vector<128x128xf32>
    %24 = arith.addf %18, %23 : vector<128x128xf32>
    %25 = vector.extract_strided_slice %5 {offsets = [0, 1, 0, 0], sizes = [2, 8, 8, 128], strides = [1, 1, 1, 1]} : vector<2x10x10x128xbf16> to vector<2x8x8x128xbf16>
    %26 = vector.shape_cast %25 : vector<2x8x8x128xbf16> to vector<128x128xbf16>
    %c3 = arith.constant 3 : index
    %c0_15 = arith.constant 0 : index
    %c0_16 = arith.constant 0 : index
    %27 = vector.load %arg4[%c3, %c0_15, %c0_16] : memref<9x128x128xbf16, #tpu.memory_space<vmem>>, vector<1x128x128xbf16>
    %28 = vector.shape_cast %27 : vector<1x128x128xbf16> to vector<128x128xbf16>
    %cst_17 = arith.constant dense<0.000000e+00> : vector<128x128xf32>
    %29 = tpu.matmul %26, %28, %cst_17 {dimension_numbers = #tpu.dot_dimension_numbers<[1], [0], [0], [1], [0, 0, 1, 1], [], []>} : vector<128x128xbf16>, vector<128x128xbf16>, vector<128x128xf32> -> vector<128x128xf32>
    %30 = arith.addf %24, %29 : vector<128x128xf32>
    %31 = vector.extract_strided_slice %5 {offsets = [0, 1, 1, 0], sizes = [2, 8, 8, 128], strides = [1, 1, 1, 1]} : vector<2x10x10x128xbf16> to vector<2x8x8x128xbf16>
    %32 = vector.shape_cast %31 : vector<2x8x8x128xbf16> to vector<128x128xbf16>
    %c4 = arith.constant 4 : index
    %c0_18 = arith.constant 0 : index
    %c0_19 = arith.constant 0 : index
    %33 = vector.load %arg4[%c4, %c0_18, %c0_19] : memref<9x128x128xbf16, #tpu.memory_space<vmem>>, vector<1x128x128xbf16>
    %34 = vector.shape_cast %33 : vector<1x128x128xbf16> to vector<128x128xbf16>
    %cst_20 = arith.constant dense<0.000000e+00> : vector<128x128xf32>
    %35 = tpu.matmul %32, %34, %cst_20 {dimension_numbers = #tpu.dot_dimension_numbers<[1], [0], [0], [1], [0, 0, 1, 1], [], []>} : vector<128x128xbf16>, vector<128x128xbf16>, vector<128x128xf32> -> vector<128x128xf32>
    %36 = arith.addf %30, %35 : vector<128x128xf32>
    %37 = vector.extract_strided_slice %5 {offsets = [0, 1, 2, 0], sizes = [2, 8, 8, 128], strides = [1, 1, 1, 1]} : vector<2x10x10x128xbf16> to vector<2x8x8x128xbf16>
    %38 = vector.shape_cast %37 : vector<2x8x8x128xbf16> to vector<128x128xbf16>
    %c5 = arith.constant 5 : index
    %c0_21 = arith.constant 0 : index
    %c0_22 = arith.constant 0 : index
    %39 = vector.load %arg4[%c5, %c0_21, %c0_22] : memref<9x128x128xbf16, #tpu.memory_space<vmem>>, vector<1x128x128xbf16>
    %40 = vector.shape_cast %39 : vector<1x128x128xbf16> to vector<128x128xbf16>
    %cst_23 = arith.constant dense<0.000000e+00> : vector<128x128xf32>
    %41 = tpu.matmul %38, %40, %cst_23 {dimension_numbers = #tpu.dot_dimension_numbers<[1], [0], [0], [1], [0, 0, 1, 1], [], []>} : vector<128x128xbf16>, vector<128x128xbf16>, vector<128x128xf32> -> vector<128x128xf32>
    %42 = arith.addf %36, %41 : vector<128x128xf32>
    %43 = vector.extract_strided_slice %5 {offsets = [0, 2, 0, 0], sizes = [2, 8, 8, 128], strides = [1, 1, 1, 1]} : vector<2x10x10x128xbf16> to vector<2x8x8x128xbf16>
    %44 = vector.shape_cast %43 : vector<2x8x8x128xbf16> to vector<128x128xbf16>
    %c6 = arith.constant 6 : index
    %c0_24 = arith.constant 0 : index
    %c0_25 = arith.constant 0 : index
    %45 = vector.load %arg4[%c6, %c0_24, %c0_25] : memref<9x128x128xbf16, #tpu.memory_space<vmem>>, vector<1x128x128xbf16>
    %46 = vector.shape_cast %45 : vector<1x128x128xbf16> to vector<128x128xbf16>
    %cst_26 = arith.constant dense<0.000000e+00> : vector<128x128xf32>
    %47 = tpu.matmul %44, %46, %cst_26 {dimension_numbers = #tpu.dot_dimension_numbers<[1], [0], [0], [1], [0, 0, 1, 1], [], []>} : vector<128x128xbf16>, vector<128x128xbf16>, vector<128x128xf32> -> vector<128x128xf32>
    %48 = arith.addf %42, %47 : vector<128x128xf32>
    %49 = vector.extract_strided_slice %5 {offsets = [0, 2, 1, 0], sizes = [2, 8, 8, 128], strides = [1, 1, 1, 1]} : vector<2x10x10x128xbf16> to vector<2x8x8x128xbf16>
    %50 = vector.shape_cast %49 : vector<2x8x8x128xbf16> to vector<128x128xbf16>
    %c7 = arith.constant 7 : index
    %c0_27 = arith.constant 0 : index
    %c0_28 = arith.constant 0 : index
    %51 = vector.load %arg4[%c7, %c0_27, %c0_28] : memref<9x128x128xbf16, #tpu.memory_space<vmem>>, vector<1x128x128xbf16>
    %52 = vector.shape_cast %51 : vector<1x128x128xbf16> to vector<128x128xbf16>
    %cst_29 = arith.constant dense<0.000000e+00> : vector<128x128xf32>
    %53 = tpu.matmul %50, %52, %cst_29 {dimension_numbers = #tpu.dot_dimension_numbers<[1], [0], [0], [1], [0, 0, 1, 1], [], []>} : vector<128x128xbf16>, vector<128x128xbf16>, vector<128x128xf32> -> vector<128x128xf32>
    %54 = arith.addf %48, %53 : vector<128x128xf32>
    %55 = vector.extract_strided_slice %5 {offsets = [0, 2, 2, 0], sizes = [2, 8, 8, 128], strides = [1, 1, 1, 1]} : vector<2x10x10x128xbf16> to vector<2x8x8x128xbf16>
    %56 = vector.shape_cast %55 : vector<2x8x8x128xbf16> to vector<128x128xbf16>
    %c8 = arith.constant 8 : index
    %c0_30 = arith.constant 0 : index
    %c0_31 = arith.constant 0 : index
    %57 = vector.load %arg4[%c8, %c0_30, %c0_31] : memref<9x128x128xbf16, #tpu.memory_space<vmem>>, vector<1x128x128xbf16>
    %58 = vector.shape_cast %57 : vector<1x128x128xbf16> to vector<128x128xbf16>
    %cst_32 = arith.constant dense<0.000000e+00> : vector<128x128xf32>
    %59 = tpu.matmul %56, %58, %cst_32 {dimension_numbers = #tpu.dot_dimension_numbers<[1], [0], [0], [1], [0, 0, 1, 1], [], []>} : vector<128x128xbf16>, vector<128x128xbf16>, vector<128x128xf32> -> vector<128x128xf32>
    %60 = arith.addf %54, %59 : vector<128x128xf32>
    %c0_i32_33 = arith.constant 0 : i32
    %61 = arith.cmpi eq, %arg0, %c0_i32_33 : i32
    %62 = arith.extui %61 : i1 to i32
    %c0_i32_34 = arith.constant 0 : i32
    %63 = arith.cmpi ne, %62, %c0_i32_34 : i32
    scf.if %63 {
      %c0_36 = arith.constant 0 : index
      %c0_37 = arith.constant 0 : index
      %67 = vector.load %arg11[%c0_36, %c0_37] : memref<1x128xf32, #tpu.memory_space<vmem>>, vector<1x128xf32>
      %cst_38 = arith.constant dense<0.000000e+00> : vector<128xf32>
      %68 = vector.multi_reduction <add>, %60, %cst_38 [0] : vector<128x128xf32> to vector<128xf32>
      %69 = vector.shape_cast %68 : vector<128xf32> to vector<1x128xf32>
      %70 = arith.addf %67, %69 : vector<1x128xf32>
      %c0_39 = arith.constant 0 : index
      %c0_40 = arith.constant 0 : index
      %71 = vector.load %arg11[%c0_39, %c0_40] : memref<1x128xf32, #tpu.memory_space<vmem>>, vector<1x128xf32>
      tpu.vector_store %arg11[%c0_39, %c0_40], %70 {strides = array<i32>} : memref<1x128xf32, #tpu.memory_space<vmem>>, vector<1x128xf32>,
      %c0_41 = arith.constant 0 : index
      %c0_42 = arith.constant 0 : index
      %72 = vector.load %arg12[%c0_41, %c0_42] : memref<1x128xf32, #tpu.memory_space<vmem>>, vector<1x128xf32>
      %73 = arith.mulf %60, %60 : vector<128x128xf32>
      %cst_43 = arith.constant dense<0.000000e+00> : vector<128xf32>
      %74 = vector.multi_reduction <add>, %73, %cst_43 [0] : vector<128x128xf32> to vector<128xf32>
      %75 = vector.shape_cast %74 : vector<128xf32> to vector<1x128xf32>
      %76 = arith.addf %72, %75 : vector<1x128xf32>
      %c0_44 = arith.constant 0 : index
      %c0_45 = arith.constant 0 : index
      %77 = vector.load %arg12[%c0_44, %c0_45] : memref<1x128xf32, #tpu.memory_space<vmem>>, vector<1x128xf32>
      tpu.vector_store %arg12[%c0_44, %c0_45], %76 {strides = array<i32>} : memref<1x128xf32, #tpu.memory_space<vmem>>, vector<1x128xf32>,
      %c0_46 = arith.constant 0 : index
      %c0_47 = arith.constant 0 : index
      %c0_48 = arith.constant 0 : index
      %c0_49 = arith.constant 0 : index
      %78 = vector.load %arg3[%c0_46, %c0_47, %c0_48, %c0_49] : memref<2x8x8x4xbf16, #tpu.memory_space<vmem>>, vector<2x8x8x4xbf16>
      %79 = vector.shape_cast %78 : vector<2x8x8x4xbf16> to vector<128x4xbf16>
      %c0_50 = arith.constant 0 : index
      %c0_51 = arith.constant 0 : index
      %80 = vector.load %arg7[%c0_50, %c0_51] : memref<4x128xbf16, #tpu.memory_space<vmem>>, vector<4x128xbf16>
      %cst_52 = arith.constant dense<0.000000e+00> : vector<128x128xf32>
      %81 = tpu.matmul %79, %80, %cst_52 {dimension_numbers = #tpu.dot_dimension_numbers<[1], [0], [0], [1], [0, 0, 1, 1], [], []>} : vector<128x4xbf16>, vector<4x128xbf16>, vector<128x128xf32> -> vector<128x128xf32>
      %c0_53 = arith.constant 0 : index
      %c0_54 = arith.constant 0 : index
      %82 = vector.load %arg13[%c0_53, %c0_54] : memref<1x128xf32, #tpu.memory_space<vmem>>, vector<1x128xf32>
      %cst_55 = arith.constant dense<0.000000e+00> : vector<128xf32>
      %83 = vector.multi_reduction <add>, %81, %cst_55 [0] : vector<128x128xf32> to vector<128xf32>
      %84 = vector.shape_cast %83 : vector<128xf32> to vector<1x128xf32>
      %85 = arith.addf %82, %84 : vector<1x128xf32>
      %c0_56 = arith.constant 0 : index
      %c0_57 = arith.constant 0 : index
      %86 = vector.load %arg13[%c0_56, %c0_57] : memref<1x128xf32, #tpu.memory_space<vmem>>, vector<1x128xf32>
      tpu.vector_store %arg13[%c0_56, %c0_57], %85 {strides = array<i32>} : memref<1x128xf32, #tpu.memory_space<vmem>>, vector<1x128xf32>,
      %c0_58 = arith.constant 0 : index
      %c0_59 = arith.constant 0 : index
      %87 = vector.load %arg14[%c0_58, %c0_59] : memref<1x128xf32, #tpu.memory_space<vmem>>, vector<1x128xf32>
      %88 = arith.mulf %81, %81 : vector<128x128xf32>
      %cst_60 = arith.constant dense<0.000000e+00> : vector<128xf32>
      %89 = vector.multi_reduction <add>, %88, %cst_60 [0] : vector<128x128xf32> to vector<128xf32>
      %90 = vector.shape_cast %89 : vector<128xf32> to vector<1x128xf32>
      %91 = arith.addf %87, %90 : vector<1x128xf32>
      %c0_61 = arith.constant 0 : index
      %c0_62 = arith.constant 0 : index
      %92 = vector.load %arg14[%c0_61, %c0_62] : memref<1x128xf32, #tpu.memory_space<vmem>>, vector<1x128xf32>
      tpu.vector_store %arg14[%c0_61, %c0_62], %91 {strides = array<i32>} : memref<1x128xf32, #tpu.memory_space<vmem>>, vector<1x128xf32>,
    } else {
    }
    %c1_i32 = arith.constant 1 : i32
    %64 = arith.cmpi eq, %arg0, %c1_i32 : i32
    %65 = arith.extui %64 : i1 to i32
    %c0_i32_35 = arith.constant 0 : i32
    %66 = arith.cmpi ne, %65, %c0_i32_35 : i32
    scf.if %66 {
      %c0_36 = arith.constant 0 : index
      %c0_37 = arith.constant 0 : index
      %67 = vector.load %arg11[%c0_36, %c0_37] : memref<1x128xf32, #tpu.memory_space<vmem>>, vector<1x128xf32>
      %cst_38 = arith.constant 7.812500e-03 : f32
      %68 = vector.broadcast %cst_38 : f32 to vector<1x128xf32>
      %69 = arith.mulf %67, %68 : vector<1x128xf32>
      %c0_39 = arith.constant 0 : index
      %c0_40 = arith.constant 0 : index
      %70 = vector.load %arg12[%c0_39, %c0_40] : memref<1x128xf32, #tpu.memory_space<vmem>>, vector<1x128xf32>
      %cst_41 = arith.constant 7.812500e-03 : f32
      %71 = vector.broadcast %cst_41 : f32 to vector<1x128xf32>
      %72 = arith.mulf %70, %71 : vector<1x128xf32>
      %73 = arith.mulf %69, %69 : vector<1x128xf32>
      %74 = arith.subf %72, %73 : vector<1x128xf32>
      %cst_42 = arith.constant 0.000000e+00 : f32
      %75 = vector.broadcast %cst_42 : f32 to vector<1x128xf32>
      %76 = arith.maximumf %74, %75 : vector<1x128xf32>
      %c0_43 = arith.constant 0 : index
      %c0_44 = arith.constant 0 : index
      %77 = vector.load %arg5[%c0_43, %c0_44] : memref<1x128xf32, #tpu.memory_space<vmem>>, vector<1x128xf32>
      %cst_45 = arith.constant 9.99999974E-6 : f32
      %78 = vector.broadcast %cst_45 : f32 to vector<1x128xf32>
      %79 = arith.addf %76, %78 : vector<1x128xf32>
      %80 = math.rsqrt %79 : vector<1x128xf32>
      %81 = arith.mulf %77, %80 : vector<1x128xf32>
      %c0_46 = arith.constant 0 : index
      %c0_47 = arith.constant 0 : index
      %82 = vector.load %arg6[%c0_46, %c0_47] : memref<1x128xf32, #tpu.memory_space<vmem>>, vector<1x128xf32>
      %83 = arith.mulf %69, %81 : vector<1x128xf32>
      %84 = arith.subf %82, %83 : vector<1x128xf32>
      %85 = vector.broadcast %81 : vector<1x128xf32> to vector<128x128xf32>
      %86 = arith.mulf %60, %85 : vector<128x128xf32>
      %87 = vector.broadcast %84 : vector<1x128xf32> to vector<128x128xf32>
      %88 = arith.addf %86, %87 : vector<128x128xf32>
      %c0_48 = arith.constant 0 : index
      %c0_49 = arith.constant 0 : index
      %c0_50 = arith.constant 0 : index
      %c0_51 = arith.constant 0 : index
      %89 = vector.load %arg3[%c0_48, %c0_49, %c0_50, %c0_51] : memref<2x8x8x4xbf16, #tpu.memory_space<vmem>>, vector<2x8x8x4xbf16>
      %90 = vector.shape_cast %89 : vector<2x8x8x4xbf16> to vector<128x4xbf16>
      %c0_52 = arith.constant 0 : index
      %c0_53 = arith.constant 0 : index
      %91 = vector.load %arg7[%c0_52, %c0_53] : memref<4x128xbf16, #tpu.memory_space<vmem>>, vector<4x128xbf16>
      %cst_54 = arith.constant dense<0.000000e+00> : vector<128x128xf32>
      %92 = tpu.matmul %90, %91, %cst_54 {dimension_numbers = #tpu.dot_dimension_numbers<[1], [0], [0], [1], [0, 0, 1, 1], [], []>} : vector<128x4xbf16>, vector<4x128xbf16>, vector<128x128xf32> -> vector<128x128xf32>
      %c0_55 = arith.constant 0 : index
      %c0_56 = arith.constant 0 : index
      %93 = vector.load %arg13[%c0_55, %c0_56] : memref<1x128xf32, #tpu.memory_space<vmem>>, vector<1x128xf32>
      %cst_57 = arith.constant 7.812500e-03 : f32
      %94 = vector.broadcast %cst_57 : f32 to vector<1x128xf32>
      %95 = arith.mulf %93, %94 : vector<1x128xf32>
      %c0_58 = arith.constant 0 : index
      %c0_59 = arith.constant 0 : index
      %96 = vector.load %arg14[%c0_58, %c0_59] : memref<1x128xf32, #tpu.memory_space<vmem>>, vector<1x128xf32>
      %cst_60 = arith.constant 7.812500e-03 : f32
      %97 = vector.broadcast %cst_60 : f32 to vector<1x128xf32>
      %98 = arith.mulf %96, %97 : vector<1x128xf32>
      %99 = arith.mulf %95, %95 : vector<1x128xf32>
      %100 = arith.subf %98, %99 : vector<1x128xf32>
      %cst_61 = arith.constant 0.000000e+00 : f32
      %101 = vector.broadcast %cst_61 : f32 to vector<1x128xf32>
      %102 = arith.maximumf %100, %101 : vector<1x128xf32>
      %c0_62 = arith.constant 0 : index
      %c0_63 = arith.constant 0 : index
      %103 = vector.load %arg8[%c0_62, %c0_63] : memref<1x128xf32, #tpu.memory_space<vmem>>, vector<1x128xf32>
      %cst_64 = arith.constant 9.99999974E-6 : f32
      %104 = vector.broadcast %cst_64 : f32 to vector<1x128xf32>
      %105 = arith.addf %102, %104 : vector<1x128xf32>
      %106 = math.rsqrt %105 : vector<1x128xf32>
      %107 = arith.mulf %103, %106 : vector<1x128xf32>
      %c0_65 = arith.constant 0 : index
      %c0_66 = arith.constant 0 : index
      %108 = vector.load %arg9[%c0_65, %c0_66] : memref<1x128xf32, #tpu.memory_space<vmem>>, vector<1x128xf32>
      %109 = arith.mulf %95, %107 : vector<1x128xf32>
      %110 = arith.subf %108, %109 : vector<1x128xf32>
      %111 = vector.broadcast %107 : vector<1x128xf32> to vector<128x128xf32>
      %112 = arith.mulf %92, %111 : vector<128x128xf32>
      %113 = vector.broadcast %110 : vector<1x128xf32> to vector<128x128xf32>
      %114 = arith.addf %112, %113 : vector<128x128xf32>
      %115 = arith.addf %88, %114 : vector<128x128xf32>
      %cst_67 = arith.constant 0.000000e+00 : f32
      %116 = vector.broadcast %cst_67 : f32 to vector<128x128xf32>
      %117 = arith.maximumf %115, %116 : vector<128x128xf32>
      %118 = vector.shape_cast %117 : vector<128x128xf32> to vector<2x8x8x128xf32>
      %119 = arith.truncf %118 : vector<2x8x8x128xf32> to vector<2x8x8x128xbf16>
      %c0_68 = arith.constant 0 : index
      %c0_69 = arith.constant 0 : index
      %c0_70 = arith.constant 0 : index
      %c0_71 = arith.constant 0 : index
      %120 = vector.load %arg10[%c0_68, %c0_69, %c0_70, %c0_71] : memref<2x8x8x128xbf16, #tpu.memory_space<vmem>>, vector<2x8x8x128xbf16>
      tpu.vector_store %arg10[%c0_68, %c0_69, %c0_70, %c0_71], %119 {strides = array<i32>} : memref<2x8x8x128xbf16, #tpu.memory_space<vmem>>, vector<2x8x8x128xbf16>,
    } else {
    }
    return
  }
  func.func @transform_0(%arg0: i32, %arg1: i32) -> (i32, i32, i32, i32) {
    %c0_i32 = arith.constant 0 : i32
    %c0_i32_0 = arith.constant 0 : i32
    %c0_i32_1 = arith.constant 0 : i32
    %c0_i32_2 = arith.constant 0 : i32
    return %arg1, %c0_i32, %c0_i32_0, %c0_i32_1 : i32, i32, i32, i32
  }
  func.func @transform_1(%arg0: i32, %arg1: i32) -> (i32, i32, i32, i32) {
    %c0_i32 = arith.constant 0 : i32
    %c0_i32_0 = arith.constant 0 : i32
    %c0_i32_1 = arith.constant 0 : i32
    %c0_i32_2 = arith.constant 0 : i32
    return %arg1, %c0_i32, %c0_i32_0, %c0_i32_1 : i32, i32, i32, i32
  }
  func.func @transform_2(%arg0: i32, %arg1: i32) -> (i32, i32, i32) {
    %c0_i32 = arith.constant 0 : i32
    %c0_i32_0 = arith.constant 0 : i32
    %c0_i32_1 = arith.constant 0 : i32
    %c0_i32_2 = arith.constant 0 : i32
    return %c0_i32, %c0_i32_0, %c0_i32_1 : i32, i32, i32
  }
  func.func @transform_3(%arg0: i32, %arg1: i32) -> (i32, i32) {
    %c0_i32 = arith.constant 0 : i32
    %c0_i32_0 = arith.constant 0 : i32
    %c0_i32_1 = arith.constant 0 : i32
    return %c0_i32, %c0_i32_0 : i32, i32
  }
  func.func @transform_4(%arg0: i32, %arg1: i32) -> (i32, i32) {
    %c0_i32 = arith.constant 0 : i32
    %c0_i32_0 = arith.constant 0 : i32
    %c0_i32_1 = arith.constant 0 : i32
    return %c0_i32, %c0_i32_0 : i32, i32
  }
  func.func @transform_5(%arg0: i32, %arg1: i32) -> (i32, i32) {
    %c0_i32 = arith.constant 0 : i32
    %c0_i32_0 = arith.constant 0 : i32
    %c0_i32_1 = arith.constant 0 : i32
    return %c0_i32, %c0_i32_0 : i32, i32
  }
  func.func @transform_6(%arg0: i32, %arg1: i32) -> (i32, i32) {
    %c0_i32 = arith.constant 0 : i32
    %c0_i32_0 = arith.constant 0 : i32
    %c0_i32_1 = arith.constant 0 : i32
    return %c0_i32, %c0_i32_0 : i32, i32
  }
  func.func @transform_7(%arg0: i32, %arg1: i32) -> (i32, i32) {
    %c0_i32 = arith.constant 0 : i32
    %c0_i32_0 = arith.constant 0 : i32
    %c0_i32_1 = arith.constant 0 : i32
    return %c0_i32, %c0_i32_0 : i32, i32
  }
  func.func @transform_8(%arg0: i32, %arg1: i32) -> (i32, i32, i32, i32) {
    %0 = arith.muli %arg0, %arg1 : i32
    %c0_i32 = arith.constant 0 : i32
    %c0_i32_0 = arith.constant 0 : i32
    %c0_i32_1 = arith.constant 0 : i32
    %c0_i32_2 = arith.constant 0 : i32
    return %0, %c0_i32, %c0_i32_0, %c0_i32_1 : i32, i32, i32, i32
  }
}

</mosaic_0001>

<bundles_post_ra>
// kernel: res_basic_blk_forward.2
= control target key start
LH: loop header
LB: loop body
LE: loop exit
PB: predicated region body
PF: predicated region fallthrough
CT: control target
= control target key end

     0   :  { %s2571_s15 = smov 0   ;;  %s2573_s16 = smov 0   ;;  %s4098_s0 = inlined_call_operand.vmem [shape: bf16[4,2,9,9,4], index: 0, kind: input, shape index: {}]   ;;  %s4099_s1 = inlined_call_operand.vmem [shape: bf16[36,128], index: 1, kind: input, shape index: {}]   ;;  %s4100_s2 = inlined_call_operand.vmem [shape: f32[1,128], index: 2, kind: input, shape index: {}]   ;;  %s4101_s3 = inlined_call_operand.vmem [shape: f32[1,128], index: 3, kind: input, shape index: {}]   ;;  %s4102_s4 = inlined_call_operand.vmem [shape: bf16[2,10,10,128], index: 4, kind: output, shape index: {}]  }
   0x1   :  { %s2575_s17 = smov 0  }
   0x2 LB: > { %s26_s18 = sadd.s32 1, %s2530_s16  ;;  %p2120_p0 = scmp.ge.s32.totalorder %s2534_s17, 1  ;;  %s2534_s17 = sphi %s2575_s17, %s14_s17   ;;  %s2530_s16 = sphi %s2573_s16, %s4112_s16   ;;  %s2526_s15 = sphi %s2571_s15, %s4111_s15  }
   0x3   : > { %p28_p1 = scmp.ge.s32.totalorder %s26_s18, 2  ;;  %p178_p2 = scmp.lt.s32.totalorder %s2534_s17, 3 }
   0x5   : > { %s4114_s18 = smov (%p28_p1, %s26_s18), 0  ;;  %p179_p3 = pnand %p2120_p0, %p178_p2 }
   0x6   : > { %p224_p4 = scmp.eq.s32.totalorder (!%p179_p3), %s2526_s15, 0 }
   0x7   : > { %182 = sbr.rel (%p179_p3) target bundleno = 635 (0x27b), region = 36 }
   0xe   : > { %229 = sbr.rel (!%p224_p4) target bundleno = 21 (0x15), region = 40  ;;  %v2536_v0 = vmov (%p224_p4), 0.0  }
   0xf   : > { %230 = vst [vmem:[#allocation2] sm:$0x1] (%p224_p4), %v2536_v0  ;;  %231 = vst [vmem:[#allocation3] sm:$0x1] (%p224_p4), %v2536_v0 }
  0x15 PF: > { %v2595_v1 = vld [vmem:[%s4098_s0 + $0xa0] sm:$0xf]  ;;  %v2600_v2 = vld [vmem:[%s4098_s0 + $0xa8] sm:$0xf]  ;;  %v268_v4 = vld [vmem:[%s4098_s0 + $0x90] sm:$0xf] }
  0x16   : > { %v2131_v3 = vcombine.low %v2595_v1, %v2600_v2  ;;  %v2610_v5 = vld [vmem:[%s4098_s0 + $0x98] sm:$0xf]  ;;  %v2616_v7 = vld [vmem:[%s4098_s0 + $0xe8] sm:$0xf]  ;;  %v2621_v8 = vld [vmem:[%s4098_s0 + $0xf0] sm:$0xf] }
  0x17   : > { %v2130_v6 = vcombine.low %v268_v4, %v2610_v5  ;;  %v277_v9 = vld [vmem:[%s4098_s0 + $0xd8] sm:$0xf]  ;;  %s2537_s7 = smov 4   ;;  %v2135_v10 = vcombine.low %v2616_v7, %v2621_v8  ;;  %v2632_v11 = vld [vmem:[%s4098_s0 + $0xe0] sm:$0xf]  ;;  %s2538_s23 = smov 8  }
  0x18   : > { %895 = vrot.lane.b32.xlu1 %v2131_v3, %s2537_s7  ;;  %v250_v12 = vld [vmem:[%s4098_s0 + $0x48] sm:$0xf]  ;;  %v251_v13 = vld [vmem:[%s4098_s0 + $0x4c] sm:$0x1]  ;;  %v2134_v14 = vcombine.low %v277_v9, %v2632_v11  ;;  %v2645_v15 = vld [vmem:[%s4098_s0 + $0x50] sm:$0xf] }
  0x19   : > { %893 = vrot.lane.b32.xlu0 %v2130_v6, %s2537_s7  ;;  %v253_v16 = vld [vmem:[%s4098_s0 + $0x54] sm:$0x1]  ;;  %vm334_vm0 = vsmask.f32 3328  ;;  %vm335_vm1 = vsmask.f32 7440 }
  0x1a   : > { %v450_v17 = vshrl.u32 %v250_v12, 16  ;;  %v453_v18 = vshll.u32 %v250_v12, 16  ;;  %v459_v19 = vshll.u32 %v251_v13, 16  ;;  %v464_v20 = vshrl.u32 %v2645_v15, 16  ;;  %v232_v23 = vld [vmem:[%s4098_s0] sm:$0xf]  ;;  %vm2671_vm2 = vmor %vm334_vm0, %vm335_vm1 }
  0x1b   : > { %v467_v21 = vshll.u32 %v2645_v15, 16  ;;  %v473_v22 = vshll.u32 %v253_v16, 16  ;;  %v233_v27 = vld [vmem:[%s4098_s0 + $0x4] sm:$0x1]  ;;  %v338_v28 = vshrl.u32 %v232_v23, 16  ;;  %v341_v33 = vshll.u32 %v232_v23, 16 }
  0x1c   : > { %903 = vrot.lane.b32.xlu1 %v2135_v10, %s2537_s7  ;;  %v452_v24 = vrot.slane %v450_v17, 4  ;;  %v455_v25 = vrot.slane %v453_v18, 5  ;;  %v461_v26 = vrot.slane %v459_v19, 5  ;;  %v466_v29 = vrot.slane %v464_v20, 4  ;;  %v2663_v32 = vld [vmem:[%s4098_s0 + $0x8] sm:$0xf] }
  0x1d   : > { %901 = vrot.lane.b32.xlu0 %v2134_v14, %s2537_s7  ;;  %v469_v30 = vrot.slane %v467_v21, 5  ;;  %v475_v31 = vrot.slane %v473_v22, 5  ;;  %v235_v35 = vld [vmem:[%s4098_s0 + $0xc] sm:$0x1]  ;;  %v340_v36 = vrot.slane %v338_v28, 4  ;;  %v347_v37 = vshll.u32 %v233_v27, 16 }
  0x1e   : > { %v456_v34 = vor.u32 %v455_v25, %v452_v24  ;;  %v352_v38 = vshrl.u32 %v2663_v32, 16  ;;  %v343_v41 = vrot.slane %v341_v33, 5  ;;  %v355_v42 = vshll.u32 %v2663_v32, 16  ;;  %v2679_v44 = vld [vmem:[%s4098_s0 + $0x58] sm:$0xf]  ;;  %s2539_s21 = smov 12  }
  0x1f   : > { %v470_v40 = vor.u32 %v469_v30, %v466_v29  ;;  %v361_v43 = vshll.u32 %v235_v35, 16  ;;  %v349_v46 = vrot.slane %v347_v37, 5  ;;  %v255_v48 = vld [vmem:[%s4098_s0 + $0x5c] sm:$0x1]  ;;  %v478_v49 = vshrl.u32 %v2679_v44, 16  ;;  %s2540_s12 = smov 16  }
  0x20   : > { %v457_v45 = vrot.slane %v456_v34, 4  ;;  %v354_v47 = vrot.slane %v352_v38, 4  ;;  %v344_v51 = vor.u32 %v343_v41, %v340_v36  ;;  %v357_v52 = vrot.slane %v355_v42, 5  ;;  %v2688_v54 = vld [vmem:[%s4098_s0 + $0x60] sm:$0xf]  ;;  %s2541_s29 = smov 20  }
  0x21   : > { %v471_v50 = vrot.slane %v470_v40, 4  ;;  %v363_v53 = vrot.slane %v361_v43, 5  ;;  %v257_v56 = vld [vmem:[%s4098_s0 + $0x64] sm:$0x1]  ;;  %v480_v57 = vrot.slane %v478_v49, 4  ;;  %v481_v58 = vshll.u32 %v2679_v44, 16 }
  0x22   : > { %v462_v55 = vsel %vm2671_vm2, %v457_v45, %v461_v26  ;;  %v487_v59 = vshll.u32 %v255_v48, 16  ;;  %v345_v61 = vrot.slane %v344_v51, 4  ;;  %v358_v62 = vor.u32 %v357_v52, %v354_v47  ;;  %v2704_v0 = vld [vmem:[%s4098_s0 + $0x10] sm:$0xf]  ;;  %v237_v3 = vld [vmem:[%s4098_s0 + $0x14] sm:$0x1] }
  0x23   : > { %v2698_v60 = vsel %vm2671_vm2, %v471_v50, %v475_v31  ;;  %v492_v63 = vshrl.u32 %v2688_v54, 16  ;;  %v483_v6 = vrot.slane %v481_v58, 5  ;;  %v495_v10 = vshll.u32 %v2688_v54, 16  ;;  %v2714_v12 = vld [vmem:[%s4098_s0 + $0x18] sm:$0xf]  ;;  %s2542_s6 = smov 24  }
  0x24   : > { %v2142_v4 = vcombine.low %v462_v55, %v2698_v60  ;;  %v489_v9 = vrot.slane %v487_v59, 5  ;;  %v350_v13 = vsel %vm2671_vm2, %v345_v61, %v349_v46  ;;  %v359_v14 = vrot.slane %v358_v62, 4  ;;  %v239_v24 = vld [vmem:[%s4098_s0 + $0x1c] sm:$0x1]  ;;  %v302_v36 = vld [vmem:[%s4098_s0 + $0x168] sm:$0xf] }
  0x25   : > { %v494_v16 = vrot.slane %v492_v63, 4  ;;  %v501_v17 = vshll.u32 %v257_v56, 16  ;;  %v484_v18 = vor.u32 %v483_v6, %v480_v57  ;;  %v497_v19 = vrot.slane %v495_v10, 5  ;;  %v304_v41 = vld [vmem:[%s4098_s0 + $0x170] sm:$0xf]  ;;  %s2543_s30 = smov 28  }
  0x26   : > { %941 = vrot.lane.b32.xlu1 %v2142_v4, %s2538_s23  ;;  %v366_v20 = vshrl.u32 %v2704_v0, 16  ;;  %v369_v21 = vshll.u32 %v2704_v0, 16  ;;  %v2723_v22 = vsel %vm2671_vm2, %v359_v14, %v363_v53  ;;  %v375_v25 = vshll.u32 %v237_v3, 16  ;;  %v286_v48 = vld [vmem:[%s4098_s0 + $0x120] sm:$0xf]  ;;  %s2544_s13 = smov 32  }
  0x27   : > { %v503_v23 = vrot.slane %v501_v17, 5  ;;  %v380_v26 = vshrl.u32 %v2714_v12, 16  ;;  %v2138_v27 = vcombine.low %v350_v13, %v2723_v22  ;;  %v485_v28 = vrot.slane %v484_v18, 4  ;;  %v288_v53 = vld [vmem:[%s4098_s0 + $0x128] sm:$0xf]  ;;  %p2205_p5 = scmp.ne.s32.totalorder %s2526_s15, 0 }
  0x28   : > { %v498_v29 = vor.u32 %v497_v19, %v494_v16  ;;  %v368_v30 = vrot.slane %v366_v20, 4  ;;  %v371_v31 = vrot.slane %v369_v21, 5  ;;  %v377_v33 = vrot.slane %v375_v25, 5  ;;  %v306_v59 = vld [vmem:[%s4098_s0 + $0x178] sm:$0xf] }
  0x29   : > { %v382_v34 = vrot.slane %v380_v26, 4  ;;  %v383_v35 = vshll.u32 %v2714_v12, 16  ;;  %933 = vrot.lane.b32.xlu0 %v2138_v27, %s2538_s23  ;;  %v2737_v37 = vsel %vm2671_vm2, %v485_v28, %v489_v9  ;;  %v389_v40 = vshll.u32 %v239_v24, 16  ;;  %v308_v4 = vld [vmem:[%s4098_s0 + $0x180] sm:$0xf] }
  0x2a   : > { %v499_v38 = vrot.slane %v498_v29, 4  ;;  %v674_v42 = vshrl.u32 %v302_v36, 16  ;;  %v372_v43 = vor.u32 %v371_v31, %v368_v30  ;;  %v677_v46 = vshll.u32 %v302_v36, 16  ;;  %v290_v19 = vld [vmem:[%s4098_s0 + $0x130] sm:$0xf] }
  0x2b   : > { %v385_v45 = vrot.slane %v383_v35, 5  ;;  %v688_v47 = vshrl.u32 %v304_v41, 16  ;;  %v391_v50 = vrot.slane %v389_v40, 5  ;;  %v691_v52 = vshll.u32 %v304_v41, 16  ;;  %v292_v25 = vld [vmem:[%s4098_s0 + $0x138] sm:$0xf] }
  0x2c   : > { %v2747_v49 = vsel %vm2671_vm2, %v499_v38, %v503_v23  ;;  %v676_v51 = vrot.slane %v674_v42, 4  ;;  %v373_v56 = vrot.slane %v372_v43, 4  ;;  %v679_v58 = vrot.slane %v677_v46, 5 }
  0x2d   : > { %v2143_v55 = vcombine.low %v2737_v37, %v2747_v49  ;;  %v386_v57 = vor.u32 %v385_v45, %v382_v34  ;;  %v690_v61 = vrot.slane %v688_v47, 4  ;;  %v693_v62 = vrot.slane %v691_v52, 5 }
  0x2e   : > { %v2150_v63 = vcombine.low %v302_v36, %v304_v41  ;;  %v562_v3 = vshrl.u32 %v286_v48, 16  ;;  %v2763_v6 = vsel %vm2671_vm2, %v373_v56, %v377_v33  ;;  %v565_v10 = vshll.u32 %v286_v48, 16 }
  0x2f   : > { %943 = vrot.lane.b32.xlu1 %v2143_v55, %s2538_s23  ;;  %v387_v9 = vrot.slane %v386_v57, 4  ;;  %v576_v13 = vshrl.u32 %v288_v53, 16  ;;  %v579_v16 = vshll.u32 %v288_v53, 16  ;;  %v2146_v17 = vcombine.low %v286_v48, %v288_v53  ;;  %v2461_v48 = vld [vmem:[%s4098_s0 + $0x1f8] ss:$8 sps:$4 sm:$0xff]  }
  0x30   : > { %v564_v14 = vrot.slane %v562_v3, 4  ;;  %v702_v18 = vshrl.u32 %v306_v59, 16  ;;  %v567_v21 = vrot.slane %v565_v10, 5  ;;  %v705_v24 = vshll.u32 %v306_v59, 16  ;;  %v303_v53 = vld [vmem:[%s4098_s0 + $0x16c] sm:$0x1] }
  0x31   : > { %v2770_v20 = vsel %vm2671_vm2, %v387_v9, %v391_v50  ;;  %v2772_v23 = vrot.slane %v576_v13, 4  ;;  %v581_v27 = vrot.slane %v579_v16, 5  ;;  %v716_v29 = vshrl.u32 %v308_v4, 16  ;;  %v305_v55 = vld [vmem:[%s4098_s0 + $0x174] sm:$0x1] }
  0x32   : > { %v2139_v26 = vcombine.low %v2763_v6, %v2770_v20  ;;  %v704_v28 = vrot.slane %v702_v18, 4  ;;  %v707_v30 = vrot.slane %v705_v24, 5  ;;  %v719_v31 = vshll.u32 %v308_v4, 16  ;;  %v2463_v3 = vld [vmem:[%s4098_s0 + $0x208] ss:$8 sps:$4 sm:$0xff]  }
  0x33   : > { %997 = vrot.lane.b32.xlu1 %v2150_v63, %s2539_s21  ;;  %v2151_v33 = vcombine.low %v306_v59, %v308_v4  ;;  %v590_v34 = vshrl.u32 %v290_v19, 16  ;;  %v718_v35 = vrot.slane %v716_v29, 4  ;;  %v593_v36 = vshll.u32 %v290_v19, 16  ;;  %v289_v4 = vld [vmem:[%s4098_s0 + $0x12c] sm:$0x1] }
  0x34   : > { %935 = vrot.lane.b32.xlu0 %v2139_v26, %s2538_s23  ;;  %v604_v38 = vshrl.u32 %v292_v25, 16  ;;  %v607_v40 = vshll.u32 %v292_v25, 16  ;;  %v721_v41 = vrot.slane %v719_v31, 5  ;;  %v680_v43 = vor.u32 %v679_v58, %v676_v51  ;;  %v293_v31 = vld [vmem:[%s4098_s0 + $0x13c] sm:$0x1] }
  0x35   : > { %v592_v42 = vrot.slane %v590_v34, 4  ;;  %v595_v45 = vrot.slane %v593_v36, 5  ;;  %v2147_v47 = vcombine.low %v290_v19, %v292_v25  ;;  %v694_v50 = vor.u32 %v693_v62, %v690_v61  ;;  %v287_v61 = vld [vmem:[%s4098_s0 + $0x124] sm:$0x1]  ;;  %v307_v19 = vld [vmem:[%s4098_s0 + $0x17c] sm:$0x1] }
  0x36   : > { %v606_v46 = vrot.slane %v604_v38, 4  ;;  %v609_v52 = vrot.slane %v607_v40, 5  ;;  %v681_v51 = vrot.slane %v680_v43, 4  ;;  %v568_v56 = vor.u32 %v567_v21, %v564_v14  ;;  %v309_v25 = vld [vmem:[%s4098_s0 + $0x184] sm:$0x1] }
  0x37   : > { %999 = vrot.lane.b32.xlu1 %v2151_v33, %s2539_s21  ;;  %v708_v57 = vor.u32 %v707_v30, %v704_v28  ;;  %v683_v58 = vshll.u32 %v303_v53, 16  ;;  %v695_v59 = vrot.slane %v694_v50, 4  ;;  %v697_v63 = vshll.u32 %v305_v55, 16 }
  0x38   : > { %989 = vrot.lane.b32.xlu0 %v2146_v17, %s2539_s21  ;;  %v722_v62 = vor.u32 %v721_v41, %v718_v35  ;;  %v569_v9 = vrot.slane %v568_v56, 4  ;;  %v571_v10 = vshll.u32 %v287_v61, 16  ;;  %v582_v13 = vor.u32 %v581_v27, %v2772_v23  ;;  %v291_v23 = vld [vmem:[%s4098_s0 + $0x134] sm:$0x1]  ;;  %v2462_v27 = vld [vmem:[%s4098_s0 + $0x1b0] ss:$8 sps:$4 sm:$0xff]  }
  0x39   : > { %v709_v14 = vrot.slane %v708_v57, 4  ;;  %v685_v16 = vrot.slane %v683_v58, 5  ;;  %v699_v17 = vrot.slane %v697_v63, 5  ;;  %v585_v18 = vshll.u32 %v289_v4, 16 }
  0x3a   : > { %v723_v21 = vrot.slane %v722_v62, 4  ;;  %v573_v24 = vrot.slane %v571_v10, 5  ;;  %v711_v26 = vshll.u32 %v307_v19, 16  ;;  %v725_v30 = vshll.u32 %v309_v25, 16  ;;  %v2849_v62 = vld [vmem:[%s4098_s0 + $0x68] sm:$0xf] }
  0x3b   : > { %1053 = vrot.lane.b32.xlu1 %v2461_v48, %s2540_s12  ;;  %v686_v28 = vsel %vm2671_vm2, %v681_v51, %v685_v16  ;;  %v700_v29 = vsel %vm2671_vm2, %v695_v59, %v699_v17  ;;  %v596_v33 = vor.u32 %v595_v45, %v592_v42  ;;  %v583_v34 = vrot.slane %v582_v13, 4  ;;  %v2464_v48 = vld [vmem:[%s4098_s0 + $0x1c0] ss:$8 sps:$4 sm:$0xff]   ;;  %v2894_v25 = vld [vmem:[%s4098_s0 + $0xb0] sm:$0xf] }
  0x3c   : > { %991 = vrot.lane.b32.xlu0 %v2147_v47, %s2539_s21  ;;  %v587_v35 = vrot.slane %v585_v18, 5  ;;  %v713_v36 = vrot.slane %v711_v26, 5  ;;  %v610_v38 = vor.u32 %v609_v52, %v606_v46  ;;  %v727_v40 = vrot.slane %v725_v30, 5  ;;  %v2881_v18 = vld [vmem:[%s4098_s0 + $0xf8] sm:$0xf] }
  0x3d   : > { %v599_v41 = vshll.u32 %v291_v23, 16  ;;  %v2166_v43 = vcombine.low %v686_v28, %v700_v29  ;;  %v613_v47 = vshll.u32 %v293_v31, 16  ;;  %v574_v50 = vsel %vm2671_vm2, %v569_v9, %v573_v24  ;;  %v2904_v28 = vld [vmem:[%s4098_s0 + $0x28] sm:$0xf]  ;;  %v2912_v30 = vld [vmem:[%s4098_s0 + $0x100] sm:$0xf] }
  0x3e   : > { %v714_v42 = vsel %vm2671_vm2, %v709_v14, %v713_v36  ;;  %v728_v45 = vsel %vm2671_vm2, %v723_v21, %v727_v40  ;;  %v597_v46 = vrot.slane %v596_v33, 4  ;;  %v588_v52 = vsel %vm2671_vm2, %v583_v34, %v587_v35 }
  0x3f   : > { %1055 = vrot.lane.b32.xlu1 %v2463_v3, %s2540_s12  ;;  %v601_v53 = vrot.slane %v599_v41, 5  ;;  %v611_v55 = vrot.slane %v610_v38, 4  ;;  %v615_v51 = vrot.slane %v613_v47, 5  ;;  %v2167_v56 = vcombine.low %v714_v42, %v728_v45  ;;  %v2496_v38 = vld [vmem:[%s4099_s1 + $0x8] sm:$0xff]   ;;  %v2945_v45 = vld [vmem:[%s4098_s0 + $0x30] sm:$0xf] }
  0x40   : > { %1045 = vrot.lane.b32.xlu0 %v2462_v27, %s2540_s12  ;;  %v2162_v57 = vcombine.low %v574_v50, %v588_v52  ;;  %v2174_v63 = vcombine.low %v2645_v15, %v2679_v44  ;;  %v506_v3 = vshrl.u32 %v2849_v62, 16  ;;  %v509_v4 = vshll.u32 %v2849_v62, 16  ;;  %v2862_v44 = vld [vmem:[%s4098_s0 + $0x20] sm:$0xf]  ;;  %v2954_v52 = vld [vmem:[%s4098_s0 + $0xb8] sm:$0xf] }
  0x41   : > { %v602_v58 = vsel %vm2671_vm2, %v597_v46, %v601_v53  ;;  %v616_v59 = vsel %vm2671_vm2, %v611_v55, %v615_v51  ;;  %v2175_v9 = vcombine.low %v2688_v54, %v2849_v62  ;;  %v2170_v15 = vcombine.low %v2663_v32, %v2704_v0  ;;  %v259_v32 = vld [vmem:[%s4098_s0 + $0x6c] sm:$0x1]  ;;  %v2495_v0 = vld [vmem:[%s4099_s1] sm:$0xff]  }
  0x42   : > { %v2163_v61 = vcombine.low %v602_v58, %v616_v59  ;;  %v394_v10 = vshrl.u32 %v2862_v44, 16  ;;  %v397_v13 = vshll.u32 %v2862_v44, 16  ;;  %v508_v14 = vrot.slane %v506_v3, 4  ;;  %2387 = vmatprep.subr.bf16.mxu0 %v2495_v0  ;;  %2409 = vmatprep.subr.bf16.mxu1 %v2495_v0  ;;  %v243_v55 = vld [vmem:[%s4098_s0 + $0x2c] sm:$0x1] }
  0x43   : > { %1093 = vrot.lane.b32.xlu1 %v2166_v43, %s2541_s29  ;;  %v511_v16 = vrot.slane %v509_v4, 5  ;;  %v2182_v54 = vcombine.low %v2632_v11, %v2616_v7  ;;  %v2171_v17 = vcombine.low %v2714_v12, %v2862_v44  ;;  %v2886_v7 = vld [vmem:[%s4098_s0 + $0x70] sm:$0xf]  ;;  %v241_v11 = vld [vmem:[%s4098_s0 + $0x24] sm:$0x1]  ;;  %v515_v21 = vshll.u32 %v259_v32, 16  ;;  %2388 = vmatpush3.bf16.msra.mxu0 %v2495_v0 }
  0x44   : > { %1047 = vrot.lane.b32.xlu0 %v2464_v48, %s2540_s12  ;;  %v396_v24 = vrot.slane %v394_v10, 4  ;;  %v399_v12 = vrot.slane %v397_v13, 5  ;;  %2412 = vmatpush3.bf16.msra.mxu1 %v2495_v0  ;;  %v2183_v26 = vcombine.low %v2621_v8, %v2881_v18  ;;  %v520_v23 = vshrl.u32 %v2886_v7, 16  ;;  %v2917_v8 = vld [vmem:[%s4098_s0 + $0x78] sm:$0xf] }
  0x45   : > { %v512_v19 = vor.u32 %v511_v16, %v508_v14  ;;  %v523_v27 = vshll.u32 %v2886_v7, 16  ;;  %v2178_v29 = vcombine.low %v2610_v5, %v2595_v1  ;;  %v2190_v31 = vcombine.low %v2698_v60, %v2737_v37  ;;  %v2924_v1 = vld [vmem:[%s4098_s0 + $0x80] sm:$0xf]  ;;  %v261_v60 = vld [vmem:[%s4098_s0 + $0x74] sm:$0x1]  ;;  %2389 = vmatprep.subr.bf16.mxu0 %v2496_v38  ;;  %2410 = vmatprep.subr.bf16.mxu1 %v2496_v38 }
  0x46   : > { %v403_v33 = vshll.u32 %v241_v11, 16  ;;  %v517_v34 = vrot.slane %v515_v21, 5  ;;  %v400_v35 = vor.u32 %v399_v12, %v396_v24  ;;  %v408_v36 = vshrl.u32 %v2904_v28, 16  ;;  %v265_v4 = vld [vmem:[%s4098_s0 + $0x84] sm:$0x1] }
  0x47   : > { %1095 = vrot.lane.b32.xlu1 %v2167_v56, %s2541_s29  ;;  %v513_v5 = vrot.slane %v512_v19, 4  ;;  %v522_v37 = vrot.slane %v520_v23, 4  ;;  %v525_v40 = vrot.slane %v523_v27, 5  ;;  %v411_v41 = vshll.u32 %v2904_v28, 16  ;;  %2390 = vmatpush3.bf16.msra.mxu0 %v2496_v38  ;;  %v2997_v19 = vld [vmem:[%s4098_s0 + $0x110] sm:$0xf] }
  0x48   : > { %1085 = vrot.lane.b32.xlu0 %v2162_v57, %s2541_s29  ;;  %v534_v43 = vshrl.u32 %v2917_v8, 16  ;;  %v2179_v47 = vcombine.low %v2600_v2, %v2894_v25  ;;  %v537_v48 = vshll.u32 %v2917_v8, 16  ;;  %v548_v50 = vshrl.u32 %v2924_v1, 16  ;;  %v2966_v57 = vld [vmem:[%s4098_s0 + $0x38] sm:$0xf]  ;;  %2413 = vmatpush3.bf16.msra.mxu1 %v2496_v38 }
  0x49   : > { %v551_v42 = vshll.u32 %v2924_v1, 16  ;;  %v2186_v46 = vcombine.low %v2723_v22, %v2763_v6  ;;  %v2136_v2 = vcombine.low %v2881_v18, %v2912_v30  ;;  %v405_v53 = vrot.slane %v403_v33, 5  ;;  %v245_v23 = vld [vmem:[%s4098_s0 + $0x34] sm:$0x1] }
  0x4a   : > { %v2961_v51 = vsel %vm2671_vm2, %v513_v5, %v517_v34  ;;  %v401_v22 = vrot.slane %v400_v35, 4  ;;  %v529_v6 = vshll.u32 %v261_v60, 16  ;;  %v410_v56 = vrot.slane %v408_v36, 4  ;;  %v3015_v36 = vld [vmem:[%s4098_s0 + $0xc8] sm:$0xf] }
  0x4b   : > { %1121 = vrot.lane.b32.xlu1 %v2174_v63, %s2542_s6  ;;  %v526_v58 = vor.u32 %v525_v40, %v522_v37  ;;  %v413_v59 = vrot.slane %v411_v41, 5  ;;  %v263_v63 = vld [vmem:[%s4098_s0 + $0x7c] sm:$0x1]  ;;  %v422_v3 = vshrl.u32 %v2945_v45, 16  ;;  %v553_v10 = vrot.slane %v551_v42, 5 }
  0x4c   : > { %1087 = vrot.lane.b32.xlu0 %v2163_v61, %s2541_s29  ;;  %v536_v61 = vrot.slane %v534_v43, 4  ;;  %v425_v13 = vshll.u32 %v2945_v45, 16  ;;  %v2132_v14 = vcombine.low %v2894_v25, %v2954_v52  ;;  %v436_v16 = vshrl.u32 %v2966_v57, 16  ;;  %v247_v60 = vld [vmem:[%s4098_s0 + $0x3c] sm:$0x1] }
  0x4d   : > { %v2191_v32 = vcombine.low %v2747_v49, %v2961_v51  ;;  %v2986_v0 = vsel %vm2671_vm2, %v401_v22, %v405_v53  ;;  %v531_v18 = vrot.slane %v529_v6, 5  ;;  %v417_v11 = vshll.u32 %v243_v55, 16  ;;  %v310_v53 = vld [vmem:[%s4098_s0 + $0x188] sm:$0xf] }
  0x4e   : > { %v527_v21 = vrot.slane %v526_v58, 4  ;;  %v414_v49 = vor.u32 %v413_v59, %v410_v56  ;;  %v543_v24 = vshll.u32 %v263_v63, 16  ;;  %v557_v12 = vshll.u32 %v265_v4, 16  ;;  %v312_v4 = vld [vmem:[%s4098_s0 + $0x190] sm:$0xf] }
  0x4f   : > { %1123 = vrot.lane.b32.xlu1 %v2175_v9, %s2542_s6  ;;  %v539_v9 = vrot.slane %v537_v48, 5  ;;  %v424_v27 = vrot.slane %v422_v3, 4  ;;  %v438_v33 = vrot.slane %v436_v16, 4  ;;  %v2187_v34 = vcombine.low %v2770_v20, %v2986_v0 }
  0x50   : > { %1113 = vrot.lane.b32.xlu0 %v2170_v15, %s2542_s6  ;;  %v550_v15 = vrot.slane %v548_v50, 4  ;;  %v419_v38 = vrot.slane %v417_v11, 5  ;;  %v3023_v37 = vsel %vm2671_vm2, %v527_v21, %v531_v18  ;;  %v415_v20 = vrot.slane %v414_v49, 4  ;;  %v314_v18 = vld [vmem:[%s4098_s0 + $0x198] sm:$0xf] }
  0x51   : > { %v540_v25 = vor.u32 %v539_v9, %v536_v61  ;;  %v545_v40 = vrot.slane %v543_v24, 5  ;;  %v431_v41 = vshll.u32 %v245_v23, 16  ;;  %v559_v48 = vrot.slane %v557_v12, 5  ;;  %v316_v24 = vld [vmem:[%s4098_s0 + $0x1a0] sm:$0xf] }
  0x52   : > { %v2144_v55 = vcombine.low %v2961_v51, %v3023_v37  ;;  %v3036_v22 = vsel %vm2671_vm2, %v415_v20, %v419_v38  ;;  %v730_v56 = vshrl.u32 %v310_v53, 16  ;;  %v733_v61 = vshll.u32 %v310_v53, 16 }
  0x53   : > { %1149 = vrot.lane.b32.xlu1 %v2182_v54, %s2543_s30  ;;  %v439_v54 = vshll.u32 %v2966_v57, 16  ;;  %v541_v43 = vrot.slane %v540_v25, 4  ;;  %v433_v6 = vrot.slane %v431_v41, 5  ;;  %v744_v9 = vshrl.u32 %v312_v4, 16  ;;  %v3098_v41 = vld [vmem:[%s4098_s0 + $0x150] sm:$0xf] }
  0x54   : > { %1115 = vrot.lane.b32.xlu0 %v2171_v17, %s2542_s6  ;;  %v2991_v17 = vld [vmem:[%s4098_s0 + $0x108] sm:$0xf]  ;;  %v732_v16 = vrot.slane %v730_v56, 4  ;;  %v735_v11 = vrot.slane %v733_v61, 5  ;;  %v761_v23 = vshll.u32 %v314_v18, 16  ;;  %v649_v56 = vshll.u32 %v3098_v41, 16 }
  0x55   : > { %v441_v5 = vrot.slane %v439_v54, 5  ;;  %v2137_v35 = vcombine.low %v2991_v17, %v2997_v19  ;;  %v3041_v58 = vsel %vm2671_vm2, %v541_v43, %v545_v40  ;;  %v3063_v54 = vld [vmem:[%s4098_s0 + $0x148] sm:$0xf]  ;;  %v313_v43 = vld [vmem:[%s4098_s0 + $0x194] sm:$0x1]  ;;  %vm1364_vm3 = vcmask 1041408  }
  0x56   : > { %v632_v49 = vshrl.u32 %v3063_v54, 16  ;;  %v635_v25 = vshll.u32 %v3063_v54, 16  ;;  %v295_v61 = vld [vmem:[%s4098_s0 + $0x144] sm:$0x1]  ;;  %vm1208_vm4 = vcmask 64512   ;;  %vm1183_vm5 = vcmask 31744  }
  0x57   : > { %1151 = vrot.lane.b32.xlu1 %v2183_v26, %s2543_s30  ;;  %v554_v26 = vor.u32 %v553_v10, %v550_v15  ;;  %v442_v42 = vor.u32 %v441_v5, %v438_v33  ;;  %v747_v15 = vshll.u32 %v312_v4, 16  ;;  %v3053_v10 = vld [vmem:[%s4098_s0 + $0x140] sm:$0xf]  ;;  %v772_v5 = vshrl.u32 %v316_v24, 16 }
  0x58   : > { %1141 = vrot.lane.b32.xlu0 %v2178_v29, %s2543_s30  ;;  %v427_v29 = vrot.slane %v425_v13, 5  ;;  %v2140_v13 = vcombine.low %v2986_v0, %v3036_v22  ;;  %v621_v21 = vshll.u32 %v3053_v10, 16  ;;  %v2148_v38 = vcombine.low %v3053_v10, %v3063_v54  ;;  %v297_v54 = vld [vmem:[%s4098_s0 + $0x14c] sm:$0x1] }
  0x59   : > { %v443_v3 = vrot.slane %v442_v42, 4  ;;  %v749_v33 = vrot.slane %v747_v15, 5  ;;  %v637_v42 = vrot.slane %v635_v25, 5  ;;  %v2499_v15 = vld [vmem:[%s4099_s1 + $0x10] ss:$0 sps:$4 sm:$0x33]  }
  0x5a   : > { %v428_v50 = vor.u32 %v427_v29, %v424_v27  ;;  %v311_v27 = vld [vmem:[%s4098_s0 + $0x18c] sm:$0x1]  ;;  %v746_v29 = vrot.slane %v744_v9, 4  ;;  %v623_v40 = vrot.slane %v621_v21, 5  ;;  %v753_v9 = vshll.u32 %v313_v43, 16  ;;  %2415 = vmatprep.subr.msk.bf16.mxu0 %vm1364_vm3, %v2499_v15  ;;  %2416 = vmatprep.subr.msk.bf16.mxu1 %vm1364_vm3, %v2499_v15 }
  0x5b   : > { %1175 = vrot.lane.b32.xlu1 %v2190_v31, %s2544_s13  ;;  %v3006_v31 = vld [vmem:[%s4098_s0 + $0xc0] sm:$0xf]  ;;  %v317_v21 = vld [vmem:[%s4098_s0 + $0x1a4] sm:$0x1]  ;;  %v651_v43 = vrot.slane %v649_v56, 5  ;;  %vm1225_vm6 = vcmask 97280  }
  0x5c   : > { %1143 = vrot.lane.b32.xlu0 %v2179_v47, %s2543_s30  ;;  %v555_v47 = vrot.slane %v554_v26, 4  ;;  %v429_v63 = vrot.slane %v428_v50, 4  ;;  %v758_v26 = vshrl.u32 %v314_v18, 16  ;;  %v634_v50 = vrot.slane %v632_v49, 4 }
  0x5d   : > { %v2128_v49 = vcombine.low %v2849_v62, %v2886_v7  ;;  %vm1242_vm7 = vcmask 130048   ;;  %vm1259_vm8 = vcmask 162816   ;;  %vm1276_vm9 = vcmask 195584  }
  0x5e   : > { %v3045_v59 = vsel %vm2671_vm2, %v555_v47, %v559_v48  ;;  %v3072_v0 = vsel %vm2671_vm2, %v429_v63, %v433_v6  ;;  %v736_v47 = vor.u32 %v735_v11, %v732_v16  ;;  %v739_v48 = vshll.u32 %v311_v27, 16  ;;  %v315_v11 = vld [vmem:[%s4098_s0 + $0x19c] sm:$0x1]  ;;  %v2479_v27 = vld [vmem:[%s4098_s0 + $0x218] ss:$8 sps:$4 sm:$0xff]  }
  0x5f   : > { %905 = vrot.lane.b32.xlu1 %v2136_v2, %s2537_s7  ;;  %v2133_v2 = vcombine.low %v3006_v31, %v3015_v36  ;;  %v646_v6 = vshrl.u32 %v3098_v41, 16  ;;  %v750_v63 = vor.u32 %v749_v33, %v746_v29  ;;  %v755_v29 = vrot.slane %v753_v9, 5 }
  0x60   : > { %1167 = vrot.lane.b32.xlu0 %v2186_v46, %s2544_s13  ;;  %v445_v46 = vshll.u32 %v247_v60, 16  ;;  %v775_v60 = vshll.u32 %v316_v24, 16  ;;  %v741_v16 = vrot.slane %v739_v48, 5  ;;  %v641_v33 = vshll.u32 %v297_v54, 16 }
  0x61   : > { %v751_v25 = vrot.slane %v750_v63, 4  ;;  %v2480_v63 = vld [vmem:[%s4098_s0 + $0x1d0] ss:$8 sps:$4 sm:$0xff]   ;;  %vm1293_vm10 = vcmask 228352   ;;  %vm1310_vm11 = vcmask 261120   ;;  %vm1347_vm12 = vcmask 293888  }
  0x62   : > { %v447_v51 = vrot.slane %v445_v46, 5  ;;  %v760_v46 = vrot.slane %v758_v26, 4  ;;  %v638_v26 = vor.u32 %v637_v42, %v634_v50  ;;  %v643_v56 = vrot.slane %v641_v33, 5 }
  0x63   : > { %1177 = vrot.lane.b32.xlu1 %v2191_v32, %s2544_s13  ;;  %v618_v32 = vshrl.u32 %v3053_v10, 16 }
  0x64   : > { %897 = vrot.lane.b32.xlu0 %v2132_v14, %s2537_s7  ;;  %v2145_v14 = vcombine.low %v3041_v58, %v3045_v59  ;;  %v3081_v12 = vsel %vm2671_vm2, %v443_v3, %v447_v51  ;;  %v777_v3 = vrot.slane %v775_v60, 5  ;;  %v2153_v51 = vcombine.low %v314_v18, %v316_v24 }
  0x65   : > { %v2141_v20 = vcombine.low %v3072_v0, %v3081_v12  ;;  %v627_v18 = vshll.u32 %v295_v61, 16  ;;  %v2124_v24 = vcombine.low %v2862_v44, %v2904_v28  ;;  %v767_v60 = vshll.u32 %v315_v11, 16 }
  0x67   : > { %907 = vrot.lane.b32.xlu1 %v2137_v35, %s2537_s7  ;;  %v3088_v35 = vrot.slane %v618_v32, 4 }
  0x68   : > { %1169 = vrot.lane.b32.xlu0 %v2187_v34, %s2544_s13  ;;  %v2152_v34 = vcombine.low %v310_v53, %v312_v4  ;;  %v300_v53 = vld [vmem:[%s4098_s0 + $0x158] sm:$0xf] }
  0x69   : > { %v660_v4 = vshrl.u32 %v300_v53, 16  ;;  %v663_v10 = vshll.u32 %v300_v53, 16  ;;  %v624_v32 = vor.u32 %v623_v40, %v3088_v35  ;;  %v781_v40 = vshll.u32 %v317_v21, 16 }
  0x6b   : > { %945 = vrot.lane.b32.xlu1 %v2144_v55, %s2538_s23  ;;  %v774_v55 = vrot.slane %v772_v5, 4  ;;  %v1366_v5 = vsel %vm1364_vm3, %v2499_v15, 0  ;;  %v665_v48 = vrot.slane %v663_v10, 5  ;;  %v625_v42 = vrot.slane %v624_v32, 4 }
  0x6c   : > { %899 = vrot.lane.b32.xlu0 %v2133_v2, %s2537_s7  ;;  %v763_v2 = vrot.slane %v761_v23, 5  ;;  %v2129_v23 = vcombine.low %v2917_v8, %v2924_v1  ;;  %2392 = vmatpush3.bf16.msra.mxu0 %v1366_v5 }
  0x6d   : > { %2414 = vmatpush3.bf16.msra.mxu1 %v1366_v5 }
  0x6e   : > { %v764_v35 = vor.u32 %v763_v2, %v760_v46  ;;  %v2481_v46 = vld [vmem:[%s4098_s0 + $0x228] ss:$8 sps:$4 sm:$0xff]   ;;  %v756_v2 = vsel %vm2671_vm2, %v751_v25, %v755_v29 }
  0x6f   : > { %947 = vrot.lane.b32.xlu1 %v2145_v14, %s2538_s23  ;;  %v737_v14 = vrot.slane %v736_v47, 4  ;;  %v662_v47 = vrot.slane %v660_v4, 4  ;;  %v783_v4 = vrot.slane %v781_v40, 5 }
  0x70   : > { %937 = vrot.lane.b32.xlu0 %v2140_v13, %s2538_s23  ;;  %v2149_v13 = vcombine.low %v3098_v41, %v300_v53  ;;  %v648_v41 = vrot.slane %v646_v6, 4  ;;  %v299_v53 = vld [vmem:[%s4098_s0 + $0x154] sm:$0x1]  ;;  %v639_v6 = vrot.slane %v638_v26, 4  ;;  %v765_v61 = vrot.slane %v764_v35, 4 }
  0x71   : > { %v742_v50 = vsel %vm2671_vm2, %v737_v14, %v741_v16  ;;  %v655_v15 = vshll.u32 %v299_v53, 16  ;;  %v666_v10 = vor.u32 %v665_v48, %v662_v47  ;;  %v2172_v48 = vcombine.low %v2904_v28, %v2945_v45  ;;  %v248_v53 = vld [vmem:[%s4098_s0 + $0x40] sm:$0xf] }
  0x72   : > { %v652_v9 = vor.u32 %v651_v43, %v648_v41  ;;  %v2168_v16 = vcombine.low %v742_v50, %v756_v2  ;;  %v644_v32 = vsel %vm2671_vm2, %v639_v6, %v643_v56  ;;  %v267_v2 = vld [vmem:[%s4098_s0 + $0x8c] sm:$0x1]  ;;  %v2173_v56 = vcombine.low %v2966_v57, %v248_v53 }
  0x73   : > { %1001 = vrot.lane.b32.xlu1 %v2152_v34, %s2539_s21  ;;  %v2125_v34 = vcombine.low %v2945_v45, %v2966_v57  ;;  %v657_v25 = vrot.slane %v655_v15, 5  ;;  %v667_v26 = vrot.slane %v666_v10, 4 }
  0x74   : > { %939 = vrot.lane.b32.xlu0 %v2141_v20, %s2538_s23  ;;  %v778_v20 = vor.u32 %v777_v3, %v774_v55  ;;  %v629_v55 = vrot.slane %v627_v18, 5  ;;  %v769_v3 = vrot.slane %v767_v60, 5  ;;  %v653_v21 = vrot.slane %v652_v9, 4  ;;  %v249_v9 = vld [vmem:[%s4098_s0 + $0x44] sm:$0x1] }
  0x75   : > { %v2176_v60 = vcombine.low %v2886_v7, %v2917_v8 }
  0x76   : > { %v630_v54 = vsel %vm2671_vm2, %v625_v42, %v629_v55  ;;  %v770_v18 = vsel %vm2671_vm2, %v765_v61, %v769_v3  ;;  %v658_v5 = vsel %vm2671_vm2, %v653_v21, %v657_v25  ;;  %v2184_v55 = vcombine.low %v2912_v30, %v2991_v17 }
  0x77   : > { %1003 = vrot.lane.b32.xlu1 %v2153_v51, %s2539_s21  ;;  %v779_v51 = vrot.slane %v778_v20, 4  ;;  %v2164_v33 = vcombine.low %v630_v54, %v644_v32  ;;  %v266_v20 = vld [vmem:[%s4098_s0 + $0x88] sm:$0xf]  ;;  %v809_v3 = vshll.u32 %v267_v2, 16  ;;  %v2180_v17 = vcombine.low %v2954_v52, %v3006_v31 }
  0x78   : > { %993 = vrot.lane.b32.xlu0 %v2148_v38, %s2539_s21  ;;  %v301_v38 = vld [vmem:[%s4098_s0 + $0x15c] sm:$0x1]  ;;  %v800_v41 = vshrl.u32 %v266_v20, 16  ;;  %v803_v43 = vshll.u32 %v266_v20, 16  ;;  %v2177_v47 = vcombine.low %v2924_v1, %v266_v20  ;;  %v795_v32 = vshll.u32 %v249_v9, 16 }
  0x79   : > { %v669_v14 = vshll.u32 %v301_v38, 16  ;;  %v784_v11 = vsel %vm2671_vm2, %v779_v51, %v783_v4  ;;  %v786_v38 = vshrl.u32 %v248_v53, 16 }
  0x7a   : > { %v2169_v29 = vcombine.low %v770_v18, %v784_v11  ;;  %v802_v50 = vrot.slane %v800_v41, 4  ;;  %v805_v42 = vrot.slane %v803_v43, 5  ;;  %v797_v11 = vrot.slane %v795_v32, 5 }
  0x7b   : > { %1057 = vrot.lane.b32.xlu1 %v2479_v27, %s2540_s12  ;;  %v671_v27 = vrot.slane %v669_v14, 5  ;;  %v788_v51 = vrot.slane %v786_v38, 4  ;;  %v811_v14 = vrot.slane %v809_v3, 5 }
  0x7c   : > { %995 = vrot.lane.b32.xlu0 %v2149_v13, %s2539_s21  ;;  %v2482_v13 = vld [vmem:[%s4098_s0 + $0x1e0] ss:$8 sps:$4 sm:$0xff]   ;;  %v806_v61 = vor.u32 %v805_v42, %v802_v50 }
  0x7d   : > { %v672_v35 = vsel %vm2671_vm2, %v667_v26, %v671_v27  ;;  %v2502_v42 = vld [vmem:[%s4098_s0 + $0x48] sm:$0xf] }
  0x7e   : > { %v2165_v40 = vcombine.low %v658_v5, %v672_v35  ;;  %v807_v10 = vrot.slane %v806_v61, 4 }
  0x7f   : > { %1059 = vrot.lane.b32.xlu1 %v2481_v46, %s2540_s12  ;;  %v789_v46 = vshll.u32 %v248_v53, 16  ;;  %v2503_v53 = vld [vmem:[%s4098_s0 + $0x50] sm:$0xf] }
  0x80   : > { %1049 = vrot.lane.b32.xlu0 %v2480_v63, %s2540_s12  ;;  %v285_v63 = vld [vmem:[%s4098_s0 + $0x118] sm:$0xf]  ;;  %v812_v31 = vsel %vm2671_vm2, %v807_v10, %v811_v14  ;;  %v2126_v38 = vcombine.low %v2502_v42, %v2503_v53  ;;  %v2507_v10 = vld [vmem:[%s4098_s0 + $0x60] sm:$0xf] }
  0x81   : > { %v791_v4 = vrot.slane %v789_v46, 5  ;;  %v2185_v30 = vcombine.low %v2997_v19, %v285_v63  ;;  %v2192_v19 = vcombine.low %v3023_v37, %v3041_v58  ;;  %v2193_v26 = vcombine.low %v3045_v59, %v812_v31  ;;  %v2505_v63 = vld [vmem:[%s4098_s0 + $0x8] sm:$0xf] }
  0x82   : > { %v2188_v37 = vcombine.low %v3036_v22, %v3072_v0 }
  0x83   : > { %1097 = vrot.lane.b32.xlu1 %v2168_v16, %s2541_s29  ;;  %v276_v16 = vld [vmem:[%s4098_s0 + $0xd0] sm:$0xf]  ;;  %v792_v54 = vor.u32 %v791_v4, %v788_v51 }
  0x84   : > { %1051 = vrot.lane.b32.xlu0 %v2482_v13, %s2540_s12  ;;  %v2181_v52 = vcombine.low %v3015_v36, %v276_v16 }
  0x85   : > { %v793_v18 = vrot.slane %v792_v54, 4 }
  0x87   : > { %1099 = vrot.lane.b32.xlu1 %v2169_v29, %s2541_s29  ;;  %v798_v58 = vsel %vm2671_vm2, %v793_v18, %v797_v11 }
  0x88   : > { %1089 = vrot.lane.b32.xlu0 %v2164_v33, %s2541_s29  ;;  %v2189_v27 = vcombine.low %v3081_v12, %v798_v58 }
  0x8a   : > { %v3198_v6 = vpop.permute.xlu1 %895 }
  0x8b   : > { %1125 = vrot.lane.b32.xlu1 %v2176_v60, %s2542_s6  ;;  %v3213_v15 = vpop.permute.xlu0 %893 }
  0x8c   : > { %1091 = vrot.lane.b32.xlu0 %v2165_v40, %s2541_s29 }
  0x8e   : > { %v3218_v13 = vpop.permute.xlu1 %903 }
  0x8f   : > { %1127 = vrot.lane.b32.xlu1 %v2177_v47, %s2542_s6  ;;  %v902_v21 = vpop.permute.xlu0 %901 }
  0x90   : > { %1117 = vrot.lane.b32.xlu0 %v2172_v48, %s2542_s6 }
  0x93   : > { %1153 = vrot.lane.b32.xlu1 %v2184_v55, %s2543_s30  ;;  %v1198_v55 = vsel %vm1183_vm5, %v2126_v38, %v902_v21 }
  0x94   : > { %1119 = vrot.lane.b32.xlu0 %v2173_v56, %s2542_s6  ;;  %v2504_v56 = vld [vmem:[%s4098_s0] sm:$0xf] }
  0x95   : > { %v2122_v61 = vcombine.low %v2504_v56, %v2505_v63 }
  0x97   : > { %1155 = vrot.lane.b32.xlu1 %v2185_v30, %s2543_s30  ;;  %v1186_v54 = vsel %vm1183_vm5, %v2122_v61, %v3213_v15  ;;  %v2508_v15 = vld [vmem:[%s4098_s0 + $0x10] sm:$0xf] }
  0x98   : > { %1145 = vrot.lane.b32.xlu0 %v2180_v17, %s2543_s30  ;;  %v942_v25 = vpop.permute.xlu1 %941  ;;  %v2506_v17 = vld [vmem:[%s4098_s0 + $0x58] sm:$0xf] }
  0x99   : > { %v1218_v3 = vsel %vm1208_vm4, %v1198_v55, %v942_v25  ;;  %v2127_v14 = vcombine.low %v2506_v17, %v2507_v10 }
  0x9b   : > { %1179 = vrot.lane.b32.xlu1 %v2192_v19, %s2544_s13  ;;  %v934_v36 = vpop.permute.xlu0 %933  ;;  %v1201_v25 = vsel %vm1183_vm5, %v2127_v14, %v3218_v13 }
  0x9c   : > { %1147 = vrot.lane.b32.xlu0 %v2181_v52, %s2543_s30  ;;  %v1210_v19 = vsel %vm1208_vm4, %v1186_v54, %v934_v36 }
  0x9f   : > { %1181 = vrot.lane.b32.xlu1 %v2193_v26, %s2544_s13 }
  0xa0   : > { %1171 = vrot.lane.b32.xlu0 %v2188_v37, %s2544_s13  ;;  %v2509_v37 = vld [vmem:[%s4098_s0 + $0x18] sm:$0xf] }
  0xa1   : > { %v944_v29 = vpop.permute.xlu1 %943  ;;  %v2123_v58 = vcombine.low %v2508_v15, %v2509_v37 }
  0xa2   : > { %v1220_v36 = vsel %vm1208_vm4, %v1201_v25, %v944_v29 }
  0xa3   : > { %v1189_v53 = vsel %vm1183_vm5, %v2123_v58, %v3198_v6 }
  0xa4   : > { %1173 = vrot.lane.b32.xlu0 %v2189_v27, %s2544_s13 }
  0xa5   : > { %v998_v33 = vpop.permute.xlu1 %997 }
  0xa6   : > { %v3238_v59 = vpop.permute.xlu0 %935  ;;  %v1235_v51 = vsel %vm1225_vm6, %v1218_v3, %v998_v33 }
  0xa9   : > { %v1000_v5 = vpop.permute.xlu1 %999 }
  0xaa   : > { %v990_v35 = vpop.permute.xlu0 %989  ;;  %v1237_v33 = vsel %vm1225_vm6, %v1220_v36, %v1000_v5  ;;  %v1212_v5 = vsel %vm1208_vm4, %v1189_v53, %v3238_v59 }
  0xab   : > { %v1227_v18 = vsel %vm1225_vm6, %v1210_v19, %v990_v35 }
  0xad   : > { %v1054_v60 = vpop.permute.xlu1 %1053 }
  0xae   : > { %v3240_v22 = vpop.permute.xlu0 %991  ;;  %v1252_v9 = vsel %vm1242_vm7, %v1235_v51, %v1054_v60 }
  0xb1   : > { %v1056_v39 = vpop.permute.xlu1 %1055 }
  0xb2   : > { %v1046_v0 = vpop.permute.xlu0 %1045  ;;  %v1254_v60 = vsel %vm1242_vm7, %v1237_v33, %v1056_v39 }
  0xb3   : > { %v1244_v26 = vsel %vm1242_vm7, %v1227_v18, %v1046_v0 }
  0xb5   : > { %v1094_v20 = vpop.permute.xlu1 %1093 }
  0xb6   : > { %v3242_v40 = vpop.permute.xlu0 %1047  ;;  %v1269_v16 = vsel %vm1259_vm8, %v1252_v9, %v1094_v20 }
  0xb9   : > { %v1096_v41 = vpop.permute.xlu1 %1095 }
  0xba   : > { %v1086_v43 = vpop.permute.xlu0 %1085 }
  0xbb   : > { %v1261_v27 = vsel %vm1259_vm8, %v1244_v26, %v1086_v43 }
  0xbd   : > { %v1122_v47 = vpop.permute.xlu1 %1121 }
  0xbe   : > { %v3244_v12 = vpop.permute.xlu0 %1087  ;;  %v1286_v32 = vsel %vm1276_vm9, %v1269_v16, %v1122_v47  ;;  %v1271_v47 = vsel %vm1259_vm8, %v1254_v60, %v1096_v41 }
  0xc1   : > { %v1124_v48 = vpop.permute.xlu1 %1123 }
  0xc2   : > { %v1114_v50 = vpop.permute.xlu0 %1113  ;;  %v1288_v29 = vsel %vm1276_vm9, %v1271_v47, %v1124_v48 }
  0xc3   : > { %v1278_v13 = vsel %vm1276_vm9, %v1261_v27, %v1114_v50  ;;  %v1229_v50 = vsel %vm1225_vm6, %v1212_v5, %v3240_v22 }
  0xc5   : > { %v1150_v46 = vpop.permute.xlu1 %1149 }
  0xc6   : > { %v1116_v2 = vpop.permute.xlu0 %1115  ;;  %v1303_v52 = vsel %vm1293_vm10, %v1286_v32, %v1150_v46  ;;  %v1246_v46 = vsel %vm1242_vm7, %v1229_v50, %v3242_v40 }
  0xc7   : > { %v1263_v6 = vsel %vm1259_vm8, %v1246_v46, %v3244_v12 }
  0xc8   : > { %v1280_v48 = vsel %vm1276_vm9, %v1263_v6, %v1116_v2 }
  0xc9   : > { %v1152_v4 = vpop.permute.xlu1 %1151 }
  0xca   : > { %v1142_v30 = vpop.permute.xlu0 %1141  ;;  %v1305_v43 = vsel %vm1293_vm10, %v1288_v29, %v1152_v4 }
  0xcb   : > { %v1295_v0 = vsel %vm1293_vm10, %v1278_v13, %v1142_v30 }
  0xcd   : > { %v1176_v31 = vpop.permute.xlu1 %1175 }
  0xce   : > { %v1144_v11 = vpop.permute.xlu0 %1143  ;;  %v1320_v21 = vsel %vm1310_vm11, %v1303_v52, %v1176_v31 }
  0xcf   : > { %2401 = vmatprep.mubr.msk.bf16.mxu1 %vm1347_vm12, %v1320_v21  ;;  %v1297_v55 = vsel %vm1293_vm10, %v1280_v48, %v1144_v11 }
  0xd1   : > { %v906_v35 = vpop.permute.xlu1 %905 }
  0xd2   : > { %v1168_v20 = vpop.permute.xlu0 %1167  ;;  %v1204_v25 = vsel %vm1183_vm5, %v2128_v49, %v906_v35 }
  0xd3   : > { %v1312_v42 = vsel %vm1310_vm11, %v1295_v0, %v1168_v20 }
  0xd4   : > { %2393 = vmatprep.mubr.msk.bf16.mxu0 %vm1347_vm12, %v1312_v42 }
  0xd5   : > { %v1178_v39 = vpop.permute.xlu1 %1177 }
  0xd6   : > { %v898_v38 = vpop.permute.xlu0 %897  ;;  %v1322_v41 = vsel %vm1310_vm11, %v1305_v43, %v1178_v39 }
  0xd7   : > { %2402 = vmatmul.mubr.msk.bf16.vlgmr.msra.gmra.mrb[0].mxu1 %vm1347_vm12, %v1322_v41  ;;  %v1192_v62 = vsel %vm1183_vm5, %v2124_v24, %v898_v38 }
  0xd9   : > { %v908_v59 = vpop.permute.xlu1 %907 }
  0xda   : > { %v1170_v56 = vpop.permute.xlu0 %1169  ;;  %v1207_v27 = vsel %vm1183_vm5, %v2129_v23, %v908_v59 }
  0xdb   : > { %v1314_v63 = vsel %vm1310_vm11, %v1297_v55, %v1170_v56 }
  0xdc   : > { %2394 = vmatmul.mubr.msk.bf16.vlgmr.msra.gmra.mrb[0].mxu0 %vm1347_vm12, %v1314_v63 }
  0xdd   : > { %v946_v22 = vpop.permute.xlu1 %945 }
  0xde   : > { %v900_v61 = vpop.permute.xlu0 %899  ;;  %v1222_v26 = vsel %vm1208_vm4, %v1204_v25, %v946_v22 }
  0xdf   : > { %v1195_v20 = vsel %vm1183_vm5, %v2125_v34, %v900_v61 }
  0xe1   : > { %v948_v3 = vpop.permute.xlu1 %947 }
  0xe2   : > { %v938_v51 = vpop.permute.xlu0 %937  ;;  %v1224_v7 = vsel %vm1208_vm4, %v1207_v27, %v948_v3 }
  0xe3   : > { %v1214_v13 = vsel %vm1208_vm4, %v1192_v62, %v938_v51 }
  0xe5   : > { %v1002_v40 = vpop.permute.xlu1 %1001 }
  0xe6   : > { %v940_v4 = vpop.permute.xlu0 %939  ;;  %v1239_v15 = vsel %vm1225_vm6, %v1222_v26, %v1002_v40 }
  0xe7   : > { %v1216_v53 = vsel %vm1208_vm4, %v1195_v20, %v940_v4 }
  0xe9   : > { %v1004_v9 = vpop.permute.xlu1 %1003 }
  0xea   : > { %v994_v30 = vpop.permute.xlu0 %993  ;;  %v1241_v35 = vsel %vm1225_vm6, %v1224_v7, %v1004_v9 }
  0xeb   : > { %v1231_v1 = vsel %vm1225_vm6, %v1214_v13, %v994_v30 }
  0xed   : > { %v1058_v17 = vpop.permute.xlu1 %1057 }
  0xee   : > { %v996_v12 = vpop.permute.xlu0 %995  ;;  %v1256_v58 = vsel %vm1242_vm7, %v1239_v15, %v1058_v17 }
  0xef   : > { %v1233_v39 = vsel %vm1225_vm6, %v1216_v53, %v996_v12 }
  0xf1   : > { %v1060_v10 = vpop.permute.xlu1 %1059 }
  0xf2   : > { %v1050_v2 = vpop.permute.xlu0 %1049  ;;  %v1258_v23 = vsel %vm1242_vm7, %v1241_v35, %v1060_v10 }
  0xf3   : > { %v1248_v28 = vsel %vm1242_vm7, %v1231_v1, %v1050_v2 }
  0xf5   : > { %v1098_v14 = vpop.permute.xlu1 %1097 }
  0xf6   : > { %v1052_v16 = vpop.permute.xlu0 %1051  ;;  %v1273_v33 = vsel %vm1259_vm8, %v1256_v58, %v1098_v14 }
  0xf7   : > { %v1250_v57 = vsel %vm1242_vm7, %v1233_v39, %v1052_v16 }
  0xf9   : > { %v1100_v54 = vpop.permute.xlu1 %1099 }
  0xfa   : > { %v1090_v32 = vpop.permute.xlu0 %1089  ;;  %v1275_v24 = vsel %vm1259_vm8, %v1258_v23, %v1100_v54 }
  0xfb   : > { %v1265_v47 = vsel %vm1259_vm8, %v1248_v28, %v1090_v32 }
  0xfd   : > { %v1126_v19 = vpop.permute.xlu1 %1125 }
  0xfe   : > { %v1092_v52 = vpop.permute.xlu0 %1091  ;;  %v1290_v49 = vsel %vm1276_vm9, %v1273_v33, %v1126_v19 }
  0xff   : > { %v1267_v41 = vsel %vm1259_vm8, %v1250_v57, %v1092_v52 }
 0x101   : > { %v1128_v31 = vpop.permute.xlu1 %1127 }
 0x102   : > { %v1118_v18 = vpop.permute.xlu0 %1117  ;;  %v1292_v42 = vsel %vm1276_vm9, %v1275_v24, %v1128_v31 }
 0x103   : > { %v1282_v29 = vsel %vm1276_vm9, %v1265_v47, %v1118_v18 }
 0x105   : > { %v1154_v11 = vpop.permute.xlu1 %1153 }
 0x106   : > { %v1120_v21 = vpop.permute.xlu0 %1119  ;;  %v1307_v60 = vsel %vm1293_vm10, %v1290_v49, %v1154_v11 }
 0x107   : > { %v1284_v46 = vsel %vm1276_vm9, %v1267_v41, %v1120_v21 }
 0x109   : > { %v1156_v37 = vpop.permute.xlu1 %1155 }
 0x10a   : > { %v1146_v36 = vpop.permute.xlu0 %1145  ;;  %v1309_v5 = vsel %vm1293_vm10, %v1292_v42, %v1156_v37 }
 0x10b   : > { %v1299_v50 = vsel %vm1293_vm10, %v1282_v29, %v1146_v36 }
 0x10d   : > { %v1180_v8 = vpop.permute.xlu1 %1179 }
 0x10e   : > { %v1148_v0 = vpop.permute.xlu0 %1147  ;;  %v1324_v44 = vsel %vm1310_vm11, %v1307_v60, %v1180_v8 }
 0x10f   : > { %2405 = vmatprep.mubr.msk.bf16.mxu1 %vm1347_vm12, %v1324_v44  ;;  %v1301_v6 = vsel %vm1293_vm10, %v1284_v46, %v1148_v0 }
 0x111   : > { %v1182_v43 = vpop.permute.xlu1 %1181 }
 0x112   : > { %v1172_v38 = vpop.permute.xlu0 %1171  ;;  %v1326_v45 = vsel %vm1310_vm11, %v1309_v5, %v1182_v43 }
 0x113   : > { %v1316_v34 = vsel %vm1310_vm11, %v1299_v50, %v1172_v38  ;;  %2406 = vmatmul.mubr.msk.bf16.gmra.mrb[4].mxu1 %vm1347_vm12, %v1326_v45 }
 0x114   : > { %2397 = vmatprep.mubr.msk.bf16.mxu0 %vm1347_vm12, %v1316_v34 }
 0x116   : > { %v1174_v48 = vpop.permute.xlu0 %1173 }
 0x117   : > { %v1318_v59 = vsel %vm1310_vm11, %v1301_v6, %v1174_v48 }
 0x118   : > { %2398 = vmatmul.mubr.msk.bf16.gmra.mrb[4].mxu0 %vm1347_vm12, %v1318_v59 }
 0x1aa   : > { %v3361_v55 = vpop.f32.mrb[0].mxu1 }
 0x1ab   : > { %v3363_v56 = vpop.f32.mrb[1].mxu1  ;;  %v1503_v44 = vmul.f32 (!%p2205_p5), %v3361_v55, %v3361_v55 }
 0x1ac   : > { %v3365_v63 = vpop.f32.mrb[2].mxu1  ;;  %v1501_v35 = vmul.f32 (!%p2205_p5), %v3363_v56, %v3363_v56 }
 0x1ad   : > { %v3367_v22 = vpop.f32.mrb[3].mxu1  ;;  %v1504_v20 = vmul.f32 (!%p2205_p5), %v3365_v63, %v3365_v63 }
 0x1ae   : > { %v1502_v1 = vmul.f32 (!%p2205_p5), %v3367_v22, %v3367_v22 }
 0x1af   : > { %v3369_v61 = vpop.f32.mrb[0].mxu0 }
 0x1b0   : > { %v3371_v3 = vpop.f32.mrb[1].mxu0  ;;  %v1495_v52 = vmul.f32 (!%p2205_p5), %v3369_v61, %v3369_v61 }
 0x1b1   : > { %v3373_v51 = vpop.f32.mrb[2].mxu0  ;;  %v1493_v54 = vmul.f32 (!%p2205_p5), %v3371_v3, %v3371_v3 }
 0x1b2   : > { %v3375_v40 = vpop.f32.mrb[3].mxu0  ;;  %v1496_v18 = vmul.f32 (!%p2205_p5), %v3373_v51, %v3373_v51 }
 0x1b3   : > { %v1469_v16 = vadd.f32 (!%p2205_p5), %v3375_v40, %v3371_v3  ;;  %v1494_v32 = vmul.f32 (!%p2205_p5), %v3375_v40, %v3375_v40 }
 0x1b5   : > { %v1470_v19 = vadd.f32 (!%p2205_p5), %v3369_v61, %v1469_v16  ;;  %v1509_v11 = vadd.f32 (!%p2205_p5), %v1494_v32, %v1493_v54 }
 0x1b7   : > { %v1471_v31 = vadd.f32 (!%p2205_p5), %v3373_v51, %v1470_v19  ;;  %v1510_v26 = vadd.f32 (!%p2205_p5), %v1509_v11, %v1495_v52 }
 0x1b9   : > { %v1511_v58 = vadd.f32 (!%p2205_p5), %v1510_v26, %v1496_v18  ;;  %v1468_v18 = vld [vmem:[#allocation2] sm:$0x1] (!%p2205_p5) }
 0x1e6   : > { %v3377_v4 = vpop.f32.mrb[4].mxu1 }
 0x1e7   : > { %v3379_v9 = vpop.f32.mrb[5].mxu1  ;;  %v1507_v38 = vmul.f32 (!%p2205_p5), %v3377_v4, %v3377_v4 }
 0x1e8   : > { %v3381_v30 = vpop.f32.mrb[6].mxu1  ;;  %1467 = sbr.rel (%p2205_p5) target bundleno = 534 (0x216), region = 44  ;;  %v1505_v53 = vmul.f32 (!%p2205_p5), %v3379_v9, %v3379_v9 }
 0x1e9   : > { %v3383_v17 = vpop.f32.mrb[7].mxu1  ;;  %v1508_v34 = vmul.f32 (!%p2205_p5), %v3381_v30, %v3381_v30 }
 0x1ea   : > { %v1506_v43 = vmul.f32 (!%p2205_p5), %v3383_v17, %v3383_v17 }
 0x1eb   : > { %v3385_v12 = vpop.f32.mrb[4].mxu0 }
 0x1ec   : > { %v3387_v10 = vpop.f32.mrb[5].mxu0  ;;  %v1499_v27 = vmul.f32 (!%p2205_p5), %v3385_v12, %v3385_v12 }
 0x1ed   : > { %v3389_v2 = vpop.f32.mrb[6].mxu0  ;;  %v1472_v21 = vadd.f32 (!%p2205_p5), %v1471_v31, %v3387_v10  ;;  %v1497_v25 = vmul.f32 (!%p2205_p5), %v3387_v10, %v3387_v10 }
 0x1ee   : > { %v3391_v14 = vpop.f32.mrb[7].mxu0  ;;  %v1500_v7 = vmul.f32 (!%p2205_p5), %v3389_v2, %v3389_v2 }
 0x1ef   : > { %v1473_v15 = vadd.f32 %v1472_v21, %v3391_v14  ;;  %v1498_v37 = vmul.f32 %v3391_v14, %v3391_v14  ;;  %v1512_v33 = vadd.f32 %v1511_v58, %v1497_v25 }
 0x1f1   : > { %v1474_v36 = vadd.f32 %v3385_v12, %v1473_v15  ;;  %v1513_v49 = vadd.f32 %v1512_v33, %v1498_v37  ;;  %v1492_v15 = vld [vmem:[#allocation3] sm:$0x1] }
 0x1f3   : > { %v1475_v62 = vadd.f32 %v3389_v2, %v1474_v36  ;;  %v1514_v60 = vadd.f32 %v1513_v49, %v1499_v27 }
 0x1f5   : > { %v1476_v13 = vadd.f32 %v1475_v62, %v3363_v56  ;;  %v1515_v23 = vadd.f32 %v1514_v60, %v1500_v7 }
 0x1f7   : > { %v1477_v8 = vadd.f32 %v1476_v13, %v3367_v22  ;;  %v1516_v28 = vadd.f32 %v1515_v23, %v1501_v35 }
 0x1f9   : > { %v1478_v0 = vadd.f32 %v3361_v55, %v1477_v8  ;;  %v1517_v47 = vadd.f32 %v1516_v28, %v1502_v1 }
 0x1fb   : > { %v1479_v24 = vadd.f32 %v3365_v63, %v1478_v0  ;;  %v1518_v29 = vadd.f32 %v1517_v47, %v1503_v44 }
 0x1fd   : > { %v1480_v42 = vadd.f32 %v1479_v24, %v3379_v9  ;;  %v1519_v39 = vadd.f32 %v1518_v29, %v1504_v20 }
 0x1ff   : > { %v1481_v5 = vadd.f32 %v1480_v42, %v3383_v17  ;;  %v1520_v45 = vadd.f32 %v1519_v39, %v1505_v53 }
 0x201   : > { %v1482_v50 = vadd.f32 %v3377_v4, %v1481_v5  ;;  %v1521_v41 = vadd.f32 %v1520_v45, %v1506_v43 }
 0x203   : > { %v1483_v57 = vadd.f32 %v3381_v30, %v1482_v50  ;;  %v1522_v6 = vadd.f32 %v1521_v41, %v1507_v38 }
 0x205   : > { %v1484_v46 = vrot.slane %v1483_v57, 4  ;;  %v1523_v59 = vadd.f32 %v1522_v6, %v1508_v34 }
 0x207   : > { %v1485_v48 = vadd.f32 %v1484_v46, %v1483_v57  ;;  %v1524_v54 = vrot.slane %v1523_v59, 4 }
 0x209   : > { %v1486_v16 = vrot.slane %v1485_v48, 2  ;;  %v1525_v19 = vadd.f32 %v1524_v54, %v1523_v59 }
 0x20b   : > { %v1487_v32 = vadd.f32 %v1486_v16, %v1485_v48  ;;  %v1526_v31 = vrot.slane %v1525_v19, 2 }
 0x20d   : > { %v1488_v52 = vrot.slane %v1487_v32, 1  ;;  %v1527_v21 = vadd.f32 %v1526_v31, %v1525_v19 }
 0x20f   : > { %v1489_v11 = vadd.f32 %v1488_v52, %v1487_v32  ;;  %v1528_v26 = vrot.slane %v1527_v21, 1 }
 0x211   : > { %v1490_v25 = vadd.f32 %v1489_v11, %v1468_v18  ;;  %v1529_v37 = vadd.f32 %v1528_v26, %v1527_v21 }
 0x213   : > { %1491 = vst [vmem:[#allocation2] sm:$0x1] %v1490_v25  ;;  %v1530_v58 = vadd.f32 %v1529_v37, %v1492_v15 }
 0x215   : > { %1531 = vst [vmem:[#allocation3] sm:$0x1] %v1530_v58 }
 0x216 PF: > { %p2206_p6 = scmp.ne.s32.totalorder %s2526_s15, 1 }
 0x217   : > { %v2545_v49 = vmov (!%p2206_p6), 0   ;;  %v1551_v8 = vlaneseq (!%p2206_p6)  ;;  %v1543_v23 = vld [vmem:[%s4100_s2] sm:$0x1] (!%p2206_p6)  ;;  %vm1835_vm13 = vcmask (!%p2206_p6), 1043456   ;;  %vm1836_vm14 = vsmask.f32 (!%p2206_p6), 7938 }
 0x218   : > { %1535 = sbr.rel (%p2206_p6) target bundleno = 635 (0x27b), region = 48  ;;  %1937 = vst [vmem:[%s4102_s4] sm:$0xf] (!%p2206_p6), %v2545_v49  ;;  %1938 = vst [vmem:[%s4102_s4 + $0x4] sm:$0x1] (!%p2206_p6), %v2545_v49  ;;  %v1547_v24 = vld [vmem:[%s4101_s3] sm:$0x1] (!%p2206_p6) }
 0x219   : > { %1939 = vst [vmem:[%s4102_s4 + $0x50] sm:$0xf] (!%p2206_p6), %v2545_v49  ;;  %1940 = vst [vmem:[%s4102_s4 + $0x54] sm:$0x1] (!%p2206_p6), %v2545_v49  ;;  %v1552_v1 = vshrl.u32 (!%p2206_p6), %v1551_v8, 7  ;;  %vm1841_vm15 = vcmask (!%p2206_p6), 1040384  }
 0x21a   : > { %v1536_v36 = vld [vmem:[#allocation2] sm:$0x1] (!%p2206_p6)  ;;  %2287 = vst [vmem:[%s4102_s4 + $0x48] sm:$0xf] (!%p2206_p6), %v2545_v49  ;;  %2288 = vst [vmem:[%s4102_s4 + $0x4c] sm:$0x1] (!%p2206_p6), %v2545_v49 }
 0x21b   : > { %v1537_v33 = vmul.f32 (!%p2206_p6), 0.0078125, %v1536_v36  ;;  %2289 = vst [vmem:[%s4102_s4 + $0x98] sm:$0xf] (!%p2206_p6), %v2545_v49  ;;  %2290 = vst [vmem:[%s4102_s4 + $0x9c] sm:$0x1] (!%p2206_p6), %v2545_v49  ;;  %v1553_v0 = vsub.s32 (!%p2206_p6), 0, %v1552_v1 }
 0x21c   : > { %v1538_v27 = vld [vmem:[#allocation3] sm:$0x1] (!%p2206_p6)  ;;  %vm1842_vm0 = vsmask.f32 (!%p2206_p6), 256  ;;  %v2223_v36 = vld [vmem:[%s4102_s4 + $0x8] sm:$0xf] (!%p2206_p6)  ;;  %vm3547_vm1 = vmand (!%p2206_p6), %vm1835_vm13, %vm1836_vm14 }
 0x21d   : > { %v1539_v62 = vmul.f32 (!%p2206_p6), 0.0078125, %v1538_v27  ;;  %v1540_v7 = vmul.f32 (!%p2206_p6), %v1537_v33, %v1537_v33  ;;  %v2225_v27 = vld [vmem:[%s4102_s4 + $0xc] sm:$0x1] (!%p2206_p6)  ;;  %vm3558_vm2 = vmand (!%p2206_p6), %vm1841_vm15, %vm1842_vm0 }
 0x21e   : > { %vm3837_vm3 = vmand (!%p2206_p6), %vm1841_vm15, %vm1836_vm14 }
 0x21f   : > { %v1541_v13 = vsub.f32 %v1539_v62, %v1540_v7  ;;  %v2229_v62 = vld [vmem:[%s4102_s4 + $0x14] sm:$0x1] }
 0x221   : > { %v1542_v35 = vmax.f32 %v1541_v13, 0.0 }
 0x223   : > { %v1544_v60 = vadd.f32 1e-05, %v1542_v35 }
 0x225   : > { %2510 = vrsqrt.f32 %v1544_v60 }
 0x22f   : > { %v2511_v44 = vpop.eup %2510 }
 0x230   : > { %v1546_v28 = vmul.f32 %v2511_v44, %v1543_v23  ;;  %v2231_v23 = vld [vmem:[%s4102_s4 + $0x18] sm:$0xf] }
 0x232   : > { %v1548_v20 = vmul.f32 %v1546_v28, %v1537_v33  ;;  %v3473_v47 = vrot.slane %v1546_v28, %v1553_v0  ;;  %v2227_v33 = vld [vmem:[%s4102_s4 + $0x10] sm:$0xf] }
 0x234   : > { %v1549_v42 = vsub.f32 %v1547_v24, %v1548_v20  ;;  %v1556_v53 = vmul.f32 %v3473_v47, %v3371_v3  ;;  %v1557_v29 = vmul.f32 %v3473_v47, %v3375_v40  ;;  %v1558_v5 = vmul.f32 %v3369_v61, %v3473_v47  ;;  %v2233_v20 = vld [vmem:[%s4102_s4 + $0x1c] sm:$0x1] }
 0x235   : > { %v1559_v43 = vmul.f32 %v3373_v51, %v3473_v47  ;;  %v1560_v39 = vmul.f32 %v3473_v47, %v3387_v10  ;;  %v1561_v50 = vmul.f32 %v3473_v47, %v3391_v14  ;;  %v1562_v3 = vmul.f32 %v3385_v12, %v3473_v47 }
 0x236   : > { %v3489_v38 = vrot.slane %v1549_v42, %v1553_v0  ;;  %v1563_v61 = vmul.f32 %v3389_v2, %v3473_v47  ;;  %v3495_v40 = vmul.f32 %v3473_v47, %v3363_v56  ;;  %v3499_v51 = vmul.f32 %v3473_v47, %v3367_v22 }
 0x237   : > { %v3503_v10 = vmul.f32 %v3361_v55, %v3473_v47  ;;  %v3507_v12 = vmul.f32 %v3365_v63, %v3473_v47  ;;  %v3511_v14 = vmul.f32 %v3473_v47, %v3379_v9  ;;  %v3515_v56 = vmul.f32 %v3473_v47, %v3383_v17 }
 0x238   : > { %v1578_v2 = vadd.f32 %v3489_v38, %v1556_v53  ;;  %v1579_v22 = vadd.f32 %v3489_v38, %v1557_v29  ;;  %v1580_v45 = vadd.f32 %v3489_v38, %v1558_v5  ;;  %v1581_v55 = vadd.f32 %v3489_v38, %v1559_v43 }
 0x239   : > { %v1582_v57 = vadd.f32 %v3489_v38, %v1560_v39  ;;  %v1583_v63 = vadd.f32 %v3489_v38, %v1561_v50  ;;  %v1584_v34 = vadd.f32 %v3489_v38, %v1562_v3  ;;  %v1585_v9 = vadd.f32 %v3489_v38, %v1563_v61  ;;  %v2235_v3 = vld [vmem:[%s4102_s4 + $0x20] sm:$0xf]  ;;  %v2237_v61 = vld [vmem:[%s4102_s4 + $0x24] sm:$0x1] }
 0x23a   : > { %v1594_v41 = vmax.f32 %v1578_v2, 0.0  ;;  %v1595_v46 = vmax.f32 %v1579_v22, 0.0  ;;  %v1596_v17 = vmax.f32 %v1580_v45, 0.0  ;;  %v1597_v6 = vmax.f32 %v1581_v55, 0.0 }
 0x23b   : > { %v1598_v48 = vmax.f32 %v1582_v57, 0.0  ;;  %v1599_v59 = vmax.f32 %v1583_v63, 0.0  ;;  %v1600_v16 = vmax.f32 %v1584_v34, 0.0  ;;  %v1601_v54 = vmax.f32 %v1585_v9, 0.0 }
 0x23c   : > { %v2360_v32 = vpack.c.bf16 %v1594_v41, %v1594_v41  ;;  %v2361_v19 = vpack.c.bf16 %v1595_v46, %v1595_v46  ;;  %v2362_v52 = vpack.c.bf16 %v1596_v17, %v1596_v17  ;;  %v2363_v31 = vpack.c.bf16 %v1597_v6, %v1597_v6 }
 0x23d   : > { %v3525_v18 = vpack.c.bf16 %v1598_v48, %v1598_v48  ;;  %v3527_v11 = vpack.c.bf16 %v1599_v59, %v1599_v59  ;;  %v3529_v21 = vpack.c.bf16 %v1600_v16, %v1600_v16  ;;  %v3531_v25 = vpack.c.bf16 %v1601_v54, %v1601_v54  ;;  %v2239_v48 = vld [vmem:[%s4102_s4 + $0x28] sm:$0xf]  ;;  %v2241_v16 = vld [vmem:[%s4102_s4 + $0x2c] sm:$0x1] }
 0x23e   : > { %v1675_v26 = vshrl.u32 %v2360_v32, 16  ;;  %v1678_v15 = vshll.u32 %v2360_v32, 16  ;;  %v1683_v37 = vshrl.u32 %v2361_v19, 16  ;;  %v1686_v58 = vshll.u32 %v2361_v19, 16 }
 0x23f   : > { %v1691_v7 = vshrl.u32 %v2362_v52, 16  ;;  %v1694_v49 = vshll.u32 %v2362_v52, 16  ;;  %v1699_v13 = vshrl.u32 %v2363_v31, 16  ;;  %v1702_v35 = vshll.u32 %v2363_v31, 16  ;;  %v2243_v52 = vld [vmem:[%s4102_s4 + $0x30] sm:$0xf] }
 0x240   : > { %v1677_v60 = vrot.slane %v1675_v26, 7  ;;  %v1685_v1 = vrot.slane %v1683_v37, 7  ;;  %v1707_v0 = vshrl.u32 %v3525_v18, 16  ;;  %v1710_v44 = vshll.u32 %v3525_v18, 16  ;;  %v2245_v31 = vld [vmem:[%s4102_s4 + $0x34] sm:$0x1] }
 0x241   : > { %v1693_v24 = vrot.slane %v1691_v7, 7  ;;  %v1701_v42 = vrot.slane %v1699_v13, 7  ;;  %v1715_v53 = vshrl.u32 %v3527_v11, 16  ;;  %v1718_v29 = vshll.u32 %v3527_v11, 16 }
 0x242   : > { %v1680_v5 = vor.u32 %v1678_v15, %v1677_v60  ;;  %v1681_v43 = vrot.slane %v1677_v60, 4  ;;  %v1688_v39 = vor.u32 %v1686_v58, %v1685_v1  ;;  %v1689_v50 = vrot.slane %v1685_v1, 4  ;;  %v2251_v60 = vld [vmem:[%s4102_s4 + $0x40] sm:$0xf]  ;;  %v2253_v1 = vld [vmem:[%s4102_s4 + $0x44] sm:$0x1] }
 0x243   : > { %v1696_v2 = vor.u32 %v1694_v49, %v1693_v24  ;;  %v1697_v22 = vrot.slane %v1693_v24, 4  ;;  %v1704_v45 = vor.u32 %v1702_v35, %v1701_v42  ;;  %v1705_v55 = vrot.slane %v1701_v42, 4  ;;  %v2249_v35 = vld [vmem:[%s4102_s4 + $0x3c] sm:$0x1] }
 0x244   : > { %v1839_v57 = vsel %vm3547_vm1, %v1680_v5, %v2223_v36  ;;  %v1845_v63 = vsel %vm3558_vm2, %v1681_v43, %v2225_v27  ;;  %v1848_v34 = vsel %vm3547_vm1, %v1688_v39, %v2227_v33  ;;  %v1851_v9 = vsel %vm3558_vm2, %v1689_v50, %v2229_v62  ;;  %v2247_v33 = vld [vmem:[%s4102_s4 + $0x38] sm:$0xf] }
 0x245   : > { %2224 = vst [vmem:[%s4102_s4 + $0x8] sm:$0xf] %v1839_v57  ;;  %2226 = vst [vmem:[%s4102_s4 + $0xc] sm:$0x1] %v1845_v63  ;;  %v1854_v41 = vsel %vm3547_vm1, %v1696_v2, %v2231_v23  ;;  %v1857_v46 = vsel %vm3558_vm2, %v1697_v22, %v2233_v20  ;;  %v1860_v17 = vsel %vm3547_vm1, %v1704_v45, %v2235_v3  ;;  %v1709_v59 = vrot.slane %v1707_v0, 7 }
 0x246   : > { %2228 = vst [vmem:[%s4102_s4 + $0x10] sm:$0xf] %v1848_v34  ;;  %2230 = vst [vmem:[%s4102_s4 + $0x14] sm:$0x1] %v1851_v9  ;;  %v1863_v6 = vsel %vm3558_vm2, %v1705_v55, %v2237_v61  ;;  %v1717_v54 = vrot.slane %v1715_v53, 7  ;;  %v1723_v32 = vshrl.u32 %v3529_v21, 16  ;;  %v1586_v26 = vadd.f32 %v3489_v38, %v3495_v40 }
 0x247   : > { %2232 = vst [vmem:[%s4102_s4 + $0x18] sm:$0xf] %v1854_v41  ;;  %2234 = vst [vmem:[%s4102_s4 + $0x1c] sm:$0x1] %v1857_v46  ;;  %v1726_v19 = vshll.u32 %v3529_v21, 16  ;;  %v1731_v18 = vshrl.u32 %v3531_v25, 16  ;;  %v1587_v15 = vadd.f32 %v3489_v38, %v3499_v51  ;;  %v1712_v37 = vor.u32 %v1710_v44, %v1709_v59 }
 0x248   : > { %2236 = vst [vmem:[%s4102_s4 + $0x20] sm:$0xf] %v1860_v17  ;;  %2238 = vst [vmem:[%s4102_s4 + $0x24] sm:$0x1] %v1863_v6  ;;  %v1734_v11 = vshll.u32 %v3531_v25, 16  ;;  %v1713_v21 = vrot.slane %v1709_v59, 4  ;;  %v1720_v58 = vor.u32 %v1718_v29, %v1717_v54  ;;  %v1588_v53 = vadd.f32 %v3489_v38, %v3503_v10 }
 0x249   : > { %v1721_v36 = vrot.slane %v1717_v54, 4  ;;  %v1725_v27 = vrot.slane %v1723_v32, 7  ;;  %v1733_v62 = vrot.slane %v1731_v18, 7  ;;  %v1602_v7 = vmax.f32 %v1586_v26, 0.0  ;;  %v2255_v63 = vld [vmem:[%s4102_s4 + $0x58] sm:$0xf] }
 0x24a   : > { %v1603_v49 = vmax.f32 %v1587_v15, 0.0  ;;  %v1866_v25 = vsel %vm3547_vm1, %v1712_v37, %v2239_v48  ;;  %v1869_v40 = vsel %vm3558_vm2, %v1713_v21, %v2241_v16  ;;  %v1872_v51 = vsel %vm3547_vm1, %v1720_v58, %v2243_v52  ;;  %v2257_v34 = vld [vmem:[%s4102_s4 + $0x5c] sm:$0x1]  ;;  %v2263_v21 = vld [vmem:[%s4102_s4 + $0x68] sm:$0xf] }
 0x24b   : > { %v1875_v13 = vsel %vm3558_vm2, %v1721_v36, %v2245_v31  ;;  %2240 = vst [vmem:[%s4102_s4 + $0x28] sm:$0xf] %v1866_v25  ;;  %2242 = vst [vmem:[%s4102_s4 + $0x2c] sm:$0x1] %v1869_v40  ;;  %v1728_v23 = vor.u32 %v1726_v19, %v1725_v27  ;;  %v1729_v0 = vrot.slane %v1725_v27, 4  ;;  %v1736_v44 = vor.u32 %v1734_v11, %v1733_v62 }
 0x24c   : > { %2244 = vst [vmem:[%s4102_s4 + $0x30] sm:$0xf] %v1872_v51  ;;  %2246 = vst [vmem:[%s4102_s4 + $0x34] sm:$0x1] %v1875_v13  ;;  %v1737_v24 = vrot.slane %v1733_v62, 4  ;;  %v2368_v20 = vpack.c.bf16 %v1602_v7, %v1602_v7  ;;  %v2369_v42 = vpack.c.bf16 %v1603_v49, %v1603_v49  ;;  %v1589_v29 = vadd.f32 %v3489_v38, %v3507_v12 }
 0x24d   : > { %v1878_v5 = vsel %vm3547_vm1, %v1728_v23, %v2247_v33  ;;  %v1881_v43 = vsel %vm3558_vm2, %v1729_v0, %v2249_v35  ;;  %v1884_v39 = vsel %vm3547_vm1, %v1736_v44, %v2251_v60  ;;  %v1604_v2 = vmax.f32 %v1588_v53, 0.0  ;;  %v2293_v18 = vld [vmem:[%s4102_s4 + $0x10] sm:$0x1]  ;;  %v2265_v36 = vld [vmem:[%s4102_s4 + $0x6c] sm:$0x1] }
 0x24e   : > { %v1887_v50 = vsel %vm3558_vm2, %v1737_v24, %v2253_v1  ;;  %2248 = vst [vmem:[%s4102_s4 + $0x38] sm:$0xf] %v1878_v5  ;;  %2250 = vst [vmem:[%s4102_s4 + $0x3c] sm:$0x1] %v1881_v43  ;;  %v1739_v10 = vshrl.u32 %v2368_v20, 16  ;;  %v1742_v12 = vshll.u32 %v2368_v20, 16  ;;  %v1590_v45 = vadd.f32 %v3489_v38, %v3511_v14 }
 0x24f   : > { %2252 = vst [vmem:[%s4102_s4 + $0x40] sm:$0xf] %v1884_v39  ;;  %2254 = vst [vmem:[%s4102_s4 + $0x44] sm:$0x1] %v1887_v50  ;;  %v1747_v3 = vshrl.u32 %v2369_v42, 16  ;;  %v1750_v61 = vshll.u32 %v2369_v42, 16  ;;  %v1591_v55 = vadd.f32 %v3489_v38, %v3515_v56  ;;  %v1570_v41 = vmul.f32 %v3377_v4, %v3473_v47 }
 0x250   : > { %v1605_v22 = vmax.f32 %v1589_v29, 0.0  ;;  %v1741_v57 = vrot.slane %v1739_v10, 7  ;;  %v1571_v46 = vmul.f32 %v3381_v30, %v3473_v47  ;;  %v2259_v14 = vld [vmem:[%s4102_s4 + $0x60] sm:$0xf]  ;;  %v2261_v56 = vld [vmem:[%s4102_s4 + $0x64] sm:$0x1]  ;;  %v2370_v17 = vpack.c.bf16 %v1604_v2, %v1604_v2 }
 0x251   : > { %v1749_v9 = vrot.slane %v1747_v3, 7  ;;  %v1606_v48 = vmax.f32 %v1590_v45, 0.0  ;;  %v1607_v59 = vmax.f32 %v1591_v55, 0.0  ;;  %v2291_v4 = vld [vmem:[%s4102_s4 + $0x8] sm:$0x1]  ;;  %v1592_v25 = vadd.f32 %v3489_v38, %v1570_v41 }
 0x252   : > { %v2371_v6 = vpack.c.bf16 %v1605_v22, %v1605_v22  ;;  %v1744_v16 = vor.u32 %v1742_v12, %v1741_v57  ;;  %v1745_v54 = vrot.slane %v1741_v57, 4  ;;  %v1755_v30 = vshrl.u32 %v2370_v17, 16  ;;  %v2267_v33 = vld [vmem:[%s4102_s4 + $0x70] sm:$0xf]  ;;  %v2269_v49 = vld [vmem:[%s4102_s4 + $0x74] sm:$0x1] }
 0x253   : > { %v1752_v32 = vor.u32 %v1750_v61, %v1749_v9  ;;  %v1753_v19 = vrot.slane %v1749_v9, 4  ;;  %v1758_v47 = vshll.u32 %v2370_v17, 16  ;;  %v2372_v62 = vpack.c.bf16 %v1606_v48, %v1606_v48  ;;  %v2295_v35 = vld [vmem:[%s4102_s4 + $0x18] sm:$0x1]  ;;  %v2299_v44 = vld [vmem:[%s4102_s4 + $0x28] sm:$0x1] }
 0x254   : > { %v1763_v52 = vshrl.u32 %v2371_v6, 16  ;;  %v1766_v31 = vshll.u32 %v2371_v6, 16  ;;  %v1890_v11 = vsel %vm3547_vm1, %v1744_v16, %v2255_v63  ;;  %v1893_v26 = vsel %vm3558_vm2, %v1745_v54, %v2257_v34  ;;  %v2301_v29 = vld [vmem:[%s4102_s4 + $0x30] sm:$0x1]  ;;  %v2271_v10 = vld [vmem:[%s4102_s4 + $0x78] sm:$0xf] }
 0x255   : > { %v1896_v15 = vsel %vm3547_vm1, %v1752_v32, %v2259_v14  ;;  %v1899_v37 = vsel %vm3558_vm2, %v1753_v19, %v2261_v56  ;;  %2256 = vst [vmem:[%s4102_s4 + $0x58] sm:$0xf] %v1890_v11  ;;  %2258 = vst [vmem:[%s4102_s4 + $0x5c] sm:$0x1] %v1893_v26  ;;  %v1757_v58 = vrot.slane %v1755_v30, 7  ;;  %v2373_v7 = vpack.c.bf16 %v1607_v59, %v1607_v59 }
 0x256   : > { %2260 = vst [vmem:[%s4102_s4 + $0x60] sm:$0xf] %v1896_v15  ;;  %2262 = vst [vmem:[%s4102_s4 + $0x64] sm:$0x1] %v1899_v37  ;;  %v1765_v27 = vrot.slane %v1763_v52, 7  ;;  %v1593_v40 = vadd.f32 %v3489_v38, %v1571_v46  ;;  %v1947_v51 = vsel %vm3558_vm2, 0, %v2291_v4 }
 0x257   : > { %v1950_v13 = vsel %vm3558_vm2, 0, %v2293_v18  ;;  %v1760_v60 = vor.u32 %v1758_v47, %v1757_v58  ;;  %v1761_v1 = vrot.slane %v1757_v58, 4  ;;  %2292 = vst [vmem:[%s4102_s4 + $0x8] sm:$0x1] %v1947_v51  ;;  %v2297_v38 = vld [vmem:[%s4102_s4 + $0x20] sm:$0x1] }
 0x258   : > { %v1768_v23 = vor.u32 %v1766_v31, %v1765_v27  ;;  %v1769_v0 = vrot.slane %v1765_v27, 4  ;;  %2294 = vst [vmem:[%s4102_s4 + $0x10] sm:$0x1] %v1950_v13  ;;  %v1771_v24 = vshrl.u32 %v2372_v62, 16  ;;  %v1774_v20 = vshll.u32 %v2372_v62, 16 }
 0x259   : > { %v1779_v42 = vshrl.u32 %v2373_v7, 16  ;;  %v1782_v53 = vshll.u32 %v2373_v7, 16  ;;  %v1902_v5 = vsel %vm3547_vm1, %v1760_v60, %v2263_v21  ;;  %v1905_v43 = vsel %vm3558_vm2, %v1761_v1, %v2265_v36  ;;  %v2273_v12 = vld [vmem:[%s4102_s4 + $0x7c] sm:$0x1]  ;;  %v2275_v3 = vld [vmem:[%s4102_s4 + $0x80] sm:$0xf] }
 0x25a   : > { %v1908_v39 = vsel %vm3547_vm1, %v1768_v23, %v2267_v33  ;;  %v1911_v50 = vsel %vm3558_vm2, %v1769_v0, %v2269_v49  ;;  %v2303_v61 = vld [vmem:[%s4102_s4 + $0x38] sm:$0x1]  ;;  %2264 = vst [vmem:[%s4102_s4 + $0x68] sm:$0xf] %v1902_v5  ;;  %2266 = vst [vmem:[%s4102_s4 + $0x6c] sm:$0x1] %v1905_v43 }
 0x25b   : > { %2268 = vst [vmem:[%s4102_s4 + $0x70] sm:$0xf] %v1908_v39  ;;  %2270 = vst [vmem:[%s4102_s4 + $0x74] sm:$0x1] %v1911_v50  ;;  %v1773_v2 = vrot.slane %v1771_v24, 7  ;;  %v1781_v22 = vrot.slane %v1779_v42, 7 }
 0x25c   : > { %v1608_v45 = vmax.f32 %v1592_v25, 0.0  ;;  %v1609_v55 = vmax.f32 %v1593_v40, 0.0  ;;  %v2305_v57 = vld [vmem:[%s4102_s4 + $0x40] sm:$0x1]  ;;  %v2277_v63 = vld [vmem:[%s4102_s4 + $0x84] sm:$0x1] }
 0x25d   : > { %v1953_v34 = vsel %vm3558_vm2, 0, %v2295_v35  ;;  %v1956_v9 = vsel %vm3558_vm2, 0, %v2297_v38  ;;  %v1959_v41 = vsel %vm3558_vm2, 0, %v2299_v44  ;;  %v1962_v46 = vsel %vm3558_vm2, 0, %v2301_v29  ;;  %v2323_v48 = vld [vmem:[%s4102_s4 + $0xc] sm:$0x1] }
 0x25e   : > { %v1776_v14 = vor.u32 %v1774_v20, %v1773_v2  ;;  %v1777_v56 = vrot.slane %v1773_v2, 4  ;;  %v1784_v17 = vor.u32 %v1782_v53, %v1781_v22  ;;  %v1785_v6 = vrot.slane %v1781_v22, 4  ;;  %2296 = vst [vmem:[%s4102_s4 + $0x18] sm:$0x1] %v1953_v34  ;;  %2298 = vst [vmem:[%s4102_s4 + $0x20] sm:$0x1] %v1956_v9 }
 0x25f   : > { %2300 = vst [vmem:[%s4102_s4 + $0x28] sm:$0x1] %v1959_v41  ;;  %2302 = vst [vmem:[%s4102_s4 + $0x30] sm:$0x1] %v1962_v46  ;;  %v2325_v59 = vld [vmem:[%s4102_s4 + $0x14] sm:$0x1]  ;;  %v2374_v54 = vpack.c.bf16 %v1608_v45, %v1608_v45  ;;  %v2375_v32 = vpack.c.bf16 %v1609_v55, %v1609_v55 }
 0x260   : > { %v1965_v19 = vsel %vm3558_vm2, 0, %v2303_v61  ;;  %v1968_v4 = vsel %vm3558_vm2, 0, %v2305_v57  ;;  %v2307_v30 = vld [vmem:[%s4102_s4 + $0x58] sm:$0x1]  ;;  %v2309_v47 = vld [vmem:[%s4102_s4 + $0x60] sm:$0x1]  ;;  %v1914_v52 = vsel %vm3547_vm1, %v1776_v14, %v2271_v10  ;;  %v1917_v31 = vsel %vm3558_vm2, %v1777_v56, %v2273_v12 }
 0x261   : > { %v1920_v18 = vsel %vm3547_vm1, %v1784_v17, %v2275_v3  ;;  %v1923_v11 = vsel %vm3558_vm2, %v1785_v6, %v2277_v63  ;;  %2304 = vst [vmem:[%s4102_s4 + $0x38] sm:$0x1] %v1965_v19  ;;  %2306 = vst [vmem:[%s4102_s4 + $0x40] sm:$0x1] %v1968_v4  ;;  %v2327_v26 = vld [vmem:[%s4102_s4 + $0x1c] sm:$0x1] }
 0x262   : > { %v2329_v15 = vld [vmem:[%s4102_s4 + $0x24] sm:$0x1]  ;;  %2272 = vst [vmem:[%s4102_s4 + $0x78] sm:$0xf] %v1914_v52  ;;  %2274 = vst [vmem:[%s4102_s4 + $0x7c] sm:$0x1] %v1917_v31 }
 0x263   : > { %2276 = vst [vmem:[%s4102_s4 + $0x80] sm:$0xf] %v1920_v18  ;;  %2278 = vst [vmem:[%s4102_s4 + $0x84] sm:$0x1] %v1923_v11  ;;  %v1787_v37 = vshrl.u32 %v2374_v54, 16  ;;  %v1790_v21 = vshll.u32 %v2374_v54, 16 }
 0x264   : > { %v1795_v58 = vshrl.u32 %v2375_v32, 16  ;;  %v1798_v36 = vshll.u32 %v2375_v32, 16  ;;  %v2331_v27 = vld [vmem:[%s4102_s4 + $0x2c] sm:$0x1]  ;;  %v2333_v33 = vld [vmem:[%s4102_s4 + $0x34] sm:$0x1] }
 0x265   : > { %v2335_v62 = vld [vmem:[%s4102_s4 + $0x3c] sm:$0x1]  ;;  %v2279_v7 = vld [vmem:[%s4102_s4 + $0x88] sm:$0xf]  ;;  %v2281_v49 = vld [vmem:[%s4102_s4 + $0x8c] sm:$0x1] }
 0x266   : > { %v2283_v25 = vld [vmem:[%s4102_s4 + $0x90] sm:$0xf]  ;;  %v2285_v40 = vld [vmem:[%s4102_s4 + $0x94] sm:$0x1]  ;;  %v1971_v51 = vsel %vm3558_vm2, 0, %v2307_v30  ;;  %v1974_v13 = vsel %vm3558_vm2, 0, %v2309_v47 }
 0x267   : > { %v1996_v35 = vsel %vm3837_vm3, 0, %v2323_v48  ;;  %v1999_v60 = vsel %vm3837_vm3, 0, %v2325_v59  ;;  %v2337_v1 = vld [vmem:[%s4102_s4 + $0x44] sm:$0x1]  ;;  %v1789_v23 = vrot.slane %v1787_v37, 7  ;;  %v1797_v0 = vrot.slane %v1795_v58, 7 }
 0x268   : > { %2308 = vst [vmem:[%s4102_s4 + $0x58] sm:$0x1] %v1971_v51  ;;  %2310 = vst [vmem:[%s4102_s4 + $0x60] sm:$0x1] %v1974_v13  ;;  %v2311_v38 = vld [vmem:[%s4102_s4 + $0x68] sm:$0x1] }
 0x269   : > { %v2313_v44 = vld [vmem:[%s4102_s4 + $0x70] sm:$0x1]  ;;  %2324 = vst [vmem:[%s4102_s4 + $0xc] sm:$0x1] %v1996_v35  ;;  %2326 = vst [vmem:[%s4102_s4 + $0x14] sm:$0x1] %v1999_v60  ;;  %v1792_v5 = vor.u32 %v1790_v21, %v1789_v23  ;;  %v1800_v39 = vor.u32 %v1798_v36, %v1797_v0 }
 0x26a   : > { %v1977_v24 = vsel %vm3558_vm2, 0, %v2311_v38  ;;  %v1980_v20 = vsel %vm3558_vm2, 0, %v2313_v44  ;;  %v2002_v42 = vsel %vm3837_vm3, 0, %v2327_v26  ;;  %v2005_v53 = vsel %vm3837_vm3, 0, %v2329_v15  ;;  %v2339_v29 = vld [vmem:[%s4102_s4 + $0x5c] sm:$0x1] }
 0x26b   : > { %v1793_v43 = vrot.slane %v1789_v23, 4  ;;  %v1801_v50 = vrot.slane %v1797_v0, 4  ;;  %2312 = vst [vmem:[%s4102_s4 + $0x68] sm:$0x1] %v1977_v24  ;;  %2314 = vst [vmem:[%s4102_s4 + $0x70] sm:$0x1] %v1980_v20  ;;  %v1926_v55 = vsel %vm3547_vm1, %v1792_v5, %v2279_v7  ;;  %v1932_v63 = vsel %vm3547_vm1, %v1800_v39, %v2283_v25 }
 0x26c   : > { %2328 = vst [vmem:[%s4102_s4 + $0x1c] sm:$0x1] %v2002_v42  ;;  %2330 = vst [vmem:[%s4102_s4 + $0x24] sm:$0x1] %v2005_v53  ;;  %v2341_v10 = vld [vmem:[%s4102_s4 + $0x64] sm:$0x1] }
 0x26d   : > { %v2343_v12 = vld [vmem:[%s4102_s4 + $0x6c] sm:$0x1]  ;;  %v2008_v3 = vsel %vm3837_vm3, 0, %v2331_v27  ;;  %v2011_v61 = vsel %vm3837_vm3, 0, %v2333_v33  ;;  %v2014_v2 = vsel %vm3837_vm3, 0, %v2335_v62  ;;  %v2017_v22 = vsel %vm3837_vm3, 0, %v2337_v1 }
 0x26e   : > { %v2345_v45 = vld [vmem:[%s4102_s4 + $0x74] sm:$0x1]  ;;  %v1929_v57 = vsel %vm3558_vm2, %v1793_v43, %v2281_v49  ;;  %v1935_v34 = vsel %vm3558_vm2, %v1801_v50, %v2285_v40  ;;  %2332 = vst [vmem:[%s4102_s4 + $0x2c] sm:$0x1] %v2008_v3  ;;  %2334 = vst [vmem:[%s4102_s4 + $0x34] sm:$0x1] %v2011_v61 }
 0x26f   : > { %2336 = vst [vmem:[%s4102_s4 + $0x3c] sm:$0x1] %v2014_v2  ;;  %2338 = vst [vmem:[%s4102_s4 + $0x44] sm:$0x1] %v2017_v22  ;;  %v2315_v8 = vld [vmem:[%s4102_s4 + $0x78] sm:$0x1] }
 0x270   : > { %2280 = vst [vmem:[%s4102_s4 + $0x88] sm:$0xf] %v1926_v55  ;;  %2282 = vst [vmem:[%s4102_s4 + $0x8c] sm:$0x1] %v1929_v57  ;;  %v2317_v9 = vld [vmem:[%s4102_s4 + $0x80] sm:$0x1] }
 0x271   : > { %2284 = vst [vmem:[%s4102_s4 + $0x90] sm:$0xf] %v1932_v63  ;;  %2286 = vst [vmem:[%s4102_s4 + $0x94] sm:$0x1] %v1935_v34  ;;  %v2020_v41 = vsel %vm3837_vm3, 0, %v2339_v29  ;;  %v2023_v46 = vsel %vm3837_vm3, 0, %v2341_v10 }
 0x272   : > { %v1983_v14 = vsel %vm3558_vm2, 0, %v2315_v8  ;;  %v1986_v56 = vsel %vm3558_vm2, 0, %v2317_v9  ;;  %2340 = vst [vmem:[%s4102_s4 + $0x5c] sm:$0x1] %v2020_v41  ;;  %2342 = vst [vmem:[%s4102_s4 + $0x64] sm:$0x1] %v2023_v46 }
 0x273   : > { %v2026_v17 = vsel %vm3837_vm3, 0, %v2343_v12  ;;  %v2029_v6 = vsel %vm3837_vm3, 0, %v2345_v45  ;;  %v2347_v48 = vld [vmem:[%s4102_s4 + $0x7c] sm:$0x1]  ;;  %2316 = vst [vmem:[%s4102_s4 + $0x78] sm:$0x1] %v1983_v14 }
 0x274   : > { %2318 = vst [vmem:[%s4102_s4 + $0x80] sm:$0x1] %v1986_v56  ;;  %2344 = vst [vmem:[%s4102_s4 + $0x6c] sm:$0x1] %v2026_v17  ;;  %v2032_v59 = vsel %vm3837_vm3, 0, %v2347_v48 }
 0x275   : > { %2346 = vst [vmem:[%s4102_s4 + $0x74] sm:$0x1] %v2029_v6  ;;  %v2349_v54 = vld [vmem:[%s4102_s4 + $0x84] sm:$0x1]  ;;  %2348 = vst [vmem:[%s4102_s4 + $0x7c] sm:$0x1] %v2032_v59 }
 0x276   : > { %v2035_v32 = vsel %vm3837_vm3, 0, %v2349_v54 }
 0x277   : > { %2350 = vst [vmem:[%s4102_s4 + $0x84] sm:$0x1] %v2035_v32  ;;  %v2319_v19 = vld [vmem:[%s4102_s4 + $0x88] sm:$0x1]  ;;  %v2351_v30 = vld [vmem:[%s4102_s4 + $0x8c] sm:$0x1] }
 0x278   : > { %v2321_v4 = vld [vmem:[%s4102_s4 + $0x90] sm:$0x1]  ;;  %v1989_v47 = vsel %vm3558_vm2, 0, %v2319_v19  ;;  %v2038_v31 = vsel %vm3837_vm3, 0, %v2351_v30  ;;  %v2353_v18 = vld [vmem:[%s4102_s4 + $0x94] sm:$0x1] }
 0x279   : > { %v1992_v52 = vsel %vm3558_vm2, 0, %v2321_v4  ;;  %2320 = vst [vmem:[%s4102_s4 + $0x88] sm:$0x1] %v1989_v47  ;;  %2352 = vst [vmem:[%s4102_s4 + $0x8c] sm:$0x1] %v2038_v31  ;;  %v2041_v28 = vsel %vm3837_vm3, 0, %v2353_v18 }
 0x27a   : > { %2322 = vst [vmem:[%s4102_s4 + $0x90] sm:$0x1] %v1992_v52  ;;  %2354 = vst [vmem:[%s4102_s4 + $0x94] sm:$0x1] %v2041_v28 }
 0x27b PF: > { %s14_s17 = sadd.s32 1, %s2534_s17   ;;  %s4111_s15 = smov %s2530_s16 }
 0x27c   : > { %p11_p7 = scmp.ge.s32.totalorder %s14_s17, 4   ;;  %s4112_s16 = smov %s4114_s18 }
 0x27e   :  { %13 = sbr.rel (!%p11_p7) target bundleno = 2 (0x2), region = 80 }

// kernel: res_basic_blk_forward.3
= control target key start
LH: loop header
LB: loop body
LE: loop exit
PB: predicated region body
PF: predicated region fallthrough
CT: control target
= control target key end

     0   :  { %s4529_s27 = smov 0   ;;  %s4531_s28 = smov 0   ;;  %s5667_s0 = inlined_call_operand.vmem [shape: bf16[2,10,10,128], index: 0, kind: input, shape index: {}]   ;;  %s5668_s1 = inlined_call_operand.vmem [shape: bf16[2,8,8,4], index: 1, kind: input, shape index: {}]   ;;  %s5669_s2 = inlined_call_operand.vmem [shape: bf16[9,128,128], index: 2, kind: input, shape index: {}]   ;;  %s5670_s3 = inlined_call_operand.vmem [shape: f32[1,128], index: 3, kind: input, shape index: {}]   ;;  %s5671_s4 = inlined_call_operand.vmem [shape: f32[1,128], index: 4, kind: input, shape index: {}]   ;;  %s5672_s5 = inlined_call_operand.vmem [shape: bf16[4,128], index: 5, kind: input, shape index: {}]   ;;  %s5673_s6 = inlined_call_operand.vmem [shape: f32[1,128], index: 6, kind: input, shape index: {}]   ;;  %s5674_s7 = inlined_call_operand.vmem [shape: f32[1,128], index: 7, kind: input, shape index: {}]   ;;  %s5675_s8 = inlined_call_operand.vmem [shape: bf16[2,8,8,128], index: 8, kind: output, shape index: {}]  }
   0x1   :  { %s4533_s29 = smov 0  }
   0x2 LB: > { %s30_s30 = sadd.s32 1, %s4477_s28  ;;  %p3324_p0 = scmp.ge.s32.totalorder %s4481_s29, 1  ;;  %s4481_s29 = sphi %s4533_s29, %s18_s29   ;;  %s4477_s28 = sphi %s4531_s28, %s5698_s28   ;;  %s4473_s27 = sphi %s4529_s27, %s5697_s27  }
   0x3   : > { %p32_p1 = scmp.ge.s32.totalorder %s30_s30, 2  ;;  %p290_p2 = scmp.lt.s32.totalorder %s4481_s29, 3 }
   0x5   : > { %s5700_s30 = smov (%p32_p1, %s30_s30), 0  ;;  %p291_p3 = pnand %p3324_p0, %p290_p2 }
   0x7   : > { %294 = sbr.rel (%p291_p3) target bundleno = 926 (0x39e), region = 52 }
   0xe   : > { %p357_p4 = scmp.eq.s32.totalorder %s4473_s27, 0 }
   0xf   : > { %v4483_v0 = vmov (%p357_p4), 0.0  }
  0x10   : > { %362 = sbr.rel (!%p357_p4) target bundleno = 23 (0x17), region = 56  ;;  %363 = vst [vmem:[#allocation2] sm:$0x1] (%p357_p4), %v4483_v0  ;;  %364 = vst [vmem:[#allocation3] sm:$0x1] (%p357_p4), %v4483_v0 }
  0x11   : > { %365 = vst [vmem:[#allocation4] sm:$0x1] (%p357_p4), %v4483_v0  ;;  %366 = vst [vmem:[#allocation5] sm:$0x1] (%p357_p4), %v4483_v0 }
  0x17 PF: > { %v4349_v1 = vld [vmem:[%s5669_s2 + $0x40] sm:$0xff]   ;;  %v4351_v3 = vld [vmem:[%s5669_s2 + $0x48] sm:$0xff]   ;;  %v4353_v5 = vld [vmem:[%s5669_s2 + $0x50] sm:$0xff]   ;;  %vm423_vm0 = vsmask.f32 3328  ;;  %vm1053_vm3 = vcmask 1042432  }
  0x18   : > { %v4350_v2 = vld [vmem:[%s5669_s2 + $0x100] sm:$0xff]   ;;  %3848 = vmatprep.subr.bf16.mxu1 %v4349_v1  ;;  %v4352_v4 = vld [vmem:[%s5669_s2 + $0x108] sm:$0xff]   ;;  %v4354_v6 = vld [vmem:[%s5669_s2 + $0x110] sm:$0xff]   ;;  %vm424_vm1 = vsmask.f32 7440  ;;  %vm1054_vm4 = vcmask 1046532  }
  0x19   : > { %3976 = vmatprep.subr.bf16.mxu0 %v4350_v2  ;;  %3849 = vmatpush3.bf16.msra.mxu1 %v4349_v1  ;;  %v4355_v7 = vld [vmem:[%s5669_s2 + $0x58] sm:$0xff]   ;;  %v4357_v9 = vld [vmem:[%s5669_s2 + $0x60] sm:$0xff]   ;;  %v4359_v11 = vld [vmem:[%s5669_s2 + $0x68] sm:$0xff]   ;;  %p3600_p5 = scmp.ne.s32.totalorder %s4473_s27, 0 }
  0x1a   : > { %3977 = vmatpush3.bf16.msra.mxu0 %v4350_v2  ;;  %3850 = vmatprep.subr.bf16.mxu1 %v4351_v3  ;;  %v4356_v8 = vld [vmem:[%s5669_s2 + $0x118] sm:$0xff]   ;;  %v4358_v10 = vld [vmem:[%s5669_s2 + $0x120] sm:$0xff]   ;;  %v4596_v14 = vld [vmem:[%s5667_s0 + $0x8] sm:$0xf]  ;;  %vm2699_vm6 = vcmask (!%p3600_p5), 1041408   ;;  %vm2674_vm7 = vcmask (!%p3600_p5), 31744  }
  0x1b   : > { %3978 = vmatprep.subr.bf16.mxu0 %v4352_v4  ;;  %v4586_v12 = vld [vmem:[%s5667_s0] sm:$0xf]  ;;  %v4591_v13 = vld [vmem:[%s5667_s0 + $0x4] sm:$0x1]  ;;  %v4360_v15 = vld [vmem:[%s5669_s2 + $0x128] sm:$0xff]   ;;  %v441_v21 = vshrl.u32 %v4596_v14, 16 }
  0x1c   : > { %v4604_v16 = vld [vmem:[%s5667_s0 + $0xc] sm:$0x1]  ;;  %v4361_v17 = vld [vmem:[%s5669_s2 + $0x70] sm:$0xff]   ;;  %v427_v18 = vshrl.u32 %v4586_v12, 16  ;;  %v430_v19 = vshll.u32 %v4586_v12, 16  ;;  %v436_v20 = vshll.u32 %v4591_v13, 16  ;;  %vm4645_vm2 = vmor %vm423_vm0, %vm424_vm1 }
  0x1d   : > { %3851 = vmatpush3.bf16.msra.mxu1 %v4351_v3  ;;  %v4616_v22 = vld [vmem:[%s5667_s0 + $0x10] sm:$0xf]  ;;  %v444_v24 = vshll.u32 %v4596_v14, 16  ;;  %v450_v25 = vshll.u32 %v4604_v16, 16  ;;  %v4626_v26 = vld [vmem:[%s5667_s0 + $0x14] sm:$0x1]  ;;  %vm4947_vm5 = vmor %vm1053_vm3, %vm1054_vm4 }
  0x1e   : > { %3979 = vmatpush3.bf16.msra.mxu0 %v4352_v4  ;;  %3852 = vmatprep.subr.bf16.mxu1 %v4353_v5  ;;  %v4362_v23 = vld [vmem:[%s5669_s2 + $0x130] sm:$0xff]   ;;  %v429_v27 = vrot.slane %v427_v18, 4  ;;  %v432_v28 = vrot.slane %v430_v19, 5  ;;  %v438_v29 = vrot.slane %v436_v20, 5  ;;  %v443_v30 = vrot.slane %v441_v21, 4  ;;  %v4363_v46 = vld [vmem:[%s5669_s2 + $0x78] sm:$0xff]  }
  0x1f   : > { %3980 = vmatprep.subr.bf16.mxu0 %v4354_v6  ;;  %v4631_v31 = vld [vmem:[%s5667_s0 + $0x18] sm:$0xf]  ;;  %v446_v32 = vrot.slane %v444_v24, 5  ;;  %v452_v33 = vrot.slane %v450_v25, 5  ;;  %v4636_v34 = vld [vmem:[%s5667_s0 + $0x1c] sm:$0x1] }
  0x20   : > { %v455_v35 = vshrl.u32 %v4616_v22, 16  ;;  %v458_v36 = vshll.u32 %v4616_v22, 16  ;;  %v433_v37 = vor.u32 %v432_v28, %v429_v27  ;;  %v464_v38 = vshll.u32 %v4626_v26, 16  ;;  %v4656_v50 = vld [vmem:[%s5667_s0 + $0x20] sm:$0xf]  ;;  %v4364_v51 = vld [vmem:[%s5669_s2 + $0x138] sm:$0xff]  }
  0x21   : > { %3853 = vmatpush3.bf16.msra.mxu1 %v4353_v5  ;;  %v469_v39 = vshrl.u32 %v4631_v31, 16  ;;  %v472_v40 = vshll.u32 %v4631_v31, 16  ;;  %v447_v42 = vor.u32 %v446_v32, %v443_v30  ;;  %v478_v45 = vshll.u32 %v4636_v34, 16  ;;  %v4665_v56 = vld [vmem:[%s5667_s0 + $0x24] sm:$0x1] }
  0x22   : > { %3981 = vmatpush3.bf16.msra.mxu0 %v4354_v6  ;;  %3854 = vmatprep.subr.bf16.mxu1 %v4355_v7  ;;  %v457_v43 = vrot.slane %v455_v35, 4  ;;  %v460_v44 = vrot.slane %v458_v36, 5  ;;  %v434_v47 = vrot.slane %v433_v37, 4  ;;  %v466_v55 = vrot.slane %v464_v38, 5  ;;  %v4365_v63 = vld [vmem:[%s5669_s2] sm:$0xff]  }
  0x23   : > { %3982 = vmatprep.subr.bf16.mxu0 %v4356_v8  ;;  %v471_v48 = vrot.slane %v469_v39, 4  ;;  %v474_v49 = vrot.slane %v472_v40, 5  ;;  %v448_v52 = vrot.slane %v447_v42, 4  ;;  %v480_v59 = vrot.slane %v478_v45, 5  ;;  %v4366_v6 = vld [vmem:[%s5669_s2 + $0x140] sm:$0xff]   ;;  %v4368_v42 = vld [vmem:[%s5669_s2 + $0x148] sm:$0xff]  }
  0x24   : > { %v461_v54 = vor.u32 %v460_v44, %v457_v43  ;;  %v439_v57 = vsel %vm4645_vm2, %v434_v47, %v438_v29  ;;  %v483_v60 = vshrl.u32 %v4656_v50, 16  ;;  %v486_v0 = vshll.u32 %v4656_v50, 16  ;;  %v4696_v18 = vld [vmem:[%s5667_s0 + $0x2c] sm:$0x1]  ;;  %v4701_v19 = vld [vmem:[%s5667_s0 + $0x30] sm:$0xf] }
  0x25   : > { %3855 = vmatpush3.bf16.msra.mxu1 %v4355_v7  ;;  %v475_v58 = vor.u32 %v474_v49, %v471_v48  ;;  %v453_v61 = vsel %vm4645_vm2, %v448_v52, %v452_v33  ;;  %v492_v1 = vshll.u32 %v4665_v56, 16  ;;  %v4714_v28 = vld [vmem:[%s5667_s0 + $0x34] sm:$0x1]  ;;  %v4719_v29 = vld [vmem:[%s5667_s0 + $0x38] sm:$0xf]  ;;  %v506_v30 = vshll.u32 %v4696_v18, 16 }
  0x26   : > { %3983 = vmatpush3.bf16.msra.mxu0 %v4356_v8  ;;  %3856 = vmatprep.subr.bf16.mxu1 %v4357_v9  ;;  %v462_v62 = vrot.slane %v461_v54, 4  ;;  %v3342_v2 = vcombine.low %v439_v57, %v453_v61  ;;  %v485_v5 = vrot.slane %v483_v60, 4  ;;  %v488_v8 = vrot.slane %v486_v0, 5  ;;  %v4728_v36 = vld [vmem:[%s5667_s0 + $0x3c] sm:$0x1]  ;;  %v4369_v47 = vld [vmem:[%s5669_s2 + $0x10] sm:$0xff]  }
  0x27   : > { %3984 = vmatprep.subr.bf16.mxu0 %v4358_v10  ;;  %v476_v3 = vrot.slane %v475_v58, 4  ;;  %v511_v32 = vshrl.u32 %v4701_v19, 16  ;;  %v514_v33 = vshll.u32 %v4701_v19, 16  ;;  %v520_v35 = vshll.u32 %v4714_v28, 16  ;;  %v4744_v54 = vld [vmem:[%s5667_s0 + $0x40] sm:$0xf] }
  0x28   : > { %v467_v7 = vsel %vm4645_vm2, %v462_v62, %v466_v55  ;;  %3864 = vmatprep.mubr.bf16.mxu1 %v3342_v2  ;;  %v489_v24 = vor.u32 %v488_v8, %v485_v5  ;;  %v525_v40 = vshrl.u32 %v4719_v29, 16  ;;  %v508_v43 = vrot.slane %v506_v30, 5  ;;  %v4749_v55 = vld [vmem:[%s5667_s0 + $0x44] sm:$0x1]  ;;  %v4370_v5 = vld [vmem:[%s5669_s2 + $0x150] sm:$0xff]  }
  0x29   : > { %3857 = vmatpush3.bf16.msra.mxu1 %v4357_v9  ;;  %v494_v9 = vrot.slane %v492_v1, 5  ;;  %v513_v44 = vrot.slane %v511_v32, 4  ;;  %v516_v45 = vrot.slane %v514_v33, 5  ;;  %v528_v52 = vshll.u32 %v4719_v29, 16  ;;  %v4780_v33 = vld [vmem:[%s5667_s0 + $0x58] sm:$0xf] }
  0x2a   : > { %3985 = vmatpush3.bf16.msra.mxu0 %v4358_v10  ;;  %3858 = vmatprep.subr.bf16.mxu1 %v4359_v11  ;;  %v481_v10 = vsel %vm4645_vm2, %v476_v3, %v480_v59  ;;  %v490_v37 = vrot.slane %v489_v24, 4  ;;  %v534_v59 = vshll.u32 %v4728_v36, 16  ;;  %v1529_v60 = vshrl.u32 %v4744_v54, 16 }
  0x2b   : > { %3986 = vmatprep.subr.bf16.mxu0 %v4360_v15  ;;  %v517_v58 = vor.u32 %v516_v45, %v513_v44  ;;  %v530_v62 = vrot.slane %v528_v52, 5  ;;  %v1538_v0 = vshll.u32 %v4749_v55, 16  ;;  %v4796_v44 = vld [vmem:[%s5667_s0 + $0x60] sm:$0xf] }
  0x2c   : > { %v495_v48 = vsel %vm4645_vm2, %v490_v37, %v494_v9  ;;  %v536_v2 = vrot.slane %v534_v59, 5  ;;  %v1531_v3 = vrot.slane %v1529_v60, 4  ;;  %v4814_v60 = vld [vmem:[%s5667_s0 + $0x68] sm:$0xf] }
  0x2d   : > { %3859 = vmatpush3.bf16.msra.mxu1 %v4359_v11  ;;  %v3470_v11 = vcombine.low %v453_v61, %v467_v7  ;;  %v3471_v57 = vcombine.low %v481_v10, %v495_v48  ;;  %v518_v1 = vrot.slane %v517_v58, 4 }
  0x2e   : > { %3987 = vmatpush3.bf16.msra.mxu0 %v4360_v15  ;;  %3860 = vmatprep.subr.bf16.mxu1 %v4361_v17  ;;  %v4367_v15 = vld [vmem:[%s5669_s2 + $0x8] sm:$0xff]  }
  0x2f   : > { %3988 = vmatprep.subr.bf16.mxu0 %v4362_v23  ;;  %3992 = vmatprep.mubr.bf16.mxu0 %v3470_v11  ;;  %v4371_v11 = vld [vmem:[%s5669_s2 + $0x18] sm:$0xff]  }
  0x31   : > { %3861 = vmatpush3.bf16.msra.mxu1 %v4361_v17  ;;  %v4691_v17 = vld [vmem:[%s5667_s0 + $0x28] sm:$0xf] }
  0x32   : > { %3989 = vmatpush3.bf16.msra.mxu0 %v4362_v23  ;;  %3862 = vmatprep.subr.bf16.mxu1 %v4363_v46  ;;  %v4707_v23 = vcombine.low %v467_v7, %v481_v10  ;;  %v497_v25 = vshrl.u32 %v4691_v17, 16  ;;  %v500_v27 = vshll.u32 %v4691_v17, 16  ;;  %v1540_v10 = vrot.slane %v1538_v0, 5  ;;  %v4824_v0 = vld [vmem:[%s5667_s0 + $0x6c] sm:$0x1] }
  0x33   : > { %3990 = vmatprep.subr.bf16.mxu0 %v4364_v51 }
  0x34   : > { %v499_v38 = vrot.slane %v497_v25, 4  ;;  %v502_v39 = vrot.slane %v500_v27, 5 }
  0x35   : > { %3863 = vmatpush3.bf16.msra.mxu1 %v4363_v46  ;;  %v522_v46 = vrot.slane %v520_v35, 5  ;;  %v4785_v35 = vld [vmem:[%s5667_s0 + $0x5c] sm:$0x1] }
  0x36   : > { %3991 = vmatpush3.bf16.msra.mxu0 %v4364_v51  ;;  %3880 = vmatprep.subr.bf16.mxu1 %v4365_v63  ;;  %v503_v49 = vor.u32 %v502_v39, %v499_v38  ;;  %v527_v51 = vrot.slane %v525_v40, 4  ;;  %v553_v40 = vshrl.u32 %v4780_v33, 16 }
  0x37   : > { %4008 = vmatprep.subr.bf16.mxu0 %v4366_v6  ;;  %v523_v25 = vsel %vm4645_vm2, %v518_v1, %v522_v46  ;;  %v4373_v1 = vld [vmem:[%s5669_s2 + $0x20] sm:$0xff]  }
  0x38   : > { %3865 = vmatmul.mubr.bf16.vlgmr.msra.gmra.mrb[0].mxu1 %v4707_v23  ;;  %v504_v61 = vrot.slane %v503_v49, 4  ;;  %v531_v8 = vor.u32 %v530_v62, %v527_v51  ;;  %v562_v49 = vshll.u32 %v4785_v35, 16  ;;  %v4804_v51 = vld [vmem:[%s5667_s0 + $0x64] sm:$0x1]  ;;  %v555_v59 = vrot.slane %v553_v40, 4 }
  0x39   : > { %3881 = vmatpush3.bf16.msra.mxu1 %v4365_v63  ;;  %v1532_v63 = vshll.u32 %v4744_v54, 16  ;;  %3993 = vmatmul.mubr.bf16.vlgmr.msra.gmra.mrb[0].mxu0 %v3471_v57  ;;  %v4847_v40 = vld [vmem:[%s5667_s0 + $0x74] sm:$0x1] }
  0x3a   : > { %3882 = vmatprep.subr.bf16.mxu1 %v4367_v15  ;;  %4009 = vmatpush3.bf16.msra.mxu0 %v4366_v6  ;;  %v509_v7 = vsel %vm4645_vm2, %v504_v61, %v508_v43  ;;  %v4770_v6 = vld [vmem:[%s5667_s0 + $0x50] sm:$0xf]  ;;  %v532_v30 = vrot.slane %v531_v8, 4  ;;  %v556_v43 = vshll.u32 %v4780_v33, 16  ;;  %v576_v8 = vshll.u32 %v4804_v51, 16 }
  0x3b   : > { %v1534_v9 = vrot.slane %v1532_v63, 5  ;;  %4010 = vmatprep.subr.bf16.mxu0 %v4368_v42  ;;  %v4763_v24 = vcombine.low %v495_v48, %v509_v7  ;;  %v3472_v27 = vcombine.low %v509_v7, %v523_v25  ;;  %v539_v37 = vshrl.u32 %v4770_v6, 16 }
  0x3c   : > { %v542_v38 = vshll.u32 %v4770_v6, 16  ;;  %v537_v45 = vsel %vm4645_vm2, %v532_v30, %v536_v2  ;;  %v558_v62 = vrot.slane %v556_v43, 5  ;;  %v564_v63 = vrot.slane %v562_v49, 5  ;;  %v4838_v30 = vld [vmem:[%s5667_s0 + $0x70] sm:$0xf]  ;;  %v4375_v43 = vld [vmem:[%s5669_s2 + $0x28] sm:$0xff]  }
  0x3d   : > { %3883 = vmatpush3.bf16.msra.mxu1 %v4367_v15  ;;  %5682 = vst [vmem:[#allocation6_spill] sm:$0xff] %v4763_v24  ;;  %v4775_v15 = vld [vmem:[%s5667_s0 + $0x54] sm:$0x1]  ;;  %v1535_v32 = vor.u32 %v1534_v9, %v1531_v3  ;;  %3868 = vmatprep.mubr.bf16.mxu1 %v4763_v24  ;;  %v541_v48 = vrot.slane %v539_v37, 4  ;;  %v4806_v52 = vcombine.low %v523_v25, %v537_v45  ;;  %v570_v7 = vshll.u32 %v4796_v44, 16 }
  0x3e   : > { %3884 = vmatprep.subr.bf16.mxu1 %v4369_v47  ;;  %v548_v39 = vshll.u32 %v4775_v15, 16  ;;  %4011 = vmatpush3.bf16.msra.mxu0 %v4368_v42  ;;  %v4372_v42 = vld [vmem:[%s5669_s2 + $0x158] sm:$0xff]   ;;  %v544_v57 = vrot.slane %v542_v38, 5  ;;  %v559_v9 = vor.u32 %v558_v62, %v555_v59  ;;  %v581_v25 = vshrl.u32 %v4814_v60, 16 }
  0x3f   : > { %3996 = vmatprep.mubr.bf16.mxu0 %v3472_v27  ;;  %v1536_v46 = vrot.slane %v1535_v32, 4  ;;  %5683 = vst [vmem:[#allocation7_spill] sm:$0xff] %v4806_v52  ;;  %4012 = vmatprep.subr.bf16.mxu0 %v4370_v5  ;;  %v584_v27 = vshll.u32 %v4814_v60, 16  ;;  %v4374_v32 = vld [vmem:[%s5669_s2 + $0x160] sm:$0xff]   ;;  %v572_v38 = vrot.slane %v570_v7, 5  ;;  %v595_v49 = vshrl.u32 %v4838_v30, 16 }
  0x40   : > { %v550_v58 = vrot.slane %v548_v39, 5  ;;  %3869 = vmatmul.mubr.bf16.gmra.mrb[4].mxu1 %v4806_v52  ;;  %v545_v3 = vor.u32 %v544_v57, %v541_v48  ;;  %v590_v39 = vshll.u32 %v4824_v0, 16 }
  0x41   : > { %3885 = vmatpush3.bf16.msra.mxu1 %v4369_v47  ;;  %v4818_v61 = vsel %vm4645_vm2, %v1536_v46, %v1540_v10  ;;  %v567_v47 = vshrl.u32 %v4796_v44, 16  ;;  %v583_v46 = vrot.slane %v581_v25, 4  ;;  %v586_v48 = vrot.slane %v584_v27, 5 }
  0x42   : > { %5684 = vst [vmem:[#allocation8_spill] sm:$0xff] %v4818_v61  ;;  %3886 = vmatprep.subr.bf16.mxu1 %v4371_v11  ;;  %v3473_v2 = vcombine.low %v537_v45, %v4818_v61  ;;  %4013 = vmatpush3.bf16.msra.mxu0 %v4370_v5  ;;  %v546_v37 = vrot.slane %v545_v3, 4  ;;  %v578_v5 = vrot.slane %v576_v8, 5  ;;  %v560_v45 = vrot.slane %v559_v9, 4 }
  0x43   : > { %v569_v10 = vrot.slane %v567_v47, 4  ;;  %4014 = vmatprep.subr.bf16.mxu0 %v4372_v42  ;;  %v592_v62 = vrot.slane %v590_v39, 5  ;;  %v598_v47 = vshll.u32 %v4838_v30, 16  ;;  %v587_v3 = vor.u32 %v586_v48, %v583_v46  ;;  %v4885_v48 = vld [vmem:[%s5667_s0 + $0x84] sm:$0x1] }
  0x44   : > { %3997 = vmatmul.mubr.bf16.gmra.mrb[4].mxu0 %v3473_v2  ;;  %v551_v57 = vsel %vm4645_vm2, %v546_v37, %v550_v58  ;;  %v4376_v2 = vld [vmem:[%s5669_s2 + $0x168] sm:$0xff]   ;;  %v597_v7 = vrot.slane %v595_v49, 4  ;;  %v604_v8 = vshll.u32 %v4847_v40, 16  ;;  %v4377_v49 = vld [vmem:[%s5669_s2 + $0x30] sm:$0xff]   ;;  %v3375_v61 = vrot.slane %v4596_v14, 9 }
  0x45   : > { %3887 = vmatpush3.bf16.msra.mxu1 %v4371_v11  ;;  %v573_v59 = vor.u32 %v572_v38, %v569_v10  ;;  %v565_v11 = vsel %vm4645_vm2, %v560_v45, %v564_v63  ;;  %v600_v58 = vrot.slane %v598_v47, 5  ;;  %v4865_v10 = vld [vmem:[%s5667_s0 + $0x78] sm:$0xf]  ;;  %v588_v27 = vrot.slane %v587_v3, 4  ;;  %v4870_v63 = vld [vmem:[%s5667_s0 + $0x7c] sm:$0x1] }
  0x46   : > { %3888 = vmatprep.subr.bf16.mxu1 %v4373_v1  ;;  %4015 = vmatpush3.bf16.msra.mxu0 %v4372_v42  ;;  %v3346_v9 = vcombine.low %v551_v57, %v565_v11  ;;  %v606_v42 = vrot.slane %v604_v8, 5  ;;  %v609_v37 = vshrl.u32 %v4865_v10, 16  ;;  %v612_v38 = vshll.u32 %v4865_v10, 16  ;;  %v4895_v3 = vld [vmem:[%s5667_s0 + $0x88] sm:$0xf] }
  0x47   : > { %v574_v25 = vrot.slane %v573_v59, 4  ;;  %4016 = vmatprep.subr.bf16.mxu0 %v4374_v32  ;;  %v601_v45 = vor.u32 %v600_v58, %v597_v7  ;;  %v618_v46 = vshll.u32 %v4870_v63, 16  ;;  %v4900_v7 = vld [vmem:[%s5667_s0 + $0x8c] sm:$0x1] }
  0x48   : > { %3872 = vmatprep.mubr.bf16.mxu1 %v3346_v9  ;;  %v611_v59 = vrot.slane %v609_v37, 4  ;;  %v614_v47 = vrot.slane %v612_v38, 5  ;;  %v637_v37 = vshrl.u32 %v4895_v3, 16 }
  0x49   : > { %3889 = vmatpush3.bf16.msra.mxu1 %v4373_v1  ;;  %v579_v39 = vsel %vm4645_vm2, %v574_v25, %v578_v5  ;;  %v4880_v1 = vld [vmem:[%s5667_s0 + $0x80] sm:$0xf]  ;;  %v593_v5 = vsel %vm4645_vm2, %v588_v27, %v592_v62  ;;  %v602_v9 = vrot.slane %v601_v45, 4  ;;  %v632_v27 = vshll.u32 %v4885_v48, 16 }
  0x4a   : > { %3890 = vmatprep.subr.bf16.mxu1 %v4375_v43  ;;  %v3474_v57 = vcombine.low %v565_v11, %v579_v39  ;;  %4017 = vmatpush3.bf16.msra.mxu0 %v4374_v32  ;;  %v4902_v8 = vcombine.low %v579_v39, %v593_v5  ;;  %v620_v11 = vrot.slane %v618_v46, 5  ;;  %v623_v62 = vshrl.u32 %v4880_v1, 16  ;;  %v4378_v32 = vld [vmem:[%s5669_s2 + $0x170] sm:$0xff]  }
  0x4b   : > { %4018 = vmatprep.subr.bf16.mxu0 %v4376_v2  ;;  %v615_v25 = vor.u32 %v614_v47, %v611_v59  ;;  %v626_v58 = vshll.u32 %v4880_v1, 16  ;;  %v607_v38 = vsel %vm4645_vm2, %v602_v9, %v606_v42  ;;  %v640_v45 = vshll.u32 %v4895_v3, 16  ;;  %v4927_v9 = vld [vmem:[%s5667_s0 + $0x94] sm:$0x1] }
  0x4c   : > { %5685 = vst [vmem:[#allocation9_spill] sm:$0xff] %v4902_v8  ;;  %4000 = vmatprep.mubr.bf16.mxu0 %v3474_v57  ;;  %3873 = vmatmul.mubr.bf16.gmra.mrb[8].mxu1 %v4902_v8  ;;  %v625_v39 = vrot.slane %v623_v62, 4  ;;  %v646_v46 = vshll.u32 %v4900_v7, 16  ;;  %v4379_v57 = vld [vmem:[%s5669_s2 + $0x38] sm:$0xff]   ;;  %v3475_v59 = vcombine.low %v593_v5, %v607_v38  ;;  %v634_v42 = vrot.slane %v632_v27, 5 }
  0x4d   : > { %3891 = vmatpush3.bf16.msra.mxu1 %v4375_v43  ;;  %v4919_v43 = vld [vmem:[%s5667_s0 + $0x90] sm:$0xf]  ;;  %v616_v47 = vrot.slane %v615_v25, 4  ;;  %v628_v21 = vrot.slane %v626_v58, 5  ;;  %v4380_v62 = vld [vmem:[%s5669_s2 + $0x178] sm:$0xff]   ;;  %v639_v20 = vrot.slane %v637_v37, 4 }
  0x4e   : > { %3892 = vmatprep.subr.bf16.mxu1 %v4377_v49  ;;  %4019 = vmatpush3.bf16.msra.mxu0 %v4376_v2  ;;  %v642_v4 = vrot.slane %v640_v45, 5  ;;  %v648_v53 = vrot.slane %v646_v46, 5  ;;  %v1543_v8 = vshrl.u32 %v4919_v43, 16  ;;  %v4936_v2 = vld [vmem:[%s5669_s2 + $0x80] sm:$0xff]   ;;  %v1546_v58 = vshll.u32 %v4919_v43, 16 }
  0x4f   : > { %4020 = vmatprep.subr.bf16.mxu0 %v4378_v32  ;;  %4001 = vmatmul.mubr.bf16.gmra.mrb[8].mxu0 %v3475_v59  ;;  %v621_v5 = vsel %vm4645_vm2, %v616_v47, %v620_v11  ;;  %v629_v25 = vor.u32 %v628_v21, %v625_v39  ;;  %v1552_v27 = vshll.u32 %v4927_v9, 16  ;;  %v3376_v21 = vrot.slane %v4616_v22, 9 }
  0x50   : > { %v4942_v37 = vcombine.low %v607_v38, %v621_v5  ;;  %v643_v45 = vor.u32 %v642_v4, %v639_v20  ;;  %v1545_v46 = vrot.slane %v1543_v8, 4  ;;  %v1548_v24 = vrot.slane %v1546_v58, 5  ;;  %v4384_v4 = vld [vmem:[%s5669_s2 + $0x180] sm:$0xff]  }
  0x51   : > { %3893 = vmatpush3.bf16.msra.mxu1 %v4377_v49  ;;  %v630_v52 = vrot.slane %v629_v25, 4  ;;  %v1554_v38 = vrot.slane %v1552_v27, 5  ;;  %v5688_v47 = vrot.slane %v4604_v16, 5  ;;  %v5689_v58 = vrot.slane %v4626_v26, 5 }
  0x52   : > { %3894 = vmatprep.subr.bf16.mxu1 %v4379_v57  ;;  %4021 = vmatpush3.bf16.msra.mxu0 %v4378_v32  ;;  %v644_v49 = vrot.slane %v643_v45, 4  ;;  %v1549_v8 = vor.u32 %v1548_v24, %v1545_v46  ;;  %v3358_v32 = vcombine.low %v4586_v12, %v4596_v14  ;;  %v1074_v16 = vrot.slane %v4665_v56, 5 }
  0x53   : > { %3876 = vmatprep.mubr.bf16.mxu1 %v4942_v37  ;;  %4022 = vmatprep.subr.bf16.mxu0 %v4380_v62  ;;  %v635_v20 = vsel %vm4645_vm2, %v630_v52, %v634_v42  ;;  %v4966_v25 = vsel %vm4947_vm5, %v3375_v61, %v5688_v47  ;;  %v4972_v52 = vsel %vm4947_vm5, %v3376_v21, %v5689_v58  ;;  %v3377_v61 = vrot.slane %v4631_v31, 9 }
  0x54   : > { %v3476_v39 = vcombine.low %v621_v5, %v635_v20  ;;  %v649_v59 = vsel %vm4645_vm2, %v644_v49, %v648_v53  ;;  %v1070_v53 = vrot.slane %v4636_v34, 5  ;;  %v3378_v42 = vrot.slane %v4656_v50, 9 }
  0x55   : > { %3895 = vmatpush3.bf16.msra.mxu1 %v4379_v57  ;;  %v4975_v24 = vcombine.low %v635_v20, %v649_v59  ;;  %v1550_v57 = vrot.slane %v1549_v8, 4  ;;  %v3504_v5 = vcombine.low %v4966_v25, %v4972_v52  ;;  %v1078_v34 = vrot.slane %v4696_v18, 5  ;;  %v4385_v20 = vld [vmem:[%s5669_s2 + $0x88] sm:$0xff]  }
  0x56   : > { %3912 = vmatprep.subr.bf16.mxu1 %v4936_v2  ;;  %4023 = vmatpush3.bf16.msra.mxu0 %v4380_v62  ;;  %v3379_v62 = vrot.slane %v4691_v17, 9  ;;  %v3380_v27 = vrot.slane %v4701_v19, 9  ;;  %v1082_v45 = vrot.slane %v4714_v28, 5  ;;  %v4995_v46 = vsel %vm4947_vm5, %v3377_v61, %v1070_v53  ;;  %v4386_v53 = vld [vmem:[%s5669_s2 + $0x188] sm:$0xff]  }
  0x57   : > { %4004 = vmatprep.mubr.bf16.mxu0 %v3476_v39  ;;  %4040 = vmatprep.subr.bf16.mxu0 %v4384_v4  ;;  %v4984_v26 = vsel %vm4645_vm2, %v1550_v57, %v1554_v38  ;;  %v4999_v21 = vsel %vm4947_vm5, %v3378_v42, %v1074_v16  ;;  %v5003_v18 = vcombine.low %v4616_v22, %v4631_v31  ;;  %v3381_v8 = vrot.slane %v4719_v29, 9 }
  0x58   : > { %3877 = vmatmul.mubr.bf16.gmra.mrb[12].mxu1 %v4975_v24  ;;  %v3477_v56 = vcombine.low %v649_v59, %v4984_v26  ;;  %v5007_v49 = vcombine.low %v4656_v50, %v4691_v17  ;;  %v5011_v28 = vsel %vm4947_vm5, %v3379_v62, %v1078_v34  ;;  %v5015_v38 = vsel %vm4947_vm5, %v3380_v27, %v1082_v45  ;;  %v4391_v45 = vld [vmem:[%s5669_s2 + $0x98] sm:$0xff]  }
  0x59   : > { %3896 = vmatprep.mubr.bf16.mxu1 %v3358_v32  ;;  %v3440_v32 = vcombine.low %v4691_v17, %v4701_v19  ;;  %v3441_v39 = vcombine.low %v4719_v29, %v4744_v54  ;;  %v3505_v59 = vcombine.low %v4995_v46, %v4999_v21  ;;  %v1086_v47 = vrot.slane %v4728_v36, 5  ;;  %v4430_v17 = vld [vmem:[%s5669_s2 + $0x218] sm:$0xff]  }
  0x5a   : > { %4005 = vmatmul.mubr.bf16.gmra.mrb[12].mxu0 %v3477_v56  ;;  %v3486_v58 = vrot.slane %v4744_v54, 9  ;;  %v3442_v57 = vcombine.low %v4780_v33, %v4796_v44  ;;  %v3506_v16 = vcombine.low %v5011_v28, %v5015_v38  ;;  %v1756_v61 = vrot.slane %v4749_v55, 5  ;;  %v4389_v55 = vld [vmem:[%s5669_s2 + $0x90] sm:$0xff]  }
  0x5b   : > { %4024 = vmatprep.mubr.bf16.mxu0 %v3504_v5  ;;  %v3383_v42 = vrot.slane %v4780_v33, 9  ;;  %v1094_v36 = vrot.slane %v4785_v35, 5  ;;  %v3384_v5 = vrot.slane %v4796_v44, 9  ;;  %v1098_v62 = vrot.slane %v4804_v51, 5 }
  0x5c   : > { %v1058_v56 = vrot.slane %v4591_v13, 5  ;;  %v5052_v35 = vcombine.low %v4701_v19, %v4719_v29  ;;  %v3444_v51 = vcombine.low %v4865_v10, %v4880_v1  ;;  %v5061_v13 = vsel %vm4947_vm5, %v3381_v8, %v1086_v47  ;;  %v5694_v19 = vld [vmem:[#allocation8_spill] sm:$0xff] }
  0x5d   : > { %v5065_v27 = vsel %vm4947_vm5, %v3486_v58, %v1756_v61  ;;  %v3445_v34 = vcombine.low %v4895_v3, %v4919_v43  ;;  %v5079_v8 = vsel %vm4947_vm5, %v3384_v5, %v1098_v62  ;;  %v3385_v47 = vrot.slane %v4814_v60, 9 }
  0x5e   : > { %v3382_v58 = vrot.slane %v4770_v6, 9  ;;  %v1090_v61 = vrot.slane %v4775_v15, 5  ;;  %v3386_v5 = vrot.slane %v4838_v30, 9  ;;  %v1106_v62 = vrot.slane %v4847_v40, 5 }
  0x5f   : > { %v1110_v15 = vrot.slane %v4870_v63, 5  ;;  %v1114_v40 = vrot.slane %v4885_v48, 5  ;;  %v5114_v63 = vcombine.low %v4796_v44, %v4814_v60  ;;  %v5250_v11 = vcombine.low %v5015_v38, %v5061_v13  ;;  %v4413_v38 = vld [vmem:[%s5669_s2 + $0x1d8] sm:$0xff]  }
  0x60   : > { %3897 = vmatmul.mubr.bf16.vlgmr.msra.gmra.mrb[0].mxu1 %v5003_v18  ;;  %v5122_v48 = vsel %vm4947_vm5, %v3386_v5, %v1106_v62  ;;  %v3487_v62 = vrot.slane %v4919_v43, 9 }
  0x61   : > { %3913 = vmatpush3.bf16.msra.mxu1 %v4936_v2  ;;  %3900 = vmatprep.mubr.bf16.mxu1 %v5007_v49  ;;  %v4390_v2 = vld [vmem:[%s5669_s2 + $0x190] sm:$0xff]  }
  0x62   : > { %3914 = vmatprep.subr.bf16.mxu1 %v4385_v20  ;;  %4025 = vmatmul.mubr.bf16.vlgmr.msra.gmra.mrb[0].mxu0 %v3505_v59  ;;  %v3374_v59 = vrot.slane %v4586_v12, 9  ;;  %v3362_v12 = vcombine.low %v4770_v6, %v4780_v33  ;;  %v5696_v33 = vcombine.low %v4814_v60, %v4838_v30 }
  0x63   : > { %4041 = vmatpush3.bf16.msra.mxu0 %v4384_v4  ;;  %4028 = vmatprep.mubr.bf16.mxu0 %v3506_v16  ;;  %v5075_v4 = vsel %vm4947_vm5, %v3383_v42, %v1094_v36  ;;  %v1102_v16 = vrot.slane %v4824_v0, 5  ;;  %v3507_v42 = vcombine.low %v5061_v13, %v5065_v27  ;;  %v4392_v36 = vld [vmem:[%s5669_s2 + $0x198] sm:$0xff]   ;;  %v3387_v0 = vrot.slane %v4865_v10, 9  ;;  %v4414_v13 = vld [vmem:[%s5669_s2 + $0xe0] sm:$0xff]  }
  0x64   : > { %4042 = vmatprep.subr.bf16.mxu0 %v4386_v53  ;;  %v3508_v6 = vcombine.low %v5075_v4, %v5079_v8 }
  0x65   : > { %3915 = vmatpush3.bf16.msra.mxu1 %v4385_v20  ;;  %v5088_v20 = vsel %vm4947_vm5, %v3374_v59, %v1058_v56  ;;  %v5105_v56 = vsel %vm4947_vm5, %v3382_v58, %v1090_v61  ;;  %v3388_v59 = vrot.slane %v4880_v1, 9  ;;  %v4396_v58 = vld [vmem:[%s5669_s2 + $0x1a0] sm:$0xff]   ;;  %v3389_v61 = vrot.slane %v4895_v3, 9 }
  0x66   : > { %3916 = vmatprep.subr.bf16.mxu1 %v4389_v55 }
  0x67   : > { %4043 = vmatpush3.bf16.msra.mxu0 %v4386_v53  ;;  %v4395_v53 = vld [vmem:[%s5669_s2 + $0xa0] sm:$0xff]  }
  0x68   : > { %3901 = vmatmul.mubr.bf16.gmra.mrb[4].mxu1 %v5052_v35  ;;  %4044 = vmatprep.subr.bf16.mxu0 %v4390_v2 }
  0x69   : > { %3917 = vmatpush3.bf16.msra.mxu1 %v4389_v55  ;;  %3904 = vmatprep.mubr.bf16.mxu1 %v3362_v12  ;;  %v5118_v55 = vsel %vm4947_vm5, %v3385_v47, %v1102_v16  ;;  %v5133_v12 = vsel %vm4947_vm5, %v3388_v59, %v1114_v40  ;;  %v4397_v47 = vld [vmem:[%s5669_s2 + $0xa8] sm:$0xff]   ;;  %v4402_v59 = vld [vmem:[%s5669_s2 + $0x1b0] sm:$0xff]   ;;  %v4403_v40 = vld [vmem:[%s5669_s2 + $0xb8] sm:$0xff]  }
  0x6a   : > { %3918 = vmatprep.subr.bf16.mxu1 %v4391_v45  ;;  %4029 = vmatmul.mubr.bf16.gmra.mrb[4].mxu0 %v3507_v42  ;;  %v3509_v16 = vcombine.low %v5118_v55, %v5122_v48  ;;  %v1118_v42 = vrot.slane %v4900_v7, 5  ;;  %v4401_v7 = vld [vmem:[%s5669_s2 + $0xb0] sm:$0xff]  }
  0x6b   : > { %4045 = vmatpush3.bf16.msra.mxu0 %v4390_v2  ;;  %4032 = vmatprep.mubr.bf16.mxu0 %v3508_v6  ;;  %v5129_v2 = vsel %vm4947_vm5, %v3387_v0, %v1110_v15  ;;  %v1760_v6 = vrot.slane %v4927_v9, 5  ;;  %v4398_v0 = vld [vmem:[%s5669_s2 + $0x1a8] sm:$0xff]  }
  0x6c   : > { %4046 = vmatprep.subr.bf16.mxu0 %v4392_v36  ;;  %v3510_v5 = vcombine.low %v5129_v2, %v5133_v12  ;;  %v5164_v9 = vsel %vm4947_vm5, %v3389_v61, %v1118_v42  ;;  %v5196_v61 = vld [vmem:[%s5667_s0 + $0x98] sm:$0xf]  ;;  %v5201_v42 = vld [vmem:[%s5667_s0 + $0x4c] sm:$0x1] }
  0x6d   : > { %3919 = vmatpush3.bf16.msra.mxu1 %v4391_v45  ;;  %v5140_v45 = vcombine.low %v4838_v30, %v4865_v10  ;;  %v5168_v15 = vsel %vm4947_vm5, %v3487_v62, %v1760_v6  ;;  %v4406_v62 = vld [vmem:[%s5669_s2 + $0x1c0] sm:$0xff]   ;;  %v2360_v6 = vrot.slane %v5201_v42, 5  ;;  %v4438_v30 = vld [vmem:[%s5669_s2 + $0x238] sm:$0xff]  }
  0x6e   : > { %3920 = vmatprep.subr.bf16.mxu1 %v4395_v53 }
  0x6f   : > { %4047 = vmatpush3.bf16.msra.mxu0 %v4392_v36  ;;  %v5160_v36 = vcombine.low %v4880_v1, %v4895_v3 }
  0x70   : > { %3905 = vmatmul.mubr.bf16.gmra.mrb[8].mxu1 %v5114_v63  ;;  %4048 = vmatprep.subr.bf16.mxu0 %v4396_v58 }
  0x71   : > { %3921 = vmatpush3.bf16.msra.mxu1 %v4395_v53  ;;  %3908 = vmatprep.mubr.bf16.mxu1 %v5140_v45  ;;  %v3406_v53 = vcombine.low %v5088_v20, %v4966_v25  ;;  %v4405_v25 = vld [vmem:[%s5669_s2 + $0xc0] sm:$0xff]  }
  0x72   : > { %3922 = vmatprep.subr.bf16.mxu1 %v4397_v47  ;;  %4033 = vmatmul.mubr.bf16.gmra.mrb[8].mxu0 %v3509_v16  ;;  %v5187_v16 = vld [vmem:[%s5667_s0 + $0x48] sm:$0xf] }
  0x73   : > { %4049 = vmatpush3.bf16.msra.mxu0 %v4396_v58  ;;  %4036 = vmatprep.mubr.bf16.mxu0 %v3510_v5  ;;  %v3511_v58 = vcombine.low %v5164_v9, %v5168_v15  ;;  %v3572_v20 = vrot.slane %v5187_v16, 9  ;;  %v5205_v5 = vcombine.low %v4972_v52, %v4995_v46  ;;  %v4407_v52 = vld [vmem:[%s5669_s2 + $0xc8] sm:$0xff]   ;;  %v5223_v46 = vcombine.low %v4999_v21, %v5011_v28 }
  0x74   : > { %4050 = vmatprep.subr.bf16.mxu0 %v4398_v0  ;;  %v4408_v21 = vld [vmem:[%s5669_s2 + $0x1c8] sm:$0xff]  }
  0x75   : > { %3923 = vmatpush3.bf16.msra.mxu1 %v4397_v47  ;;  %v4404_v47 = vld [vmem:[%s5669_s2 + $0x1b8] sm:$0xff]  }
  0x76   : > { %3924 = vmatprep.subr.bf16.mxu1 %v4401_v7 }
  0x77   : > { %4051 = vmatpush3.bf16.msra.mxu0 %v4398_v0  ;;  %v3573_v0 = vrot.slane %v5196_v61, 9 }
  0x78   : > { %3909 = vmatmul.mubr.bf16.gmra.mrb[12].mxu1 %v5160_v36  ;;  %4052 = vmatprep.subr.bf16.mxu0 %v4402_v59 }
  0x79   : > { %3925 = vmatpush3.bf16.msra.mxu1 %v4401_v7  ;;  %3928 = vmatprep.mubr.bf16.mxu1 %v3406_v53  ;;  %v5216_v7 = vld [vmem:[%s5667_s0 + $0x9c] sm:$0x1] }
  0x7a   : > { %3926 = vmatprep.subr.bf16.mxu1 %v4403_v40  ;;  %4037 = vmatmul.mubr.bf16.gmra.mrb[12].mxu0 %v3511_v58  ;;  %v4409_v58 = vld [vmem:[%s5669_s2 + $0xd0] sm:$0xff]   ;;  %v2168_v29 = vshll.u32 %v5216_v7, 16 }
  0x7b   : > { %4053 = vmatpush3.bf16.msra.mxu0 %v4402_v59  ;;  %4056 = vmatprep.mubr.bf16.mxu0 %v5003_v18  ;;  %v5227_v18 = vsel %vm4947_vm5, %v3572_v20, %v2360_v6  ;;  %v2364_v59 = vrot.slane %v5216_v7, 5  ;;  %v4416_v20 = vld [vmem:[%s5669_s2 + $0xe8] sm:$0xff]   ;;  %v4420_v6 = vld [vmem:[%s5669_s2 + $0x1f0] sm:$0xff]  }
  0x7c   : > { %4054 = vmatprep.subr.bf16.mxu0 %v4404_v47 }
  0x7d   : > { %3927 = vmatpush3.bf16.msra.mxu1 %v4403_v40  ;;  %v3590_v40 = vcombine.low %v5065_v27, %v5227_v18  ;;  %v5235_v53 = vsel %vm4947_vm5, %v3573_v0, %v2364_v59  ;;  %v5690_v0 = vcombine.low %v4596_v14, %v4616_v22  ;;  %v5691_v14 = vcombine.low %v4631_v31, %v4656_v50  ;;  %v5693_v50 = vld [vmem:[#allocation7_spill] sm:$0xff] }
  0x7e   : > { %3944 = vmatprep.subr.bf16.mxu1 %v4405_v25  ;;  %v3591_v28 = vcombine.low %v5168_v15, %v5235_v53  ;;  %v2162_v31 = vshll.u32 %v5196_v61, 16 }
  0x7f   : > { %4055 = vmatpush3.bf16.msra.mxu0 %v4404_v47  ;;  %v4411_v47 = vld [vmem:[%s5669_s2 + $0x1d0] sm:$0xff]  }
  0x80   : > { %3929 = vmatmul.mubr.bf16.vlgmr.msra.gmra.mrb[0].mxu1 %v5205_v5  ;;  %4072 = vmatprep.subr.bf16.mxu0 %v4406_v62 }
  0x81   : > { %3945 = vmatpush3.bf16.msra.mxu1 %v4405_v25  ;;  %3932 = vmatprep.mubr.bf16.mxu1 %v5223_v46  ;;  %v4412_v25 = vld [vmem:[%s5669_s2 + $0xd8] sm:$0xff]  }
  0x82   : > { %3946 = vmatprep.subr.bf16.mxu1 %v4407_v52  ;;  %4057 = vmatmul.mubr.bf16.vlgmr.msra.gmra.mrb[0].mxu0 %v5007_v49  ;;  %v3410_v49 = vcombine.low %v5105_v56, %v5075_v4  ;;  %v5272_v4 = vcombine.low %v5079_v8, %v5118_v55  ;;  %v4415_v56 = vld [vmem:[%s5669_s2 + $0x1e0] sm:$0xff]   ;;  %v4417_v8 = vld [vmem:[%s5669_s2 + $0x1e8] sm:$0xff]   ;;  %v2145_v55 = vshrl.u32 %v5187_v16, 16 }
  0x83   : > { %4073 = vmatpush3.bf16.msra.mxu0 %v4406_v62  ;;  %4060 = vmatprep.mubr.bf16.mxu0 %v5052_v35  ;;  %v3536_v35 = vcombine.low %v4744_v54, %v5187_v16  ;;  %v5282_v62 = vcombine.low %v5122_v48, %v5129_v2  ;;  %v2148_v48 = vshll.u32 %v5187_v16, 16  ;;  %v5298_v2 = vcombine.low %v5133_v12, %v5164_v9  ;;  %v4422_v9 = vld [vmem:[%s5669_s2 + $0x1f8] sm:$0xff]   ;;  %v4434_v54 = vld [vmem:[%s5669_s2 + $0x228] sm:$0xff]  }
  0x84   : > { %4074 = vmatprep.subr.bf16.mxu0 %v4408_v21  ;;  %v3537_v16 = vcombine.low %v4919_v43, %v5196_v61 }
  0x85   : > { %3947 = vmatpush3.bf16.msra.mxu1 %v4407_v52  ;;  %v2150_v12 = vrot.slane %v2148_v48, 5  ;;  %v4425_v52 = vld [vmem:[%s5669_s2 + $0x200] sm:$0xff]  }
  0x86   : > { %3948 = vmatprep.subr.bf16.mxu1 %v4409_v58 }
  0x87   : > { %4075 = vmatpush3.bf16.msra.mxu0 %v4408_v21  ;;  %v2154_v21 = vshll.u32 %v5201_v42, 16  ;;  %v5692_v42 = vld [vmem:[#allocation6_spill] sm:$0xff] }
  0x88   : > { %3933 = vmatmul.mubr.bf16.gmra.mrb[4].mxu1 %v5250_v11  ;;  %4076 = vmatprep.subr.bf16.mxu0 %v4411_v47 }
  0x89   : > { %3949 = vmatpush3.bf16.msra.mxu1 %v4409_v58  ;;  %3936 = vmatprep.mubr.bf16.mxu1 %v3410_v49  ;;  %v4426_v58 = vld [vmem:[%s5669_s2 + $0x208] sm:$0xff]  }
  0x8a   : > { %3950 = vmatprep.subr.bf16.mxu1 %v4412_v25  ;;  %4061 = vmatmul.mubr.bf16.gmra.mrb[4].mxu0 %v3536_v35  ;;  %v2164_v35 = vrot.slane %v2162_v31, 5 }
  0x8b   : > { %4077 = vmatpush3.bf16.msra.mxu0 %v4411_v47  ;;  %4064 = vmatprep.mubr.bf16.mxu0 %v5114_v63  ;;  %v4418_v63 = vld [vmem:[%s5669_s2 + $0xf0] sm:$0xff]   ;;  %v2156_v47 = vrot.slane %v2154_v21, 5 }
  0x8c   : > { %4078 = vmatprep.subr.bf16.mxu0 %v4413_v38 }
  0x8d   : > { %3951 = vmatpush3.bf16.msra.mxu1 %v4412_v25  ;;  %v2159_v25 = vshrl.u32 %v5196_v61, 16 }
  0x8e   : > { %3952 = vmatprep.subr.bf16.mxu1 %v4414_v13 }
  0x8f   : > { %4079 = vmatpush3.bf16.msra.mxu0 %v4413_v38  ;;  %v2161_v61 = vrot.slane %v2159_v25, 4  ;;  %v4433_v38 = vld [vmem:[%s5669_s2 + $0x220] sm:$0xff]  }
  0x90   : > { %3937 = vmatmul.mubr.bf16.gmra.mrb[8].mxu1 %v5272_v4  ;;  %4080 = vmatprep.subr.bf16.mxu0 %v4415_v56 }
  0x91   : > { %3953 = vmatpush3.bf16.msra.mxu1 %v4414_v13  ;;  %3940 = vmatprep.mubr.bf16.mxu1 %v5282_v62  ;;  %v5695_v13 = vld [vmem:[#allocation9_spill] sm:$0xff] }
  0x92   : > { %3954 = vmatprep.subr.bf16.mxu1 %v4416_v20  ;;  %4065 = vmatmul.mubr.bf16.gmra.mrb[8].mxu0 %v5140_v45  ;;  %v4421_v45 = vld [vmem:[%s5669_s2 + $0xf8] sm:$0xff]  }
  0x93   : > { %4081 = vmatpush3.bf16.msra.mxu0 %v4415_v56  ;;  %4068 = vmatprep.mubr.bf16.mxu0 %v5160_v36  ;;  %v2147_v36 = vrot.slane %v2145_v55, 4  ;;  %v2165_v56 = vor.u32 %v2164_v35, %v2161_v61 }
  0x94   : > { %4082 = vmatprep.subr.bf16.mxu0 %v4417_v8 }
  0x95   : > { %3955 = vmatpush3.bf16.msra.mxu1 %v4416_v20  ;;  %v2151_v59 = vor.u32 %v2150_v12, %v2147_v36  ;;  %v2166_v44 = vrot.slane %v2165_v56, 4 }
  0x96   : > { %3956 = vmatprep.subr.bf16.mxu1 %v4418_v63 }
  0x97   : > { %4083 = vmatpush3.bf16.msra.mxu0 %v4417_v8  ;;  %v2152_v22 = vrot.slane %v2151_v59, 4 }
  0x98   : > { %3941 = vmatmul.mubr.bf16.gmra.mrb[12].mxu1 %v5298_v2  ;;  %4084 = vmatprep.subr.bf16.mxu0 %v4420_v6 }
  0x99   : > { %3957 = vmatpush3.bf16.msra.mxu1 %v4418_v63  ;;  %3960 = vmatprep.mubr.bf16.mxu1 %v5690_v0  ;;  %v2157_v49 = vsel %vm4645_vm2, %v2152_v22, %v2156_v47 }
  0x9a   : > { %3958 = vmatprep.subr.bf16.mxu1 %v4421_v45  ;;  %4069 = vmatmul.mubr.bf16.gmra.mrb[12].mxu0 %v3537_v16 }
  0x9b   : > { %4085 = vmatpush3.bf16.msra.mxu0 %v4420_v6  ;;  %4088 = vmatprep.mubr.bf16.mxu0 %v4707_v23  ;;  %v4429_v23 = vld [vmem:[%s5669_s2 + $0x210] sm:$0xff]  }
  0x9c   : > { %4086 = vmatprep.subr.bf16.mxu0 %v4422_v9 }
  0x9d   : > { %3959 = vmatpush3.bf16.msra.mxu1 %v4421_v45 }
  0x9e   : > { %4172 = vmatprep.subr.bf16.mxu1 %v4425_v52 }
  0x9f   : > { %4087 = vmatpush3.bf16.msra.mxu0 %v4422_v9 }
  0xa0   : > { %3961 = vmatmul.mubr.bf16.vlgmr.msra.gmra.mrb[0].mxu1 %v5691_v14  ;;  %4104 = vmatprep.subr.bf16.mxu0 %v4425_v52 }
  0xa1   : > { %4180 = vmatpush3.bf16.msra.mxu1 %v4425_v52  ;;  %3964 = vmatprep.mubr.bf16.mxu1 %v3440_v32  ;;  %v3562_v32 = vcombine.low %v5694_v19, %v2157_v49 }
  0xa2   : > { %4173 = vmatprep.subr.bf16.mxu1 %v4426_v58  ;;  %4089 = vmatmul.mubr.bf16.vlgmr.msra.gmra.mrb[0].mxu0 %v5692_v42 }
  0xa3   : > { %4105 = vmatpush3.bf16.msra.mxu0 %v4425_v52  ;;  %4092 = vmatprep.mubr.bf16.mxu0 %v5693_v50 }
  0xa4   : > { %4106 = vmatprep.subr.bf16.mxu0 %v4426_v58 }
  0xa5   : > { %4181 = vmatpush3.bf16.msra.mxu1 %v4426_v58 }
  0xa6   : > { %4174 = vmatprep.subr.bf16.mxu1 %v4429_v23 }
  0xa7   : > { %4107 = vmatpush3.bf16.msra.mxu0 %v4426_v58 }
  0xa8   : > { %3965 = vmatmul.mubr.bf16.gmra.mrb[4].mxu1 %v3441_v39  ;;  %4108 = vmatprep.subr.bf16.mxu0 %v4429_v23  ;;  %v2170_v39 = vrot.slane %v2168_v29, 5 }
  0xa9   : > { %4182 = vmatpush3.bf16.msra.mxu1 %v4429_v23  ;;  %3968 = vmatprep.mubr.bf16.mxu1 %v3442_v57  ;;  %v4437_v57 = vld [vmem:[%s5669_s2 + $0x230] sm:$0xff]  }
  0xaa   : > { %4175 = vmatprep.subr.bf16.mxu1 %v4430_v17  ;;  %4093 = vmatmul.mubr.bf16.gmra.mrb[4].mxu0 %v3562_v32  ;;  %v2171_v60 = vsel %vm4645_vm2, %v2166_v44, %v2170_v39 }
  0xab   : > { %4109 = vmatpush3.bf16.msra.mxu0 %v4429_v23  ;;  %4096 = vmatprep.mubr.bf16.mxu0 %v5695_v13  ;;  %v3563_v10 = vcombine.low %v4984_v26, %v2171_v60 }
  0xac   : > { %4110 = vmatprep.subr.bf16.mxu0 %v4430_v17 }
  0xad   : > { %4183 = vmatpush3.bf16.msra.mxu1 %v4430_v17 }
  0xae   : > { %4176 = vmatprep.subr.bf16.mxu1 %v4433_v38 }
  0xaf   : > { %4111 = vmatpush3.bf16.msra.mxu0 %v4430_v17 }
  0xb0   : > { %3969 = vmatmul.mubr.bf16.gmra.mrb[8].mxu1 %v5696_v33  ;;  %4112 = vmatprep.subr.bf16.mxu0 %v4433_v38 }
  0xb1   : > { %4184 = vmatpush3.bf16.msra.mxu1 %v4433_v38  ;;  %3972 = vmatprep.mubr.bf16.mxu1 %v3444_v51 }
  0xb2   : > { %4177 = vmatprep.subr.bf16.mxu1 %v4434_v54  ;;  %4097 = vmatmul.mubr.bf16.gmra.mrb[8].mxu0 %v4942_v37 }
  0xb3   : > { %4113 = vmatpush3.bf16.msra.mxu0 %v4433_v38  ;;  %4100 = vmatprep.mubr.bf16.mxu0 %v4975_v24 }
  0xb4   : > { %4114 = vmatprep.subr.bf16.mxu0 %v4434_v54 }
  0xb5   : > { %4185 = vmatpush3.bf16.msra.mxu1 %v4434_v54 }
  0xb6   : > { %4178 = vmatprep.subr.bf16.mxu1 %v4437_v57 }
  0xb7   : > { %4115 = vmatpush3.bf16.msra.mxu0 %v4434_v54 }
  0xb8   : > { %3973 = vmatmul.mubr.bf16.gmra.mrb[12].mxu1 %v3445_v34  ;;  %4116 = vmatprep.subr.bf16.mxu0 %v4437_v57 }
  0xb9   : > { %4186 = vmatpush3.bf16.msra.mxu1 %v4437_v57  ;;  %4128 = vmatprep.mubr.bf16.mxu1 %v5272_v4 }
  0xba   : > { %4179 = vmatprep.subr.bf16.mxu1 %v4438_v30  ;;  %4101 = vmatmul.mubr.bf16.gmra.mrb[12].mxu0 %v3563_v10 }
  0xbb   : > { %4117 = vmatpush3.bf16.msra.mxu0 %v4437_v57  ;;  %4120 = vmatprep.mubr.bf16.mxu0 %v5205_v5 }
  0xbc   : > { %4118 = vmatprep.subr.bf16.mxu0 %v4438_v30 }
  0xbd   : > { %4187 = vmatpush3.bf16.msra.mxu1 %v4438_v30 }
  0xbf   : > { %4119 = vmatpush3.bf16.msra.mxu0 %v4438_v30 }
  0xc0   : > { %4129 = vmatmul.mubr.bf16.vlgmr.msra.gmra.mrb[16].mxu1 %v5282_v62 }
  0xc1   : > { %4132 = vmatprep.mubr.bf16.mxu1 %v5298_v2 }
  0xc2   : > { %4121 = vmatmul.mubr.bf16.vlgmr.msra.gmra.mrb[0].mxu0 %v5223_v46 }
  0xc3   : > { %4124 = vmatprep.mubr.bf16.mxu0 %v5250_v11 }
  0xc8   : > { %4133 = vmatmul.mubr.bf16.gmra.mrb[20].mxu1 %v3591_v28 }
  0xca   : > { %4125 = vmatmul.mubr.bf16.gmra.mrb[4].mxu0 %v3590_v40 }
 0x173   : > { %v3962_v41 = vpop.f32.mrb[0].mxu1 }
 0x174   : > { %v1449_v1 = vpop.f32.mrb[1].mxu1 }
 0x175   : > { %v3963_v3 = vpop.f32.mrb[2].mxu1 }
 0x176   : > { %v1452_v43 = vpop.f32.mrb[3].mxu1 }
 0x17b   : > { %v3966_v37 = vpop.f32.mrb[4].mxu1 }
 0x17c   : > { %v1465_v24 = vpop.f32.mrb[5].mxu1 }
 0x17d   : > { %v3967_v26 = vpop.f32.mrb[6].mxu1 }
 0x17e   : > { %v1468_v34 = vpop.f32.mrb[7].mxu1 }
 0x183   : > { %v3970_v51 = vpop.f32.mrb[8].mxu1 }
 0x184   : > { %v1481_v5 = vpop.f32.mrb[9].mxu1 }
 0x185   : > { %v3971_v7 = vpop.f32.mrb[10].mxu1  ;;  %v4098_v46 = vpop.f32.mrb[8].mxu0 }
 0x186   : > { %v1484_v11 = vpop.f32.mrb[11].mxu1  ;;  %v4196_v4 = vadd.f32 %v4098_v46, %v3970_v51  ;;  %v2309_v15 = vpop.f32.mrb[9].mxu0  ;;  %v4441_v46 = vld [vmem:[%s5668_s1 + $0x10] sm:$0xff] (!%p3600_p5)  }
 0x187   : > { %v4198_v53 = vadd.f32 %v2309_v15, %v1481_v5  ;;  %v4099_v28 = vpop.f32.mrb[10].mxu0 }
 0x188   : > { %v4200_v20 = vadd.f32 %v4099_v28, %v3971_v7  ;;  %v2312_v27 = vpop.f32.mrb[11].mxu0  ;;  %v4440_v7 = vld [vmem:[%s5668_s1 + $0x8] sm:$0xff] (!%p3600_p5)   ;;  %v4443_v28 = vld [vmem:[%s5668_s1 + $0x20] sm:$0xff] (!%p3600_p5)  }
 0x189   : > { %v4202_v18 = vadd.f32 %v2312_v27, %v1484_v11  ;;  %4146 = vmatprep.mubr.msk.bf16.mxu1 (!%p3600_p5), %vm2674_vm7, %v4443_v28  ;;  %v2553_v28 = vld [vmem:[#allocation2] sm:$0x1] (!%p3600_p5) }
 0x18b   : > { %v3974_v40 = vpop.f32.mrb[12].mxu1 }
 0x18c   : > { %v1497_v62 = vpop.f32.mrb[13].mxu1 }
 0x18d   : > { %v3975_v8 = vpop.f32.mrb[14].mxu1  ;;  %v4102_v63 = vpop.f32.mrb[12].mxu0 }
 0x18e   : > { %v1500_v55 = vpop.f32.mrb[15].mxu1  ;;  %v4204_v48 = vadd.f32 %v4102_v63, %v3974_v40  ;;  %v2325_v2 = vpop.f32.mrb[13].mxu0 }
 0x18f   : > { %v4206_v6 = vadd.f32 %v2325_v2, %v1497_v62  ;;  %v4103_v45 = vpop.f32.mrb[14].mxu0  ;;  %v4445_v62 = vld [vmem:[%s5668_s1 + $0x30] sm:$0xff] (!%p3600_p5)  }
 0x190   : > { %v4208_v16 = vadd.f32 %v4103_v45, %v3975_v8  ;;  %v2328_v36 = vpop.f32.mrb[15].mxu0 }
 0x191   : > { %v4210_v12 = vadd.f32 %v2328_v36, %v1500_v55 }
 0x193   : > { %v4130_v9 = vpop.f32.mrb[16].mxu1 }
 0x194   : > { %v5388_v0 = vadd.f32 %v4196_v4, %v4130_v9  ;;  %v2503_v52 = vpop.f32.mrb[17].mxu1  ;;  %v4446_v9 = vld [vmem:[%s5668_s1 + $0x38] sm:$0xff] (!%p3600_p5)  }
 0x195   : > { %v5390_v59 = vadd.f32 %v4198_v53, %v2503_v52  ;;  %v4131_v21 = vpop.f32.mrb[18].mxu1  ;;  %v4122_v58 = vpop.f32.mrb[0].mxu0 }
 0x196   : > { %v5392_v14 = vadd.f32 %v4200_v20, %v4131_v21  ;;  %v2506_v22 = vpop.f32.mrb[19].mxu1  ;;  %v5394_v47 = vadd.f32 %v4122_v58, %v3962_v41  ;;  %v2471_v23 = vpop.f32.mrb[1].mxu0  ;;  %v4444_v20 = vld [vmem:[%s5668_s1 + $0x28] sm:$0xff] (!%p3600_p5)  }
 0x197   : > { %v5396_v42 = vadd.f32 %v4202_v18, %v2506_v22  ;;  %v5398_v25 = vadd.f32 %v2471_v23, %v1449_v1  ;;  %v4123_v31 = vpop.f32.mrb[2].mxu0  ;;  %v2588_v23 = vmul.f32 (!%p3600_p5), %v5388_v0, %v5388_v0 }
 0x198   : > { %v5400_v50 = vadd.f32 %v4123_v31, %v3963_v3  ;;  %v2474_v49 = vpop.f32.mrb[3].mxu0 }
 0x199   : > { %v5402_v17 = vadd.f32 %v2474_v49, %v1452_v43  ;;  %v2578_v1 = vmul.f32 (!%p3600_p5), %v5398_v25, %v5398_v25  ;;  %v2587_v21 = vmul.f32 (!%p3600_p5), %v5396_v42, %v5396_v42 }
 0x19a   : > { %v2581_v51 = vmul.f32 (!%p3600_p5), %v5400_v50, %v5400_v50 }
 0x19b   : > { %v4134_v19 = vpop.f32.mrb[20].mxu1  ;;  %2552 = sbr.rel (%p3600_p5) target bundleno = 683 (0x2ab), region = 60  ;;  %v2554_v41 = vadd.f32 (!%p3600_p5), %v5402_v17, %v5398_v25  ;;  %v2579_v3 = vmul.f32 (!%p3600_p5), %v5402_v17, %v5402_v17 }
 0x19c   : > { %v5404_v32 = vadd.f32 %v4204_v48, %v4134_v19  ;;  %v2519_v61 = vpop.f32.mrb[21].mxu1  ;;  %v2589_v19 = vmul.f32 (!%p3600_p5), %v5392_v14, %v5392_v14 }
 0x19d   : > { %v5406_v35 = vadd.f32 %v4206_v6, %v2519_v61  ;;  %v4135_v38 = vpop.f32.mrb[22].mxu1  ;;  %v4126_v13 = vpop.f32.mrb[4].mxu0  ;;  %v2555_v43 = vadd.f32 (!%p3600_p5), %v5394_v47, %v2554_v41  ;;  %v2594_v5 = vadd.f32 (!%p3600_p5), %v2579_v3, %v2578_v1 }
 0x19e   : > { %v5408_v56 = vadd.f32 %v4208_v16, %v4135_v38  ;;  %v2522_v29 = vpop.f32.mrb[23].mxu1  ;;  %v5410_v54 = vadd.f32 %v4126_v13, %v3966_v37  ;;  %v2487_v33 = vpop.f32.mrb[5].mxu0  ;;  %v2580_v37 = vmul.f32 (!%p3600_p5), %v5394_v47, %v5394_v47  ;;  %v2586_v16 = vmul.f32 (!%p3600_p5), %v5390_v59, %v5390_v59 }
 0x19f   : > { %v5412_v44 = vadd.f32 %v4210_v12, %v2522_v29  ;;  %v5414_v39 = vadd.f32 %v2487_v33, %v1465_v24  ;;  %v4127_v57 = vpop.f32.mrb[6].mxu0  ;;  %v4439_v24 = vld [vmem:[%s5668_s1] sm:$0xff] (!%p3600_p5)   ;;  %v4442_v12 = vld [vmem:[%s5668_s1 + $0x18] sm:$0xff] (!%p3600_p5)   ;;  %v2590_v13 = vmul.f32 (!%p3600_p5), %v5406_v35, %v5406_v35  ;;  %v2592_v1 = vmul.f32 (!%p3600_p5), %v5404_v32, %v5404_v32 }
 0x1a0   : > { %v5416_v60 = vadd.f32 %v4127_v57, %v3967_v26  ;;  %v2490_v30 = vpop.f32.mrb[7].mxu0  ;;  %v2633_v26 = vld [vmem:[%s5672_s5] sm:$0x3] (!%p3600_p5)  ;;  %v2595_v15 = vadd.f32 (!%p3600_p5), %v2594_v5, %v2580_v37  ;;  %4138 = vmatprep.mubr.msk.bf16.mxu0 (!%p3600_p5), %vm2674_vm7, %v4439_v24  ;;  %v2584_v63 = vmul.f32 (!%p3600_p5), %v5410_v54, %v5410_v54  ;;  %v2593_v37 = vmul.f32 (!%p3600_p5), %v5408_v56, %v5408_v56 }
 0x1a1   : > { %v5418_v10 = vadd.f32 %v2490_v30, %v1468_v34  ;;  %v2556_v34 = vadd.f32 (!%p3600_p5), %v5400_v50, %v2555_v43  ;;  %v2582_v4 = vmul.f32 (!%p3600_p5), %v5414_v39, %v5414_v39  ;;  %4320 = vmatprep.subr.msk.bf16.mxu0 (!%p3600_p5), %vm2699_vm6, %v2633_v26  ;;  %v2701_v53 = vsel (!%p3600_p5), %vm2699_vm6, %v2633_v26, 0  ;;  %4321 = vmatprep.subr.msk.bf16.mxu1 (!%p3600_p5), %vm2699_vm6, %v2633_v26 }
 0x1a2   : > { %4137 = vmatpush3.bf16.msra.mxu0 %v2701_v53  ;;  %v2596_v40 = vadd.f32 %v2595_v15, %v2581_v51  ;;  %4317 = vmatpush3.bf16.msra.mxu1 %v2701_v53  ;;  %v2585_v2 = vmul.f32 %v5416_v60, %v5416_v60  ;;  %v2591_v57 = vmul.f32 %v5412_v44, %v5412_v44 }
 0x1a3   : > { %v2557_v11 = vadd.f32 %v5414_v39, %v2556_v34  ;;  %v2583_v18 = vmul.f32 %v5418_v10, %v5418_v10 }
 0x1a4   : > { %v2597_v55 = vadd.f32 %v2596_v40, %v2582_v4 }
 0x1a5   : > { %v2558_v27 = vadd.f32 %v5418_v10, %v2557_v11  ;;  %4139 = vmatmul.mubr.msk.bf16.vlgmr.msra.gmra.mrb[0].mxu0 %vm2674_vm7, %v4440_v7  ;;  %4147 = vmatmul.mubr.msk.bf16.vlgmr.msra.gmra.mrb[0].mxu1 %vm2674_vm7, %v4444_v20 }
 0x1a6   : > { %4142 = vmatprep.mubr.msk.bf16.mxu0 %vm2674_vm7, %v4441_v46  ;;  %v2598_v6 = vadd.f32 %v2597_v55, %v2583_v18  ;;  %4150 = vmatprep.mubr.msk.bf16.mxu1 %vm2674_vm7, %v4445_v62  ;;  %v2577_v62 = vld [vmem:[#allocation3] sm:$0x1] }
 0x1a7   : > { %v2559_v8 = vadd.f32 %v5410_v54, %v2558_v27 }
 0x1a8   : > { %v2599_v36 = vadd.f32 %v2598_v6, %v2584_v63 }
 0x1a9   : > { %v2560_v48 = vadd.f32 %v5416_v60, %v2559_v8 }
 0x1aa   : > { %v2600_v58 = vadd.f32 %v2599_v36, %v2585_v2 }
 0x1ab   : > { %v2561_v45 = vadd.f32 %v5390_v59, %v2560_v48 }
 0x1ac   : > { %v2601_v31 = vadd.f32 %v2600_v58, %v2586_v16 }
 0x1ad   : > { %v2562_v52 = vadd.f32 %v5396_v42, %v2561_v45  ;;  %4143 = vmatmul.mubr.msk.bf16.gmra.mrb[4].mxu0 %vm2674_vm7, %v4442_v12  ;;  %4151 = vmatmul.mubr.msk.bf16.gmra.mrb[4].mxu1 %vm2674_vm7, %v4446_v9 }
 0x1ae   : > { %v2602_v61 = vadd.f32 %v2601_v31, %v2587_v21 }
 0x1af   : > { %v2563_v22 = vadd.f32 %v5388_v0, %v2562_v52 }
 0x1b0   : > { %v2603_v29 = vadd.f32 %v2602_v61, %v2588_v23 }
 0x1b1   : > { %v2564_v49 = vadd.f32 %v5392_v14, %v2563_v22 }
 0x1b2   : > { %v2604_v30 = vadd.f32 %v2603_v29, %v2589_v19 }
 0x1b3   : > { %v2565_v38 = vadd.f32 %v5406_v35, %v2564_v49 }
 0x1b4   : > { %v2605_v3 = vadd.f32 %v2604_v30, %v2590_v13 }
 0x1b5   : > { %v2566_v33 = vadd.f32 %v5412_v44, %v2565_v38 }
 0x1b6   : > { %v2606_v24 = vadd.f32 %v2605_v3, %v2591_v57 }
 0x1b7   : > { %v2567_v41 = vadd.f32 %v5404_v32, %v2566_v33 }
 0x1b8   : > { %v2607_v34 = vadd.f32 %v2606_v24, %v2592_v1 }
 0x1b9   : > { %v2568_v43 = vadd.f32 %v5408_v56, %v2567_v41 }
 0x1ba   : > { %v2608_v5 = vadd.f32 %v2607_v34, %v2593_v37 }
 0x1bb   : > { %v2569_v26 = vrot.slane %v2568_v43, 4 }
 0x1bc   : > { %v2609_v46 = vrot.slane %v2608_v5, 4 }
 0x1bd   : > { %v2570_v51 = vadd.f32 %v2569_v26, %v2568_v43 }
 0x1be   : > { %v2610_v4 = vadd.f32 %v2609_v46, %v2608_v5 }
 0x1bf   : > { %v2571_v7 = vrot.slane %v2570_v51, 2 }
 0x1c0   : > { %v2611_v53 = vrot.slane %v2610_v4, 2 }
 0x1c1   : > { %v2572_v11 = vadd.f32 %v2571_v7, %v2570_v51 }
 0x1c2   : > { %v2612_v27 = vadd.f32 %v2611_v53, %v2610_v4 }
 0x1c3   : > { %v2573_v15 = vrot.slane %v2572_v11, 1 }
 0x1c4   : > { %v2613_v40 = vrot.slane %v2612_v27, 1 }
 0x1c5   : > { %v2574_v20 = vadd.f32 %v2573_v15, %v2572_v11 }
 0x1c6   : > { %v2614_v8 = vadd.f32 %v2613_v40, %v2612_v27 }
 0x1c7   : > { %v2575_v18 = vadd.f32 %v2574_v20, %v2553_v28 }
 0x1c8   : > { %v2615_v63 = vadd.f32 %v2614_v8, %v2577_v62 }
 0x1c9   : > { %2576 = vst [vmem:[#allocation2] sm:$0x1] %v2575_v18 }
 0x1ca   : > { %2616 = vst [vmem:[#allocation3] sm:$0x1] %v2615_v63 }
 0x278   : > { %v4140_v55 = vpop.f32.mrb[0].mxu0  ;;  %v4148_v2 = vpop.f32.mrb[0].mxu1 }
 0x279   : > { %v2737_v48 = vpop.f32.mrb[1].mxu0  ;;  %v2769_v45 = vpop.f32.mrb[1].mxu1  ;;  %v2827_v58 = vmul.f32 %v4140_v55, %v4140_v55  ;;  %v2835_v18 = vmul.f32 %v4148_v2, %v4148_v2 }
 0x27a   : > { %v4141_v6 = vpop.f32.mrb[2].mxu0  ;;  %v4149_v36 = vpop.f32.mrb[2].mxu1  ;;  %v2825_v12 = vmul.f32 %v2737_v48, %v2737_v48  ;;  %v2833_v4 = vmul.f32 %v2769_v45, %v2769_v45 }
 0x27b   : > { %v2740_v16 = vpop.f32.mrb[3].mxu0  ;;  %v2772_v21 = vpop.f32.mrb[3].mxu1  ;;  %v2828_v31 = vmul.f32 %v4141_v6, %v4141_v6  ;;  %v2836_v8 = vmul.f32 %v4149_v36, %v4149_v36 }
 0x27c   : > { %v2801_v9 = vadd.f32 %v2740_v16, %v2737_v48  ;;  %v2826_v52 = vmul.f32 %v2740_v16, %v2740_v16  ;;  %v2834_v27 = vmul.f32 %v2772_v21, %v2772_v21 }
 0x27e   : > { %v2802_v22 = vadd.f32 %v4140_v55, %v2801_v9  ;;  %v2841_v23 = vadd.f32 %v2826_v52, %v2825_v12 }
 0x280   : > { %v2842_v49 = vadd.f32 %v2841_v23, %v2827_v58  ;;  %v4144_v19 = vpop.f32.mrb[4].mxu0  ;;  %v2803_v61 = vadd.f32 %v4141_v6, %v2802_v22  ;;  %v4152_v13 = vpop.f32.mrb[4].mxu1 }
 0x281   : > { %v2753_v38 = vpop.f32.mrb[5].mxu0  ;;  %v2785_v41 = vpop.f32.mrb[5].mxu1  ;;  %v2831_v34 = vmul.f32 %v4144_v19, %v4144_v19  ;;  %v2839_v58 = vmul.f32 %v4152_v13, %v4152_v13 }
 0x282   : > { %v2804_v29 = vadd.f32 %v2803_v61, %v2753_v38  ;;  %v2829_v33 = vmul.f32 %v2753_v38, %v2753_v38  ;;  %v2843_v57 = vadd.f32 %v2842_v49, %v2828_v31  ;;  %v4145_v30 = vpop.f32.mrb[6].mxu0  ;;  %v4153_v3 = vpop.f32.mrb[6].mxu1  ;;  %v2837_v48 = vmul.f32 %v2785_v41, %v2785_v41 }
 0x283   : > { %v2756_v1 = vpop.f32.mrb[7].mxu0  ;;  %v2788_v26 = vpop.f32.mrb[7].mxu1  ;;  %v2832_v7 = vmul.f32 %v4145_v30, %v4145_v30 }
 0x284   : > { %v2844_v43 = vadd.f32 %v2843_v57, %v2829_v33  ;;  %v2805_v37 = vadd.f32 %v2804_v29, %v2756_v1  ;;  %v2830_v24 = vmul.f32 %v2756_v1, %v2756_v1  ;;  %v2838_v52 = vmul.f32 %v2788_v26, %v2788_v26 }
 0x286   : > { %v2806_v51 = vadd.f32 %v4144_v19, %v2805_v37  ;;  %v2845_v5 = vadd.f32 %v2844_v43, %v2830_v24  ;;  %v2824_v37 = vld [vmem:[#allocation5] sm:$0x1] }
 0x288   : > { %v2846_v46 = vadd.f32 %v2845_v5, %v2831_v34  ;;  %v2807_v11 = vadd.f32 %v4145_v30, %v2806_v51 }
 0x28a   : > { %v2808_v15 = vadd.f32 %v2807_v11, %v2769_v45  ;;  %v2847_v53 = vadd.f32 %v2846_v46, %v2832_v7  ;;  %v2840_v45 = vmul.f32 %v4153_v3, %v4153_v3 }
 0x28c   : > { %v2848_v28 = vadd.f32 %v2847_v53, %v2833_v4  ;;  %v2809_v20 = vadd.f32 %v2808_v15, %v2772_v21 }
 0x28e   : > { %v2810_v40 = vadd.f32 %v4148_v2, %v2809_v20  ;;  %v2849_v62 = vadd.f32 %v2848_v28, %v2834_v27 }
 0x290   : > { %v2850_v63 = vadd.f32 %v2849_v62, %v2835_v18  ;;  %v2811_v55 = vadd.f32 %v4149_v36, %v2810_v40 }
 0x292   : > { %v2812_v6 = vadd.f32 %v2811_v55, %v2785_v41  ;;  %v2851_v16 = vadd.f32 %v2850_v63, %v2836_v8  ;;  %v2800_v41 = vld [vmem:[#allocation4] sm:$0x1] }
 0x294   : > { %v2852_v12 = vadd.f32 %v2851_v16, %v2837_v48  ;;  %v2813_v9 = vadd.f32 %v2812_v6, %v2788_v26 }
 0x296   : > { %v2814_v22 = vadd.f32 %v4152_v13, %v2813_v9  ;;  %v2853_v23 = vadd.f32 %v2852_v12, %v2838_v52 }
 0x298   : > { %v2815_v31 = vadd.f32 %v4153_v3, %v2814_v22  ;;  %v2854_v49 = vadd.f32 %v2853_v23, %v2839_v58 }
 0x29a   : > { %v2816_v19 = vrot.slane %v2815_v31, 4  ;;  %v2855_v21 = vadd.f32 %v2854_v49, %v2840_v45 }
 0x29c   : > { %v2817_v61 = vadd.f32 %v2816_v19, %v2815_v31  ;;  %v2856_v2 = vrot.slane %v2855_v21, 4 }
 0x29e   : > { %v2818_v38 = vrot.slane %v2817_v61, 2  ;;  %v2857_v29 = vadd.f32 %v2856_v2, %v2855_v21 }
 0x2a0   : > { %v2819_v33 = vadd.f32 %v2818_v38, %v2817_v61  ;;  %v2858_v36 = vrot.slane %v2857_v29, 2 }
 0x2a2   : > { %v2820_v57 = vrot.slane %v2819_v33, 1  ;;  %v2859_v30 = vadd.f32 %v2858_v36, %v2857_v29 }
 0x2a4   : > { %v2821_v1 = vadd.f32 %v2820_v57, %v2819_v33  ;;  %v2860_v43 = vrot.slane %v2859_v30, 1 }
 0x2a6   : > { %v2822_v24 = vadd.f32 %v2821_v1, %v2800_v41  ;;  %v2861_v13 = vadd.f32 %v2860_v43, %v2859_v30 }
 0x2a8   : > { %2823 = vst [vmem:[#allocation4] sm:$0x1] %v2822_v24  ;;  %v2862_v26 = vadd.f32 %v2861_v13, %v2824_v37 }
 0x2aa   : > { %2863 = vst [vmem:[#allocation5] sm:$0x1] %v2862_v26 }
 0x2ab PF: > { %p3617_p6 = scmp.ne.s32.totalorder %s4473_s27, 1 }
 0x2ac   : > { %v2942_v3 = vld [vmem:[%s5672_s5] sm:$0x3] (!%p3617_p6)  ;;  %vm3008_vm8 = vcmask (!%p3617_p6), 1041408   ;;  %vm2983_vm9 = vcmask (!%p3617_p6), 31744   ;;  %v4449_v7 = vld [vmem:[%s5668_s1 + $0x8] sm:$0xff] (!%p3617_p6)   ;;  %v4451_v11 = vld [vmem:[%s5668_s1 + $0x10] sm:$0xff] (!%p3617_p6)   ;;  %v2883_v22 = vlaneseq (!%p3617_p6) }
 0x2ad   : > { %2867 = sbr.rel (%p3617_p6) target bundleno = 926 (0x39e), region = 64  ;;  %v4447_v34 = vld [vmem:[%s5668_s1] sm:$0xff] (!%p3617_p6)   ;;  %4322 = vmatprep.subr.msk.bf16.mxu0 (!%p3617_p6), %vm3008_vm8, %v2942_v3  ;;  %4323 = vmatprep.subr.msk.bf16.mxu1 (!%p3617_p6), %vm3008_vm8, %v2942_v3  ;;  %v3010_v51 = vsel (!%p3617_p6), %vm3008_vm8, %v2942_v3, 0  ;;  %v4450_v46 = vld [vmem:[%s5668_s1 + $0x28] sm:$0xff] (!%p3617_p6)   ;;  %v4452_v4 = vld [vmem:[%s5668_s1 + $0x30] sm:$0xff] (!%p3617_p6)  }
 0x2ae   : > { %4155 = vmatpush3.bf16.msra.mxu0 (!%p3617_p6), %v3010_v51  ;;  %4319 = vmatpush3.bf16.msra.mxu1 (!%p3617_p6), %v3010_v51  ;;  %v4448_v5 = vld [vmem:[%s5668_s1 + $0x20] sm:$0xff] (!%p3617_p6)   ;;  %v4453_v15 = vld [vmem:[%s5668_s1 + $0x18] sm:$0xff] (!%p3617_p6)   ;;  %v2884_v49 = vshrl.u32 (!%p3617_p6), %v2883_v22, 7 }
 0x2af   : > { %4156 = vmatprep.mubr.msk.bf16.mxu0 (!%p3617_p6), %vm2983_vm9, %v4447_v34  ;;  %4164 = vmatprep.mubr.msk.bf16.mxu1 (!%p3617_p6), %vm2983_vm9, %v4448_v5  ;;  %v4454_v53 = vld [vmem:[%s5668_s1 + $0x38] sm:$0xff] (!%p3617_p6)   ;;  %v2868_v28 = vld [vmem:[#allocation2] sm:$0x1] (!%p3617_p6)  ;;  %v2870_v27 = vld [vmem:[#allocation3] sm:$0x1] (!%p3617_p6) }
 0x2b0   : > { %v2869_v20 = vmul.f32 (!%p3617_p6), 0.0078125, %v2868_v28  ;;  %v3109_v18 = vld [vmem:[#allocation4] sm:$0x1] (!%p3617_p6)  ;;  %v2871_v40 = vmul.f32 (!%p3617_p6), 0.0078125, %v2870_v27  ;;  %v2875_v45 = vld [vmem:[%s5670_s3] sm:$0x1] (!%p3617_p6) }
 0x2b1   : > { %4157 = vmatmul.mubr.msk.bf16.vlgmr.msra.gmra.mrb[0].mxu0 (!%p3617_p6), %vm2983_vm9, %v4449_v7  ;;  %4165 = vmatmul.mubr.msk.bf16.vlgmr.msra.gmra.mrb[0].mxu1 (!%p3617_p6), %vm2983_vm9, %v4450_v46  ;;  %v3110_v8 = vmul.f32 (!%p3617_p6), 0.0078125, %v3109_v18  ;;  %v3111_v63 = vld [vmem:[#allocation5] sm:$0x1] (!%p3617_p6)  ;;  %v3116_v21 = vld [vmem:[%s5673_s6] sm:$0x1] (!%p3617_p6)  ;;  %v2885_v2 = vsub.s32 (!%p3617_p6), 0, %v2884_v49 }
 0x2b2   : > { %4160 = vmatprep.mubr.msk.bf16.mxu0 (!%p3617_p6), %vm2983_vm9, %v4451_v11  ;;  %4168 = vmatprep.mubr.msk.bf16.mxu1 (!%p3617_p6), %vm2983_vm9, %v4452_v4  ;;  %v2872_v62 = vmul.f32 (!%p3617_p6), %v2869_v20, %v2869_v20  ;;  %v3112_v48 = vmul.f32 (!%p3617_p6), 0.0078125, %v3111_v63  ;;  %v2879_v29 = vld [vmem:[%s5671_s4] sm:$0x1] (!%p3617_p6) }
 0x2b3   : > { %v3113_v6 = vmul.f32 (!%p3617_p6), %v3110_v8, %v3110_v8  ;;  %v3120_v30 = vld [vmem:[%s5674_s7] sm:$0x1] (!%p3617_p6) }
 0x2b4   : > { %v2873_v55 = vsub.f32 %v2871_v40, %v2872_v62 }
 0x2b5   : > { %v3114_v12 = vsub.f32 %v3112_v48, %v3113_v6 }
 0x2b6   : > { %v2874_v16 = vmax.f32 %v2873_v55, 0.0 }
 0x2b7   : > { %v3115_v52 = vmax.f32 %v3114_v12, 0.0 }
 0x2b8   : > { %v2876_v9 = vadd.f32 1e-05, %v2874_v16 }
 0x2b9   : > { %4161 = vmatmul.mubr.msk.bf16.gmra.mrb[4].mxu0 %vm2983_vm9, %v4453_v15  ;;  %4169 = vmatmul.mubr.msk.bf16.gmra.mrb[4].mxu1 %vm2983_vm9, %v4454_v53  ;;  %v3117_v58 = vadd.f32 1e-05, %v3115_v52 }
 0x2ba   : > { %4455 = vrsqrt.f32 %v2876_v9 }
 0x2bb   : > { %4457 = vrsqrt.f32 %v3117_v58 }
 0x2c4   : > { %v4456_v23 = vpop.eup %4455 }
 0x2c5   : > { %v2878_v31 = vmul.f32 %v4456_v23, %v2875_v45  ;;  %v4458_v19 = vpop.eup %4457 }
 0x2c6   : > { %v3119_v38 = vmul.f32 %v4458_v19, %v3116_v21 }
 0x2c7   : > { %v2880_v61 = vmul.f32 %v2878_v31, %v2869_v20  ;;  %v2886_v36 = vrot.slane %v2878_v31, %v2885_v2 }
 0x2c8   : > { %v3121_v57 = vmul.f32 %v3119_v38, %v3110_v8  ;;  %v5564_v7 = vrot.slane %v3119_v38, %v2885_v2 }
 0x2c9   : > { %v2881_v33 = vsub.f32 %v2879_v29, %v2880_v61  ;;  %v2890_v41 = vmul.f32 %v5394_v47, %v2886_v36  ;;  %v2898_v37 = vmul.f32 %v5388_v0, %v2886_v36  ;;  %v2888_v24 = vmul.f32 %v5398_v25, %v2886_v36 }
 0x2ca   : > { %v3122_v43 = vsub.f32 %v3120_v30, %v3121_v57  ;;  %v2896_v13 = vmul.f32 %v5390_v59, %v2886_v36  ;;  %v2891_v26 = vmul.f32 %v5400_v50, %v2886_v36  ;;  %v2899_v3 = vmul.f32 %v5392_v14, %v2886_v36 }
 0x2cb   : > { %v5553_v1 = vrot.slane %v2881_v33, %v2885_v2  ;;  %v2889_v34 = vmul.f32 %v5402_v17, %v2886_v36  ;;  %v2897_v51 = vmul.f32 %v5396_v42, %v2886_v36  ;;  %v2894_v5 = vmul.f32 %v5410_v54, %v2886_v36 }
 0x2cc   : > { %v2902_v47 = vmul.f32 %v5404_v32, %v2886_v36  ;;  %v2892_v0 = vmul.f32 %v5414_v39, %v2886_v36  ;;  %v2900_v25 = vmul.f32 %v5406_v35, %v2886_v36  ;;  %v5569_v46 = vrot.slane %v3122_v43, %v2885_v2 }
 0x2cd   : > { %v2912_v59 = vadd.f32 %v5553_v1, %v2890_v41  ;;  %v2920_v14 = vadd.f32 %v5553_v1, %v2898_v37  ;;  %v2910_v50 = vadd.f32 %v5553_v1, %v2888_v24  ;;  %v2918_v42 = vadd.f32 %v5553_v1, %v2896_v13 }
 0x2ce   : > { %v2913_v17 = vadd.f32 %v5553_v1, %v2891_v26  ;;  %v2921_v32 = vadd.f32 %v5553_v1, %v2899_v3  ;;  %v2911_v11 = vadd.f32 %v5553_v1, %v2889_v34  ;;  %v2919_v39 = vadd.f32 %v5553_v1, %v2897_v51 }
 0x2cf   : > { %v5579_v35 = vadd.f32 %v5553_v1, %v2894_v5  ;;  %v5582_v4 = vadd.f32 %v5553_v1, %v2902_v47  ;;  %v5586_v20 = vadd.f32 %v5553_v1, %v2892_v0  ;;  %v5589_v27 = vadd.f32 %v5553_v1, %v2900_v25 }
 0x2d0   : > { %v2895_v18 = vmul.f32 %v5416_v60, %v2886_v36  ;;  %v2903_v55 = vmul.f32 %v5408_v56, %v2886_v36  ;;  %v2893_v48 = vmul.f32 %v5418_v10, %v2886_v36  ;;  %v2901_v60 = vmul.f32 %v5412_v44, %v2886_v36 }
 0x384   : > { %v4158_v54 = vpop.f32.mrb[0].mxu0  ;;  %v4166_v53 = vpop.f32.mrb[0].mxu1 }
 0x385   : > { %v3131_v15 = vmul.f32 %v4158_v54, %v5564_v7  ;;  %v3046_v28 = vpop.f32.mrb[1].mxu0  ;;  %v3139_v40 = vmul.f32 %v4166_v53, %v5564_v7  ;;  %v3078_v8 = vpop.f32.mrb[1].mxu1 }
 0x386   : > { %v3129_v62 = vmul.f32 %v5564_v7, %v3046_v28  ;;  %v4159_v63 = vpop.f32.mrb[2].mxu0  ;;  %v3137_v16 = vmul.f32 %v5564_v7, %v3078_v8  ;;  %v4167_v9 = vpop.f32.mrb[2].mxu1 }
 0x387   : > { %v3153_v6 = vadd.f32 %v5569_v46, %v3131_v15  ;;  %v3132_v12 = vmul.f32 %v4159_v63, %v5564_v7  ;;  %v3049_v52 = vpop.f32.mrb[3].mxu0  ;;  %v3161_v58 = vadd.f32 %v5569_v46, %v3139_v40  ;;  %v3140_v23 = vmul.f32 %v4167_v9, %v5564_v7  ;;  %v3081_v45 = vpop.f32.mrb[3].mxu1 }
 0x388   : > { %v3151_v22 = vadd.f32 %v5569_v46, %v3129_v62  ;;  %v3130_v56 = vmul.f32 %v5564_v7, %v3049_v52  ;;  %v3159_v31 = vadd.f32 %v5569_v46, %v3137_v16  ;;  %v3138_v19 = vmul.f32 %v5564_v7, %v3081_v45 }
 0x389   : > { %v3169_v10 = vadd.f32 %v3153_v6, %v2912_v59  ;;  %v3154_v49 = vadd.f32 %v5569_v46, %v3132_v12  ;;  %v3177_v21 = vadd.f32 %v3161_v58, %v2920_v14  ;;  %v3162_v44 = vadd.f32 %v5569_v46, %v3140_v23 }
 0x38a   : > { %v3167_v61 = vadd.f32 %v3151_v22, %v2910_v50  ;;  %v3152_v2 = vadd.f32 %v5569_v46, %v3130_v56  ;;  %v3175_v29 = vadd.f32 %v3159_v31, %v2918_v42  ;;  %v3160_v36 = vadd.f32 %v5569_v46, %v3138_v19 }
 0x38b   : > { %v3185_v38 = vmax.f32 %v3169_v10, 0.0  ;;  %v3170_v33 = vadd.f32 %v3154_v49, %v2913_v17  ;;  %v3193_v57 = vmax.f32 %v3177_v21, 0.0  ;;  %v3178_v41 = vadd.f32 %v3162_v44, %v2921_v32 }
 0x38c   : > { %v3183_v30 = vmax.f32 %v3167_v61, 0.0  ;;  %v3168_v43 = vadd.f32 %v3152_v2, %v2911_v11  ;;  %v4162_v37 = vpop.f32.mrb[4].mxu0  ;;  %v3191_v24 = vmax.f32 %v3175_v29, 0.0  ;;  %v3176_v26 = vadd.f32 %v3160_v36, %v2919_v39  ;;  %v4170_v34 = vpop.f32.mrb[4].mxu1 }
 0x38d   : > { %v3186_v13 = vmax.f32 %v3170_v33, 0.0  ;;  %v3135_v3 = vmul.f32 %v4162_v37, %v5564_v7  ;;  %v3062_v51 = vpop.f32.mrb[5].mxu0  ;;  %v3194_v5 = vmax.f32 %v3178_v41, 0.0  ;;  %v3143_v0 = vmul.f32 %v4170_v34, %v5564_v7  ;;  %v3094_v59 = vpop.f32.mrb[5].mxu1 }
 0x38e   : > { %v3184_v47 = vmax.f32 %v3168_v43, 0.0  ;;  %v3133_v25 = vmul.f32 %v5564_v7, %v3062_v51  ;;  %v4163_v14 = vpop.f32.mrb[6].mxu0  ;;  %v3192_v42 = vmax.f32 %v3176_v26, 0.0  ;;  %v3141_v32 = vmul.f32 %v5564_v7, %v3094_v59  ;;  %v4171_v54 = vpop.f32.mrb[6].mxu1 }
 0x38f   : > { %v3647_v50 = vpack.c.bf16 %v3186_v13, %v3185_v38  ;;  %v3157_v17 = vadd.f32 %v5569_v46, %v3135_v3  ;;  %v3065_v11 = vpop.f32.mrb[7].mxu0  ;;  %v3667_v39 = vpack.c.bf16 %v3194_v5, %v3193_v57  ;;  %v3165_v53 = vadd.f32 %v5569_v46, %v3143_v0  ;;  %v3097_v40 = vpop.f32.mrb[7].mxu1 }
 0x390   : > { %v3642_v15 = vpack.c.bf16 %v3184_v47, %v3183_v30  ;;  %v3155_v28 = vadd.f32 %v5569_v46, %v3133_v25  ;;  %v3662_v62 = vpack.c.bf16 %v3192_v42, %v3191_v24  ;;  %v3163_v8 = vadd.f32 %v5569_v46, %v3141_v32 }
 0x391   : > { %3679 = vst [vmem:[%s5675_s8 + $0x8] sm:$0xff] %v3647_v50   ;;  %v2917_v63 = vadd.f32 %v5553_v1, %v2895_v18  ;;  %v3136_v6 = vmul.f32 %v4163_v14, %v5564_v7  ;;  %3683 = vst [vmem:[%s5675_s8 + $0x28] sm:$0xff] %v3667_v39   ;;  %v2925_v16 = vadd.f32 %v5553_v1, %v2903_v55 }
 0x392   : > { %3643 = vst [vmem:[%s5675_s8] sm:$0xff] %v3642_v15   ;;  %v3144_v12 = vmul.f32 %v4171_v54, %v5564_v7  ;;  %v2915_v9 = vadd.f32 %v5553_v1, %v2893_v48  ;;  %v3134_v52 = vmul.f32 %v5564_v7, %v3065_v11  ;;  %3682 = vst [vmem:[%s5675_s8 + $0x20] sm:$0xff] %v3662_v62  }
 0x393   : > { %v3173_v18 = vadd.f32 %v3157_v17, %v5579_v35  ;;  %v3158_v58 = vadd.f32 %v5569_v46, %v3136_v6  ;;  %v2923_v22 = vadd.f32 %v5553_v1, %v2901_v60  ;;  %v3142_v23 = vmul.f32 %v5564_v7, %v3097_v40 }
 0x394   : > { %v3181_v55 = vadd.f32 %v3165_v53, %v5582_v4  ;;  %v3171_v56 = vadd.f32 %v3155_v28, %v5586_v20  ;;  %v3166_v48 = vadd.f32 %v5569_v46, %v3144_v12  ;;  %v3156_v45 = vadd.f32 %v5569_v46, %v3134_v52 }
 0x395   : > { %v3179_v10 = vadd.f32 %v3163_v8, %v5589_v27  ;;  %v3174_v31 = vadd.f32 %v3158_v58, %v2917_v63  ;;  %v3164_v49 = vadd.f32 %v5569_v46, %v3142_v23  ;;  %v3189_v21 = vmax.f32 %v3173_v18, 0.0 }
 0x396   : > { %v3182_v35 = vadd.f32 %v3166_v48, %v2925_v16  ;;  %v3172_v19 = vadd.f32 %v3156_v45, %v2915_v9  ;;  %v3197_v60 = vmax.f32 %v3181_v55, 0.0  ;;  %v3187_v7 = vmax.f32 %v3171_v56, 0.0 }
 0x397   : > { %v3190_v61 = vmax.f32 %v3174_v31, 0.0  ;;  %v3180_v1 = vadd.f32 %v3164_v49, %v2923_v22  ;;  %v3195_v2 = vmax.f32 %v3179_v10, 0.0 }
 0x398   : > { %v3198_v44 = vmax.f32 %v3182_v35, 0.0  ;;  %v3188_v4 = vmax.f32 %v3172_v19, 0.0 }
 0x399   : > { %v3657_v20 = vpack.c.bf16 %v3190_v61, %v3189_v21  ;;  %v3196_v38 = vmax.f32 %v3180_v1, 0.0 }
 0x39a   : > { %v3677_v29 = vpack.c.bf16 %v3198_v44, %v3197_v60  ;;  %v3652_v33 = vpack.c.bf16 %v3188_v4, %v3187_v7 }
 0x39b   : > { %3681 = vst [vmem:[%s5675_s8 + $0x18] sm:$0xff] %v3657_v20   ;;  %v3672_v27 = vpack.c.bf16 %v3196_v38, %v3195_v2 }
 0x39c   : > { %3685 = vst [vmem:[%s5675_s8 + $0x38] sm:$0xff] %v3677_v29   ;;  %3680 = vst [vmem:[%s5675_s8 + $0x10] sm:$0xff] %v3652_v33  }
 0x39d   : > { %3684 = vst [vmem:[%s5675_s8 + $0x30] sm:$0xff] %v3672_v27  }
 0x39e PF: > { %s18_s29 = sadd.s32 1, %s4481_s29   ;;  %s5697_s27 = smov %s4477_s28 }
 0x39f   : > { %p15_p7 = scmp.ge.s32.totalorder %s18_s29, 4   ;;  %s5698_s28 = smov %s5700_s30 }
 0x3a1   :  { %17 = sbr.rel (!%p15_p7) target bundleno = 2 (0x2), region = 105 }

</bundles_post_ra>
